<compile_context>
chip_gen: v5e
topology: v5e:2x2
jax: 0.10.0
libtpu: 0.0.40
codegen_flags: <defaults>
</compile_context>

<pallas_src>
import functools

import jax
import jax.numpy as jnp
from jax.experimental import pallas as pl
from jax.experimental.pallas import tpu as pltpu  # noqa: F401  (TPU backend)


# ----------------------------------------------------------------------------
# fused kernel
# ----------------------------------------------------------------------------
def _mhsa_kernel(x_ref, wqkv_ref, bqkv_ref, wo_ref, bo_ref, o_ref, *,
                 n_heads, head_dim):
    """Fused multi-head self-attention over the whole (B, S, D) batch.

    x_ref    : (B, S, D)      f32 input patch embeddings
    wqkv_ref : (D, 3*H*hd)    bf16, [Wq | Wk | Wv], head-major inside each
                              block; 1/sqrt(hd) pre-folded into the Wq block
    bqkv_ref : (1, 3*H*hd)    f32 packed bias (same layout / same scale fold)
    wo_ref   : (H*hd, D)      bf16 output projection (head-major input axis)
    bo_ref   : (1, D)         f32
    o_ref    : (B, S, D)
    """
    f32, bf16 = jnp.float32, jnp.bfloat16
    B, S, D = x_ref.shape
    H, hd = n_heads, head_dim

    # ---- fused Q/K/V projection: one lane-dense matmul over all tokens ----
    x2 = x_ref[...].reshape(B * S, D).astype(bf16)              # (BS, D)
    qkv = jnp.dot(x2, wqkv_ref[...],
                  preferred_element_type=f32) + bqkv_ref[...]   # (BS, 3*H*hd)

    def split_heads(cols):                                      # -> (B*H, S, hd)
        t = cols.reshape(B, S, H, hd)
        return jnp.transpose(t, (0, 2, 1, 3)).reshape(B * H, S, hd)

    q = split_heads(qkv[:, 0 * H * hd:1 * H * hd])   # already scaled by 1/sqrt(hd)
    k = split_heads(qkv[:, 1 * H * hd:2 * H * hd])
    v = split_heads(qkv[:, 2 * H * hd:3 * H * hd])

    # ---- scaled dot-product attention, (B*H) as the single batch dim ----
    s = jnp.einsum('nqe,nke->nqk', q.astype(bf16), k.astype(bf16),
                   preferred_element_type=f32)                  # (BH, S, S)
    s = s - jnp.max(s, axis=-1, keepdims=True)
    p = jnp.exp(s)
    # Approximate EUP reciprocal: error is far below the bf16 rounding of the
    # following P@V matmul (documented; use approx=False for bit-closer parity).
    p = p * pl.reciprocal(jnp.sum(p, axis=-1, keepdims=True), approx=True)

    ctx = jnp.einsum('nqk,nke->nqe', p.astype(bf16), v.astype(bf16),
                     preferred_element_type=f32)                # (BH, S, hd)

    # ---- head concat + output projection as ONE matmul ----
    ctx = jnp.transpose(ctx.reshape(B, H, S, hd), (0, 2, 1, 3))  # (B, S, H, hd)
    ctx = ctx.reshape(B * S, H * hd)
    out = jnp.dot(ctx.astype(bf16), wo_ref[...],
                  preferred_element_type=f32) + bo_ref[...]     # (BS, D)

    o_ref[...] = out.reshape(B, S, D).astype(o_ref.dtype)


def mhsa_pallas(x, kparams, *, n_heads, head_dim):
    """x: (B, S, D) -> (B, S, D) multi-head self-attention + output projection."""
    B, S, D = x.shape
    return pl.pallas_call(
        functools.partial(_mhsa_kernel, n_heads=n_heads, head_dim=head_dim),
        out_shape=jax.ShapeDtypeStruct((B, S, D), x.dtype),
        # grid=() (default): activations + packed weights total ~15 KiB, so
        # everything lives whole-array in VMEM; a batch grid at B=2 would only
        # add per-step overhead and duplicate weight DMAs.
    )(x, kparams['wqkv'], kparams['bqkv'], kparams['wo'], kparams['bo'])


# ----------------------------------------------------------------------------
# module wrapper (parameters)
# ----------------------------------------------------------------------------
class MultiHeadSelfAttentionPallas:
    """Pallas port of vit.MultiHeadSelfAttention (eval mode)."""

    def __init__(self, n_heads=4, embed_dim=32, qkv_dim=8, dropout_rate=0.1,
                 seed=0):
        self.n_heads = n_heads
        self.embed_dim = embed_dim
        self.qkv_dim = qkv_dim
        self.dropout_rate = dropout_rate   # identity in eval mode

        key = jax.random.PRNGKey(seed)
        ks = jax.random.split(key, 8)

        def nrm(k, shape):
            return jax.random.normal(k, shape, jnp.float32) * 0.02

        H, D, hd = n_heads, embed_dim, qkv_dim
        # Semantic (PyTorch-layout) f32 parameters — used by the reference.
        self.params = dict(
            # per-head q/k/v Linear(embed_dim -> qkv_dim), stacked over heads
            wq=nrm(ks[0], (H, D, hd)), bq=nrm(ks[1], (H, 1, hd)),
            wk=nrm(ks[2], (H, D, hd)), bk=nrm(ks[3], (H, 1, hd)),
            wv=nrm(ks[4], (H, D, hd)), bv=nrm(ks[5], (H, 1, hd)),
            # projection Linear(n_heads*qkv_dim -> embed_dim), split by head
            wo=nrm(ks[6], (H, hd, D)), bo=nrm(ks[7], (1, D)),
        )

        # Kernel-packed parameters, built ONCE at init:
        #  * Wq/Wk/Wv fused into a single (D, 3*H*hd) bf16 weight + one bias,
        #  * 1/sqrt(hd) folded into the Wq/bq block (init-time fold),
        #  * Wo flattened to (H*hd, D) bf16 so the head-sum rides the MXU.
        p = self.params
        scale = 1.0 / float(hd) ** 0.5

        def pack_w(w):                     # (H, D, hd) -> (D, H*hd), head-major
            return jnp.transpose(w, (1, 0, 2)).reshape(D, H * hd)

        def pack_b(b):                     # (H, 1, hd) -> (1, H*hd), head-major
            return b.reshape(1, H * hd)

        self.kparams = dict(
            wqkv=jnp.concatenate(
                [pack_w(p['wq']) * scale, pack_w(p['wk']), pack_w(p['wv'])],
                axis=1).astype(jnp.bfloat16),                    # (D, 3*H*hd)
            bqkv=jnp.concatenate(
                [pack_b(p['bq']) * scale, pack_b(p['bk']), pack_b(p['bv'])],
                axis=1),                                         # (1, 3*H*hd) f32
            wo=p['wo'].reshape(H * hd, D).astype(jnp.bfloat16),  # (H*hd, D)
            bo=p['bo'],                                          # (1, D) f32
        )

    def __call__(self, x):
        return mhsa_pallas(x, self.kparams,
                           n_heads=self.n_heads, head_dim=self.qkv_dim)


# ----------------------------------------------------------------------------
# pure-JAX f32 reference (numerical sanity check)
# ----------------------------------------------------------------------------
def mhsa_reference(x, p, *, head_dim):
    q = jnp.einsum('bsd,hde->bhse', x, p['wq']) + p['bq'][None]
    k = jnp.einsum('bsd,hde->bhse', x, p['wk']) + p['bk'][None]
    v = jnp.einsum('bsd,hde->bhse', x, p['wv']) + p['bv'][None]
    s = jnp.einsum('bhqe,bhke->bhqk', q, k) / jnp.sqrt(jnp.float32(head_dim))
    a = jax.nn.softmax(s, axis=-1)
    ctx = jnp.einsum('bhqk,bhke->bhqe', a, v)
    return jnp.einsum('bhqe,hed->bqd', ctx, p['wo']) + p['bo'][None]


# ----------------------------------------------------------------------------
if __name__ == "__main__":
    B, S = 2, 17                       # S = H*W + 1 (16 patches + CLS token)
    n_heads, embed_dim, qkv_dim = 4, 32, 8

    model = MultiHeadSelfAttentionPallas(n_heads=n_heads, embed_dim=embed_dim,
                                         qkv_dim=qkv_dim, dropout_rate=0.1,
                                         seed=0)
    x = jax.random.normal(jax.random.PRNGKey(0), (B, S, embed_dim), jnp.float32)

    out = jax.block_until_ready(model(x))

    assert out.shape == (B, S, embed_dim)
    assert bool(jnp.all(jnp.isfinite(out)))

    ref = mhsa_reference(x, model.params, head_dim=qkv_dim)
    err = float(jnp.max(jnp.abs(out - ref)))
    assert bool(jnp.allclose(out, ref, atol=2e-3, rtol=2e-2)), (
        "max abs err = %g" % err)

    print("KERNEL_OK")
</pallas_src>

<mosaic_0001>
module attributes {stable_mosaic.version = 11 : i64} {
  func.func @_mhsa_kernel(%arg0: memref<2x17x32xf32, #tpu.memory_space<vmem>>, %arg1: memref<32x96xbf16, #tpu.memory_space<vmem>>, %arg2: memref<1x96xf32, #tpu.memory_space<vmem>>, %arg3: memref<32x32xbf16, #tpu.memory_space<vmem>>, %arg4: memref<1x32xf32, #tpu.memory_space<vmem>>, %arg5: memref<2x17x32xf32, #tpu.memory_space<vmem>>) attributes {dimension_semantics = [], scalar_prefetch = 0 : i64, scratch_operands = 0 : i64, tpu.core_type = #tpu.core_type<tc>} {
    %c0 = arith.constant 0 : index
    %c0_0 = arith.constant 0 : index
    %c0_1 = arith.constant 0 : index
    %0 = vector.load %arg0[%c0, %c0_0, %c0_1] : memref<2x17x32xf32, #tpu.memory_space<vmem>>, vector<2x17x32xf32>
    %1 = vector.shape_cast %0 : vector<2x17x32xf32> to vector<34x32xf32>
    %2 = arith.truncf %1 : vector<34x32xf32> to vector<34x32xbf16>
    %c0_2 = arith.constant 0 : index
    %c0_3 = arith.constant 0 : index
    %3 = vector.load %arg1[%c0_2, %c0_3] : memref<32x96xbf16, #tpu.memory_space<vmem>>, vector<32x96xbf16>
    %cst = arith.constant dense<0.000000e+00> : vector<34x96xf32>
    %4 = tpu.matmul %2, %3, %cst {dimension_numbers = #tpu.dot_dimension_numbers<[1], [0], [0], [1], [0, 0, 1, 1], [], []>} : vector<34x32xbf16>, vector<32x96xbf16>, vector<34x96xf32> -> vector<34x96xf32>
    %c0_4 = arith.constant 0 : index
    %c0_5 = arith.constant 0 : index
    %5 = vector.load %arg2[%c0_4, %c0_5] : memref<1x96xf32, #tpu.memory_space<vmem>>, vector<1x96xf32>
    %6 = vector.broadcast %5 : vector<1x96xf32> to vector<34x96xf32>
    %7 = arith.addf %4, %6 : vector<34x96xf32>
    %8 = vector.extract_strided_slice %7 {offsets = [0, 0], sizes = [34, 32], strides = [1, 1]} : vector<34x96xf32> to vector<34x32xf32>
    %9 = vector.shape_cast %8 : vector<34x32xf32> to vector<2x17x4x8xf32>
    %10 = tpu.transpose %9, [0, 2, 1, 3] : vector<2x17x4x8xf32> -> vector<2x4x17x8xf32>
    %11 = vector.shape_cast %10 : vector<2x4x17x8xf32> to vector<8x17x8xf32>
    %12 = vector.extract_strided_slice %7 {offsets = [0, 32], sizes = [34, 32], strides = [1, 1]} : vector<34x96xf32> to vector<34x32xf32>
    %13 = vector.shape_cast %12 : vector<34x32xf32> to vector<2x17x4x8xf32>
    %14 = tpu.transpose %13, [0, 2, 1, 3] : vector<2x17x4x8xf32> -> vector<2x4x17x8xf32>
    %15 = vector.shape_cast %14 : vector<2x4x17x8xf32> to vector<8x17x8xf32>
    %16 = vector.extract_strided_slice %7 {offsets = [0, 64], sizes = [34, 32], strides = [1, 1]} : vector<34x96xf32> to vector<34x32xf32>
    %17 = vector.shape_cast %16 : vector<34x32xf32> to vector<2x17x4x8xf32>
    %18 = tpu.transpose %17, [0, 2, 1, 3] : vector<2x17x4x8xf32> -> vector<2x4x17x8xf32>
    %19 = vector.shape_cast %18 : vector<2x4x17x8xf32> to vector<8x17x8xf32>
    %20 = arith.truncf %11 : vector<8x17x8xf32> to vector<8x17x8xbf16>
    %21 = arith.truncf %15 : vector<8x17x8xf32> to vector<8x17x8xbf16>
    "tpu.trace_start"() <{level = 10 : i32, message = "nqe,nke->nqk"}> : () -> ()
    %cst_6 = arith.constant dense<0.000000e+00> : vector<8x17x17xf32>
    %22 = tpu.matmul %20, %21, %cst_6 {dimension_numbers = #tpu.dot_dimension_numbers<[2], [2], [1], [1], [0, 0, 0, 1, 1, 1], [0], [0]>} : vector<8x17x8xbf16>, vector<8x17x8xbf16>, vector<8x17x17xf32> -> vector<8x17x17xf32>
    "tpu.trace_stop"() : () -> ()
    %cst_7 = arith.constant dense<0xFF800000> : vector<8x17xf32>
    %23 = vector.multi_reduction <maximumf>, %22, %cst_7 [2] : vector<8x17x17xf32> to vector<8x17xf32>
    %24 = vector.shape_cast %23 : vector<8x17xf32> to vector<8x17x1xf32>
    %25 = vector.broadcast %24 : vector<8x17x1xf32> to vector<8x17x17xf32>
    %26 = arith.subf %22, %25 : vector<8x17x17xf32>
    %27 = math.exp %26 : vector<8x17x17xf32>
    %cst_8 = arith.constant dense<0.000000e+00> : vector<8x17xf32>
    %28 = vector.multi_reduction <add>, %27, %cst_8 [2] : vector<8x17x17xf32> to vector<8x17xf32>
    %29 = vector.shape_cast %28 : vector<8x17xf32> to vector<8x17x1xf32>
    %30 = tpu.reciprocal %29 {approx = true} : vector<8x17x1xf32> -> vector<8x17x1xf32>
    %31 = vector.broadcast %30 : vector<8x17x1xf32> to vector<8x17x17xf32>
    %32 = arith.mulf %27, %31 : vector<8x17x17xf32>
    %33 = arith.truncf %32 : vector<8x17x17xf32> to vector<8x17x17xbf16>
    %34 = arith.truncf %19 : vector<8x17x8xf32> to vector<8x17x8xbf16>
    "tpu.trace_start"() <{level = 10 : i32, message = "nqk,nke->nqe"}> : () -> ()
    %cst_9 = arith.constant dense<0.000000e+00> : vector<8x17x8xf32>
    %35 = tpu.matmul %33, %34, %cst_9 {dimension_numbers = #tpu.dot_dimension_numbers<[2], [1], [1], [2], [0, 0, 0, 1, 1, 2], [0], [0]>} : vector<8x17x17xbf16>, vector<8x17x8xbf16>, vector<8x17x8xf32> -> vector<8x17x8xf32>
    "tpu.trace_stop"() : () -> ()
    %36 = vector.shape_cast %35 : vector<8x17x8xf32> to vector<2x4x17x8xf32>
    %37 = tpu.transpose %36, [0, 2, 1, 3] : vector<2x4x17x8xf32> -> vector<2x17x4x8xf32>
    %38 = vector.shape_cast %37 : vector<2x17x4x8xf32> to vector<34x32xf32>
    %39 = arith.truncf %38 : vector<34x32xf32> to vector<34x32xbf16>
    %c0_10 = arith.constant 0 : index
    %c0_11 = arith.constant 0 : index
    %40 = vector.load %arg3[%c0_10, %c0_11] : memref<32x32xbf16, #tpu.memory_space<vmem>>, vector<32x32xbf16>
    %cst_12 = arith.constant dense<0.000000e+00> : vector<34x32xf32>
    %41 = tpu.matmul %39, %40, %cst_12 {dimension_numbers = #tpu.dot_dimension_numbers<[1], [0], [0], [1], [0, 0, 1, 1], [], []>} : vector<34x32xbf16>, vector<32x32xbf16>, vector<34x32xf32> -> vector<34x32xf32>
    %c0_13 = arith.constant 0 : index
    %c0_14 = arith.constant 0 : index
    %42 = vector.load %arg4[%c0_13, %c0_14] : memref<1x32xf32, #tpu.memory_space<vmem>>, vector<1x32xf32>
    %43 = vector.broadcast %42 : vector<1x32xf32> to vector<34x32xf32>
    %44 = arith.addf %41, %43 : vector<34x32xf32>
    %45 = vector.shape_cast %44 : vector<34x32xf32> to vector<2x17x32xf32>
    %c0_15 = arith.constant 0 : index
    %c0_16 = arith.constant 0 : index
    %c0_17 = arith.constant 0 : index
    %46 = vector.load %arg5[%c0_15, %c0_16, %c0_17] : memref<2x17x32xf32, #tpu.memory_space<vmem>>, vector<2x17x32xf32>
    tpu.vector_store %arg5[%c0_15, %c0_16, %c0_17], %45 {strides = array<i32>} : memref<2x17x32xf32, #tpu.memory_space<vmem>>, vector<2x17x32xf32>,
    return
  }
}

</mosaic_0001>

<bundles_post_ra>
// kernel: tpu_custom_call.1
= control target key start
LH: loop header
LB: loop body
LE: loop exit
PB: predicated region body
PF: predicated region fallthrough
CT: control target
= control target key end

     0   :  { %vm135_vm0 = vcmask 261120   ;;  %s3973_s10 = smov 112   ;;  %v3975_v59 = vmov 1983009808   ;;  %vm219_vm1 = vcmask 1047556   ;;  %s3976_s11 = smov 96   ;;  %s5888_s1 = inlined_call_operand.vmem [shape: bf16[32,96], index: 1, kind: input, shape index: {}]   ;;  %s5889_s0 = inlined_call_operand.vmem [shape: f32[2,17,32], index: 0, kind: input, shape index: {}]   ;;  %s5890_s2 = inlined_call_operand.vmem [shape: f32[1,96], index: 2, kind: input, shape index: {}]   ;;  %s5891_s3 = inlined_call_operand.vmem [shape: bf16[32,32], index: 3, kind: input, shape index: {}]   ;;  %s5892_s4 = inlined_call_operand.vmem [shape: f32[1,32], index: 4, kind: input, shape index: {}]   ;;  %s5893_s5 = inlined_call_operand.vmem [shape: f32[2,17,32], index: 5, kind: output, shape index: {}]  }
   0x1   :  { %v3698_v0 = vld [vmem:[%s5888_s1 + $0x8] sm:$0xff]  ;;  %v21_v1 = vld [vmem:[%s5889_s0] sm:$0xff]  ;;  %v24_v19 = vld [vmem:[%s5889_s0 + $0x18] sm:$0xff]  ;;  %v224_v60 = vunpack.c.l.s4 %v3975_v59  ;;  %s3978_s12 = smov 64   ;;  %vm1891_vm2 = vcmask 64512   ;;  %vm2244_vm3 = vcmask 138240  }
   0x2   :  { %v33_v2 = vrot.slane %v21_v1, 1  ;;  %v34_v3 = vrot.slane %v21_v1, 2  ;;  %v35_v4 = vrot.slane %v21_v1, 3  ;;  %151 = vmatpush.bf16.msra.mxu0 %v3698_v0  ;;  %v3697_v5 = vld [vmem:[%s5888_s1] sm:$0xff]  ;;  %v36_v6 = vrot.slane %v21_v1, 4  ;;  %v22_v10 = vld [vmem:[%s5889_s0 + $0x8] sm:$0xff] }
   0x3   :  { %61 = vst [vmem:[#allocation1] ss:$9 sm:$0xff] %v21_v1  ;;  %v37_v7 = vrot.slane %v21_v1, 5  ;;  %v38_v8 = vrot.slane %v21_v1, 6  ;;  %v39_v9 = vrot.slane %v21_v1, 7  ;;  %v40_v11 = vrot.slane %v22_v10, 1 }
   0x4   :  { %63 = vst [vmem:[#allocation1 + $0x1] ss:$9 sm:$0xff] %v33_v2  ;;  %v41_v12 = vrot.slane %v22_v10, 2  ;;  %v42_v13 = vrot.slane %v22_v10, 3  ;;  %v43_v15 = vrot.slane %v22_v10, 4  ;;  %v44_v16 = vrot.slane %v22_v10, 5 }
   0x5   :  { %65 = vst [vmem:[#allocation1 + $0x2] ss:$9 sm:$0xff] %v34_v3  ;;  %v45_v17 = vrot.slane %v22_v10, 6  ;;  %v46_v18 = vrot.slane %v22_v10, 7  ;;  %v23_v20 = vld [vmem:[%s5889_s0 + $0x10] sm:$0x1]  ;;  %v4079_v3 = vunpack.c.0.s8 %v224_v60 }
   0x6   :  { %67 = vst [vmem:[#allocation1 + $0x3] ss:$9 sm:$0xff] %v35_v4  ;;  %152 = vmatpush.bf16.msra.mxu0 %v3697_v5  ;;  %v47_v21 = vrot.slane %v24_v19, 1  ;;  %v48_v23 = vrot.slane %v24_v19, 2  ;;  %v49_v25 = vrot.slane %v24_v19, 3  ;;  %v50_v26 = vrot.slane %v24_v19, 4 }
   0x7   :  { %69 = vst [vmem:[#allocation1 + $0x4] ss:$9 sm:$0xff] %v36_v6  ;;  %v51_v27 = vrot.slane %v24_v19, 5  ;;  %v52_v28 = vrot.slane %v24_v19, 6  ;;  %v25_v29 = vld [vmem:[%s5889_s0 + $0x20] sm:$0xff]  ;;  %v53_v30 = vrot.slane %v24_v19, 7 }
   0x8   :  { %71 = vst [vmem:[#allocation1 + $0x5] ss:$9 sm:$0xff] %v37_v7  ;;  %v54_v31 = vrot.slane %v25_v29, 1  ;;  %v55_v32 = vrot.slane %v25_v29, 2  ;;  %v56_v34 = vrot.slane %v25_v29, 3  ;;  %v57_v35 = vrot.slane %v25_v29, 4 }
   0x9   :  { %73 = vst [vmem:[#allocation1 + $0x6] ss:$9 sm:$0xff] %v38_v8  ;;  %v58_v36 = vrot.slane %v25_v29, 5  ;;  %v59_v37 = vrot.slane %v25_v29, 6  ;;  %v60_v38 = vrot.slane %v25_v29, 7  ;;  %vm2581_vm4 = vcmask 1040384  }
   0xa   :  { %75 = vst [vmem:[#allocation1 + $0x7] ss:$9 sm:$0xff] %v39_v9  ;;  %v26_v39 = vld [vmem:[%s5889_s0 + $0x28] sm:$0x1]  ;;  %v3874_v45 = vld [vmem:[%s5890_s2] ss:$0 sm:$0xff] }
   0xb   :  { %s3972_s0 = smov 104   ;;  %s3974_s2 = smov 120   ;;  %vm2251_vm5 = vcmask 131072   ;;  %vm3478_vm6 = vcmask 130048   ;;  %vm3484_vm7 = vcmask 195584   ;;  %vm3634_vm8 = vcmask 253952  }
   0xc   :  { %s3980_s13 = smov 16   ;;  %s3981_s14 = smov 24  }
   0xd   :  { %s3982_s15 = smov 8  }
  0x11   :  { %v76_v14 = vld [vmem:[#allocation1] sm:$0xff] }
  0x12   :  { %77 = vst [vmem:[#allocation1] ss:$9 sm:$0xff] %v22_v10 }
  0x13   :  { %78 = vst [vmem:[#allocation1 + $0x1] ss:$9 sm:$0xff] %v40_v11 }
  0x14   :  { %79 = vst [vmem:[#allocation1 + $0x2] ss:$9 sm:$0xff] %v41_v12 }
  0x15   :  { %80 = vst [vmem:[#allocation1 + $0x3] ss:$9 sm:$0xff] %v42_v13 }
  0x16   :  { %81 = vst [vmem:[#allocation1 + $0x4] ss:$9 sm:$0xff] %v43_v15 }
  0x17   :  { %82 = vst [vmem:[#allocation1 + $0x5] ss:$9 sm:$0xff] %v44_v16 }
  0x18   :  { %83 = vst [vmem:[#allocation1 + $0x6] ss:$9 sm:$0xff] %v45_v17 }
  0x19   :  { %84 = vst [vmem:[#allocation1 + $0x7] ss:$9 sm:$0xff] %v46_v18 }
  0x20   :  { %v85_v22 = vld [vmem:[#allocation1] sm:$0xff] }
  0x21   :  { %v112_v24 = vpack.c.bf16 %v85_v22, %v76_v14  ;;  %86 = vst [vmem:[#allocation1] ss:$9 sm:$0xff] %v23_v20 }
  0x22   :  { %87 = vst [vmem:[#allocation1 + $0x1] ss:$9 sm:$0xff] %v24_v19 }
  0x23   :  { %3651 = vmatmul.msk.bf16.vlgmr.msra.gmra.mxu0 %vm135_vm0, %v112_v24  ;;  %88 = vst [vmem:[#allocation1 + $0x2] ss:$9 sm:$0xff] %v47_v21 }
  0x24   :  { %89 = vst [vmem:[#allocation1 + $0x3] ss:$9 sm:$0xff] %v48_v23 }
  0x25   :  { %90 = vst [vmem:[#allocation1 + $0x4] ss:$9 sm:$0xff] %v49_v25 }
  0x26   :  { %91 = vst [vmem:[#allocation1 + $0x5] ss:$9 sm:$0xff] %v50_v26 }
  0x27   :  { %92 = vst [vmem:[#allocation1 + $0x6] ss:$9 sm:$0xff] %v51_v27 }
  0x28   :  { %93 = vst [vmem:[#allocation1 + $0x7] ss:$9 sm:$0xff] %v52_v28  ;;  %v3977_v28 = vmov 1934713408  }
  0x2f   :  { %v94_v33 = vld [vmem:[#allocation1] sm:$0xff] }
  0x30   :  { %95 = vst [vmem:[#allocation1] ss:$9 sm:$0xff] %v53_v30 }
  0x31   :  { %96 = vst [vmem:[#allocation1 + $0x1] ss:$9 sm:$0xff] %v25_v29  ;;  %v248_v29 = vunpack.c.l.s4 %v3977_v28 }
  0x32   :  { %97 = vst [vmem:[#allocation1 + $0x2] ss:$9 sm:$0xff] %v54_v31 }
  0x33   :  { %98 = vst [vmem:[#allocation1 + $0x3] ss:$9 sm:$0xff] %v55_v32 }
  0x34   :  { %99 = vst [vmem:[#allocation1 + $0x4] ss:$9 sm:$0xff] %v56_v34 }
  0x35   :  { %100 = vst [vmem:[#allocation1 + $0x5] ss:$9 sm:$0xff] %v57_v35  ;;  %v4117_v35 = vunpack.c.0.s8 %v248_v29 }
  0x36   :  { %101 = vst [vmem:[#allocation1 + $0x6] ss:$9 sm:$0xff] %v58_v36 }
  0x37   :  { %102 = vst [vmem:[#allocation1 + $0x7] ss:$9 sm:$0xff] %v59_v37 }
  0x3e   :  { %v103_v40 = vld [vmem:[#allocation1] sm:$0xff] }
  0x3f   :  { %v113_v41 = vpack.c.bf16 %v103_v40, %v94_v33  ;;  %104 = vst [vmem:[#allocation1] ss:$9 sm:$0xff] %v60_v38 }
  0x40   :  { %105 = vst [vmem:[#allocation1 + $0x1] ss:$9 sm:$0xff] %v26_v39 }
  0x41   :  { %3652 = vmatmul.msk.bf16.gmra.mxu0 %vm135_vm0, %v113_v41 }
  0x47   :  { %v106_v42 = vld [vmem:[#allocation1] sm:$0xff] }
  0x48   :  { %v114_v43 = vpack.c.bf16 %v106_v42, %v106_v42 }
  0x51   :  { %3653 = vmatmul.msk.bf16.gmra.mxu0 %vm135_vm0, %v114_v43 }
  0xa0   :  { %v154_v44 = vpop.f32.mrf.mxu0 }
  0xa1   :  { %v4043_v47 = vadd.f32 %v3874_v45, %v154_v44 }
  0xa3   :  { %v221_v26 = vrot.slane %v4043_v47, 4 }
  0xa8   :  { %v156_v46 = vpop.f32.mrf.mxu0 }
  0xa9   :  { %v4045_v48 = vadd.f32 %v3874_v45, %v156_v46 }
  0xab   :  { %205 = vrot.lane.b32.xlu1 %v4045_v48, %s3972_s0  ;;  %v4051_v49 = vpack.i.bf16 %v4045_v48, %v4043_v47  ;;  %v277_v0 = vrot.slane %v4045_v48, 4 }
  0xad   :  { %3715 = vrot.lane.b32.xlu0 %v4051_v49, %s3973_s10 }
  0xbe   :  { %v159_v50 = vpop.f32.mrf.mxu0 }
  0xbf   :  { %v4055_v51 = vadd.f32 %v3874_v45, %v159_v50 }
  0xc1   :  { %192 = vrot.lane.b32.xlu2 %v4055_v51, %s3973_s10  ;;  %v3724_v52 = vpack.i.bf16 %v4043_v47, %v4055_v51  ;;  %v333_v23 = vrot.slane %v4055_v51, 4 }
  0xc3   :  { %3725 = vrot.lane.b32.xlu1 %v3724_v52, %s3974_s2  ;;  %3720 = vrot.lane.b32.xlu0 %v3724_v52, %s3972_s0 }
  0xc6   :  { %v161_v53 = vpop.f32.mrf.mxu0 }
  0xc7   :  { %v4063_v54 = vadd.f32 %v3874_v45, %v161_v53 }
  0xc9   :  { %5901 = vst [vmem:[#allocation2_spill] sm:$0xff] %v4063_v54  ;;  %175 = vrot.lane.b32.xlu2 %v4045_v48, %s3974_s2 }
  0xce   :  { %v164_v55 = vpop.f32.mrf.mxu0 }
  0xcf   :  { %v4067_v56 = vadd.f32 %v3874_v45, %v164_v55 }
  0xd1   :  { %5902 = vst [vmem:[#allocation3_spill] sm:$0xff] %v4067_v56  ;;  %v4125_v40 = vpack.i.bf16 %v4063_v54, %v4067_v56 }
  0xd6   :  { %v166_v57 = vpop.f32.mrf.mxu0 }
 0x11b   :  { %v4069_v58 = vpop.permute.xlu2 %192 }
 0x11c   :  { %v331_v22 = vrot.slane %v4069_v58, 4  ;;  %v334_v27 = vsel %vm219_vm1, %v4069_v58, %v333_v23 }
 0x11d   :  { %v4071_v61 = vpop.permute.xlu1 %205  ;;  %v4110_v32 = vperm.slane %v334_v27, %v4079_v3 }
 0x11e   :  { %v287_v63 = vrot.slane %v4071_v61, 4  ;;  %v332_v30 = vsel %vm219_vm1, %v331_v22, %v4055_v51 }
 0x11f   :  { %v4073_v62 = vpop.permute.xlu0 %3715  ;;  %v4115_v34 = vperm.slane %v332_v30, %v4079_v3  ;;  %v369_v39 = vrot.slane %v4110_v32, 4 }
 0x120   :  { %v3718_v1 = vunpack.i.h.bf16 %v4073_v62  ;;  %v3717_v2 = vunpack.i.l.bf16 %v4073_v62  ;;  %3735 = vrot.lane.b32.xlu0 %v4073_v62, %s3976_s11 }
 0x121   :  { %v357_v41 = vrot.slane %v4115_v34, 4 }
 0x122   :  { %v275_v4 = vrot.slane %v3718_v1, 4  ;;  %v278_v5 = vsel %vm219_vm1, %v3718_v1, %v277_v0  ;;  %v218_v25 = vrot.slane %v3717_v2, 4  ;;  %v222_v31 = vsel %vm219_vm1, %v3717_v2, %v221_v26 }
 0x123   :  { %v4082_v6 = vpop.permute.xlu2 %175  ;;  %v286_v7 = vperm.slane %v278_v5, %v4079_v3  ;;  %v230_v36 = vperm.slane %v222_v31, %v4079_v3 }
 0x124   :  { %v289_v8 = vrot.slane %v4082_v6, 4  ;;  %v288_v9 = vsel %vm219_vm1, %v287_v63, %v4082_v6  ;;  %v276_v10 = vsel %vm219_vm1, %v275_v4, %v4045_v48  ;;  %v220_v33 = vsel %vm219_vm1, %v218_v25, %v4043_v47 }
 0x125   :  { %v294_v11 = vperm.slane %v288_v9, %v4079_v3  ;;  %v282_v12 = vperm.slane %v276_v10, %v4079_v3  ;;  %v313_v13 = vrot.slane %v286_v7, 4  ;;  %v226_v37 = vperm.slane %v220_v33, %v4079_v3 }
 0x126   :  { %v290_v14 = vsel %vm219_vm1, %v4071_v61, %v289_v8  ;;  %v257_v42 = vrot.slane %v230_v36, 4  ;;  %v3754_v46 = vpack.i.bf16 %v4055_v51, %v4082_v6 }
 0x127   :  { %v298_v15 = vperm.slane %v290_v14, %v4079_v3  ;;  %v299_v16 = vrot.slane %v294_v11, 4  ;;  %v301_v17 = vrot.slane %v282_v12, 4  ;;  %v245_v57 = vrot.slane %v226_v37, 4 }
 0x129   :  { %v311_v18 = vrot.slane %v298_v15, 4  ;;  %v300_v19 = vsel %vm219_vm1, %v299_v16, %v282_v12  ;;  %v302_v20 = vsel %vm219_vm1, %v294_v11, %v301_v17  ;;  %v314_v21 = vsel %vm219_vm1, %v298_v15, %v313_v13 }
 0x12a   :  { %v310_v38 = vperm.slane %v302_v20, %v4117_v35  ;;  %v4129_v43 = vperm.slane %v300_v19, %v4117_v35  ;;  %v322_v60 = vperm.slane %v314_v21, %v4117_v35 }
 0x12b   :  { %v312_v24 = vsel %vm219_vm1, %v311_v18, %v286_v7 }
 0x12c   :  { %v4142_v59 = vperm.slane %v312_v24, %v4117_v35  ;;  %v325_v63 = vrot.slane %v310_v38, 4  ;;  %v323_v5 = vrot.slane %v4129_v43, 4  ;;  %v329_v17 = vrot.slane %v322_v60, 4 }
 0x12e   :  { %v326_v16 = vsel %vm219_vm1, 0.0, %v325_v63 }
 0x12f   :  { %v520_v28 = vrot.slane %v326_v16, 4 }
 0x135   :  { %v3726_v44 = vpop.permute.xlu1 %3725  ;;  %v3721_v45 = vpop.permute.xlu0 %3720 }
 0x136   :  { %v4133_v50 = vunpack.i.h.bf16 %v3726_v44  ;;  %v4135_v52 = vunpack.i.l.bf16 %v3726_v44  ;;  %v4137_v53 = vunpack.i.h.bf16 %v3721_v45  ;;  %v4139_v55 = vunpack.i.l.bf16 %v3721_v45 }
 0x137   :  { %v327_v45 = vrot.slane %v4142_v59, 4 }
 0x138   :  { %v233_v0 = vrot.slane %v4133_v50, 4  ;;  %v345_v1 = vrot.slane %v4135_v52, 4  ;;  %v231_v2 = vrot.slane %v4137_v53, 4  ;;  %v343_v4 = vrot.slane %v4139_v55, 4 }
 0x139   :  { %v3744_v7 = vpack.i.bf16 %v4135_v52, %v4071_v61  ;;  %v3729_v8 = vpack.i.bf16 %v4137_v53, %v4045_v48  ;;  %v3739_v9 = vpack.i.bf16 %v4043_v47, %v4139_v55  ;;  %v3804_v18 = vpack.i.bf16 %v4071_v61, %v4137_v53 }
 0x13a   :  { %v232_v10 = vsel %vm219_vm1, %v231_v2, %v4133_v50  ;;  %v234_v11 = vsel %vm219_vm1, %v4137_v53, %v233_v0  ;;  %v344_v12 = vsel %vm219_vm1, %v343_v4, %v4135_v52  ;;  %v346_v13 = vsel %vm219_vm1, %v4139_v55, %v345_v1 }
 0x13b   :  { %v238_v14 = vperm.slane %v232_v10, %v4079_v3  ;;  %v242_v15 = vperm.slane %v234_v11, %v4079_v3  ;;  %v4167_v48 = vperm.slane %v344_v12, %v4079_v3  ;;  %v354_v47 = vperm.slane %v346_v13, %v4079_v3  ;;  %3745 = vrot.lane.b32.xlu0 %v3744_v7, %s3976_s11 }
 0x13c   :  { %3730 = vrot.lane.b32.xlu2 %v3729_v8, %s3976_s11  ;;  %3740 = vrot.lane.b32.xlu1 %v3739_v9, %s3976_s11  ;;  %v3749_v0 = vpack.i.bf16 %v4133_v50, %v4069_v58  ;;  %v515_v8 = vsel %vm219_vm1, %v325_v63, %v4129_v43  ;;  %v526_v10 = vsel %vm219_vm1, %v329_v17, %v4142_v59 }
 0x13d   :  { %v243_v20 = vrot.slane %v238_v14, 4  ;;  %v246_v21 = vsel %vm219_vm1, %v238_v14, %v245_v57  ;;  %v255_v22 = vrot.slane %v242_v15, 4  ;;  %v258_v23 = vsel %vm219_vm1, %v242_v15, %v257_v42 }
 0x13e   :  { %v254_v24 = vperm.slane %v246_v21, %v4117_v35  ;;  %v266_v25 = vperm.slane %v258_v23, %v4117_v35  ;;  %v358_v26 = vsel %vm219_vm1, %v4167_v48, %v357_v41  ;;  %v367_v27 = vrot.slane %v354_v47, 4 }
 0x13f   :  { %v244_v29 = vsel %vm219_vm1, %v243_v20, %v226_v37  ;;  %v256_v30 = vsel %vm219_vm1, %v255_v22, %v230_v36  ;;  %v370_v31 = vsel %vm219_vm1, %v354_v47, %v369_v39  ;;  %v330_v57 = vsel %vm219_vm1, 0.0, %v329_v17 }
 0x140   :  { %v250_v33 = vperm.slane %v244_v29, %v4117_v35  ;;  %v262_v38 = vperm.slane %v256_v30, %v4117_v35  ;;  %v269_v42 = vrot.slane %v254_v24, 4  ;;  %v273_v44 = vrot.slane %v266_v25, 4 }
 0x141   :  { %v368_v41 = vsel %vm219_vm1, %v367_v27, %v4110_v32  ;;  %v4194_v60 = vperm.slane %v370_v31, %v4117_v35  ;;  %v366_v39 = vperm.slane %v358_v26, %v4117_v35  ;;  %v324_v32 = vsel %vm219_vm1, 0.0, %v323_v5 }
 0x142   :  { %v270_v36 = vsel %vm219_vm1, 0.0, %v269_v42  ;;  %v274_v37 = vsel %vm219_vm1, 0.0, %v273_v44  ;;  %v267_v1 = vrot.slane %v250_v33, 4  ;;  %v374_v2 = vperm.slane %v368_v41, %v4117_v35 }
 0x143   :  { %v385_v4 = vrot.slane %v4194_v60, 4  ;;  %3760 = vrot.lane.b32.xlu0 %v4125_v40, %s3972_s0  ;;  %v271_v7 = vrot.slane %v262_v38, 4  ;;  %v521_v9 = vsel %vm219_vm1, %v520_v28, %v324_v32  ;;  %v466_v11 = vrot.slane %v270_v36, 4 }
 0x144   :  { %3755 = vrot.lane.b32.xlu2 %v3754_v46, %s3976_s11  ;;  %3750 = vrot.lane.b32.xlu1 %v3749_v0, %s3976_s11  ;;  %v477_v12 = vrot.slane %v274_v37, 4  ;;  %v383_v13 = vrot.slane %v374_v2, 4  ;;  %v531_v15 = vrot.slane %v330_v57, 4  ;;  %v461_v47 = vsel %vm219_vm1, %v269_v42, %v250_v33 }
 0x145   :  { %v386_v14 = vsel %vm219_vm1, 0.0, %v385_v4  ;;  %v472_v46 = vsel %vm219_vm1, %v273_v44, %v262_v38  ;;  %v519_v63 = vperm.slane %v515_v8, %v4079_v3  ;;  %v525_v20 = vperm.slane %v521_v9, %v4079_v3 }
 0x146   :  { %v598_v5 = vrot.slane %v386_v14, 4  ;;  %v384_v16 = vsel %vm219_vm1, 0.0, %v383_v13  ;;  %v593_v43 = vsel %vm219_vm1, %v383_v13, %v366_v39  ;;  %v268_v17 = vsel %vm219_vm1, 0.0, %v267_v1 }
 0x147   :  { %v272_v21 = vsel %vm219_vm1, 0.0, %v271_v7  ;;  %v355_v22 = vrot.slane %v4167_v48, 4  ;;  %v381_v23 = vrot.slane %v366_v39, 4  ;;  %v467_v24 = vsel %vm219_vm1, %v466_v11, %v268_v17 }
 0x148   :  { %v4221_v59 = vsel %vm219_vm1, %v598_v5, %v384_v16  ;;  %v478_v25 = vsel %vm219_vm1, %v477_v12, %v272_v21  ;;  %v328_v26 = vsel %vm219_vm1, 0.0, %v327_v45  ;;  %v465_v27 = vperm.slane %v461_v47, %v4079_v3 }
 0x149   :  { %v471_v28 = vperm.slane %v467_v24, %v4079_v3  ;;  %v482_v29 = vperm.slane %v478_v25, %v4079_v3  ;;  %v476_v30 = vperm.slane %v472_v46, %v4079_v3  ;;  %v532_v31 = vsel %vm219_vm1, %v531_v15, %v328_v26 }
 0x14a   :  { %v537_v33 = vrot.slane %v525_v20, 4  ;;  %v539_v38 = vrot.slane %v519_v63, 4  ;;  %v536_v44 = vperm.slane %v532_v31, %v4079_v3  ;;  %v356_v45 = vsel %vm219_vm1, %v355_v22, %v4115_v34 }
 0x14b   :  { %v483_v48 = vrot.slane %v471_v28, 4  ;;  %v495_v42 = vrot.slane %v482_v29, 4  ;;  %v530_v57 = vperm.slane %v526_v10, %v4079_v3  ;;  %v4244_v36 = vperm.slane %v356_v45, %v4117_v35 }
 0x14c   :  { %3770 = vrot.lane.b32.xlu2 %v4125_v40, %s3973_s10  ;;  %3765 = vrot.lane.b32.xlu1 %v4125_v40, %s3974_s2  ;;  %v538_v41 = vsel %vm219_vm1, %v537_v33, %v519_v63  ;;  %v382_v37 = vsel %vm219_vm1, 0.0, %v381_v23  ;;  %v549_v1 = vrot.slane %v536_v44, 4  ;;  %v485_v2 = vrot.slane %v465_v27, 4 }
 0x14d   :  { %v484_v39 = vsel %vm219_vm1, %v483_v48, %v465_v27  ;;  %v496_v40 = vsel %vm219_vm1, %v495_v42, %v476_v30  ;;  %v544_v0 = vperm.slane %v538_v41, %v4117_v35  ;;  %v379_v32 = vrot.slane %v4244_v36, 4 }
 0x14e   :  { %v490_v4 = vperm.slane %v484_v39, %v4117_v35  ;;  %v502_v34 = vperm.slane %v496_v40, %v4117_v35  ;;  %v550_v7 = vsel %vm219_vm1, %v549_v1, %v530_v57  ;;  %v587_v9 = vrot.slane %v382_v37, 4 }
 0x14f   :  { %v563_v8 = vrot.slane %v544_v0, 4  ;;  %v540_v10 = vsel %vm219_vm1, %v525_v20, %v539_v38  ;;  %v556_v13 = vperm.slane %v550_v7, %v4117_v35  ;;  %v380_v14 = vsel %vm219_vm1, 0.0, %v379_v32 }
 0x150   :  { %v507_v11 = vrot.slane %v502_v34, 4  ;;  %v509_v12 = vrot.slane %v490_v4, 4  ;;  %v597_v15 = vperm.slane %v593_v43, %v4079_v3  ;;  %v497_v5 = vrot.slane %v476_v30, 4 }
 0x151   :  { %v588_v47 = vsel %vm219_vm1, %v587_v9, %v380_v14  ;;  %v561_v16 = vrot.slane %v556_v13, 4  ;;  %v564_v63 = vsel %vm219_vm1, %v556_v13, %v563_v8  ;;  %v551_v21 = vrot.slane %v530_v57, 4 }
 0x152   :  { %v510_v46 = vsel %vm219_vm1, %v502_v34, %v509_v12  ;;  %v508_v17 = vsel %vm219_vm1, %v507_v11, %v490_v4  ;;  %v1831_v22 = vpack.c.bf16 %v564_v63, %v564_v63  ;;  %v592_v25 = vperm.slane %v588_v47, %v4079_v3 }
 0x153   :  { %v1830_v20 = vpack.c.bf16 %v510_v46, %v510_v46  ;;  %v1827_v23 = vpack.c.bf16 %v508_v17, %v508_v17  ;;  %v562_v24 = vsel %vm219_vm1, %v561_v16, %v544_v0  ;;  %v486_v43 = vsel %vm219_vm1, %v471_v28, %v485_v2 }
 0x154   :  { %v548_v26 = vperm.slane %v540_v10, %v4117_v35  ;;  %v4268_v30 = vunpack.c.l.b16 %v1831_v22  ;;  %v1828_v31 = vpack.c.bf16 %v562_v24, %v562_v24  ;;  %v609_v38 = vrot.slane %v597_v15, 4 }
 0x155   :  { %v4266_v27 = vunpack.c.l.b16 %v1830_v20  ;;  %v4270_v33 = vunpack.c.l.b16 %v1827_v23  ;;  %v494_v48 = vperm.slane %v486_v43, %v4117_v35  ;;  %v498_v57 = vsel %vm219_vm1, %v482_v29, %v497_v5 }
 0x156   :  { %v4275_v45 = vunpack.c.l.b16 %v1828_v31  ;;  %v506_v28 = vperm.slane %v498_v57, %v4117_v35  ;;  %v552_v37 = vsel %vm219_vm1, %v536_v44, %v551_v21  ;;  %v611_v40 = vrot.slane %v592_v25, 4 }
 0x157   :  { %v513_v41 = vrot.slane %v494_v48, 4  ;;  %v560_v0 = vperm.slane %v552_v37, %v4117_v35  ;;  %v567_v1 = vrot.slane %v548_v26, 4  ;;  %v610_v34 = vsel %vm219_vm1, %v609_v38, %v592_v25 }
 0x158   :  { %v511_v4 = vrot.slane %v506_v28, 4  ;;  %v612_v12 = vsel %vm219_vm1, %v597_v15, %v611_v40  ;;  %v4310_v20 = vperm.slane %v4244_v36, %v4079_v3  ;;  %v4323_v36 = vperm.slane %v4221_v59, %v4079_v3 }
 0x159   :  { %v514_v2 = vsel %vm219_vm1, %v506_v28, %v513_v41  ;;  %v568_v32 = vsel %vm219_vm1, %v560_v0, %v567_v1  ;;  %v565_v7 = vrot.slane %v560_v0, 4 }
 0x15a   :  { %v1836_v29 = vpack.c.bf16 %v514_v2, %v514_v2  ;;  %v1837_v8 = vpack.c.bf16 %v568_v32, %v568_v32  ;;  %v512_v9 = vsel %vm219_vm1, %v511_v4, %v494_v48  ;;  %v578_v24 = vperm.slane %v4310_v20, %v4117_v35 }
 0x15b   :  { %v566_v10 = vsel %vm219_vm1, %v565_v7, %v548_v26  ;;  %v1833_v11 = vpack.c.bf16 %v512_v9, %v512_v9  ;;  %v389_v32 = vrot.slane %v4063_v54, 4 }
 0x15c   :  { %v4287_v44 = vunpack.c.l.b16 %v1836_v29  ;;  %v4291_v13 = vunpack.c.l.b16 %v1837_v8  ;;  %v1834_v14 = vpack.c.bf16 %v566_v10, %v566_v10  ;;  %v1829_v57 = vpack.c.bf16 %v578_v24, %v578_v24 }
 0x15d   :  { %v4293_v5 = vunpack.c.l.b16 %v1833_v11  ;;  %v583_v28 = vrot.slane %v578_v24, 4  ;;  %v4348_v10 = vperm.slane %v610_v34, %v4117_v35 }
 0x15e   :  { %v4297_v46 = vunpack.c.l.b16 %v1834_v14  ;;  %v4342_v8 = vunpack.c.l.b16 %v1829_v57 }
 0x15f   :  { %5903 = vst [vmem:[#allocation4_spill] sm:$0xff] %v4293_v5  ;;  %v4345_v9 = vsel %vm219_vm1, 0.0, %v583_v28 }
 0x160   :  { %5904 = vst [vmem:[#allocation5_spill] sm:$0xff] %v4297_v46 }
 0x192   :  { %v4303_v17 = vpop.permute.xlu0 %3735 }
 0x193   :  { %v3738_v15 = vunpack.i.h.bf16 %v4303_v17  ;;  %v3737_v37 = vunpack.i.l.bf16 %v4303_v17  ;;  %v4355_v17 = vperm.slane %v612_v12, %v4117_v35 }
 0x195   :  { %v831_v23 = vrot.slane %v3738_v15, 4 }
 0x196   :  { %v4301_v63 = vpop.permute.xlu2 %3730 }
 0x197   :  { %v3732_v22 = vunpack.i.l.bf16 %v4301_v63  ;;  %v3733_v41 = vunpack.i.h.bf16 %v4301_v63 }
 0x199   :  { %v833_v25 = vrot.slane %v3732_v22, 4  ;;  %v832_v43 = vsel %vm219_vm1, %v831_v23, %v3732_v22  ;;  %v787_v11 = vrot.slane %v3733_v41, 4  ;;  %v775_v23 = vrot.slane %v3737_v37, 4 }
 0x19a   :  { %v4329_v0 = vperm.slane %v832_v43, %v4079_v3 }
 0x19b   :  { %v834_v26 = vsel %vm219_vm1, %v3738_v15, %v833_v25 }
 0x19c   :  { %v842_v1 = vperm.slane %v834_v26, %v4079_v3  ;;  %v857_v24 = vrot.slane %v4329_v0, 4 }
 0x19e   :  { %v4305_v21 = vpop.permute.xlu2 %3755  ;;  %v869_v34 = vrot.slane %v842_v1, 4 }
 0x19f   :  { %v3758_v40 = vunpack.i.h.bf16 %v4305_v21  ;;  %v3757_v4 = vunpack.i.l.bf16 %v4305_v21 }
 0x1a1   :  { %v4360_v22 = vrot.slane %v3758_v40, 4  ;;  %v845_v43 = vrot.slane %v3757_v4, 4 }
 0x1a6   :  { %v3771_v31 = vpop.permute.xlu2 %3770 }
 0x1a7   :  { %v4317_v38 = vunpack.i.h.bf16 %v3771_v31  ;;  %v4319_v48 = vunpack.i.l.bf16 %v3771_v31 }
 0x1a9   :  { %v3779_v2 = vpack.i.bf16 %v4067_v56, %v4319_v48  ;;  %v387_v7 = vrot.slane %v4317_v38, 4  ;;  %v390_v14 = vsel %vm219_vm1, %v4317_v38, %v389_v32  ;;  %v443_v26 = vrot.slane %v4319_v48, 4 }
 0x1aa   :  { %v3829_v15 = vpack.i.bf16 %v4319_v48, %v4317_v38 }
 0x1ab   :  { %3780 = vrot.lane.b32.xlu1 %v3779_v2, %s3976_s11  ;;  %v388_v12 = vsel %vm219_vm1, %v387_v7, %v4063_v54  ;;  %v4367_v2 = vperm.slane %v390_v14, %v4079_v3  ;;  %v4379_v14 = vsel %vm219_vm1, %v443_v26, %v4067_v56 }
 0x1ac   :  { %v4375_v7 = vperm.slane %v388_v12, %v4079_v3 }
 0x1ad   :  { %v3746_v25 = vpop.permute.xlu0 %3745 }
 0x1ae   :  { %v3748_v31 = vunpack.i.h.bf16 %v3746_v25  ;;  %v3747_v57 = vunpack.i.l.bf16 %v3746_v25  ;;  %v3741_v28 = vpop.permute.xlu1 %3740 }
 0x1af   :  { %v3743_v32 = vunpack.i.h.bf16 %v3741_v28  ;;  %v3742_v16 = vunpack.i.l.bf16 %v3741_v28 }
 0x1b0   :  { %v901_v47 = vrot.slane %v3748_v31, 4  ;;  %v843_v39 = vrot.slane %v3747_v57, 4  ;;  %v846_v42 = vsel %vm219_vm1, %v3747_v57, %v845_v43 }
 0x1b1   :  { %v854_v29 = vperm.slane %v846_v42, %v4079_v3  ;;  %v776_v25 = vsel %vm219_vm1, %v775_v23, %v3743_v32  ;;  %v777_v59 = vrot.slane %v3743_v32, 4  ;;  %v899_v19 = vrot.slane %v3742_v16, 4 }
 0x1b2   :  { %v844_v28 = vsel %vm219_vm1, %v843_v39, %v3757_v4  ;;  %v902_v43 = vsel %vm219_vm1, %v3742_v16, %v901_v47  ;;  %v782_v39 = vperm.slane %v776_v25, %v4079_v3 }
 0x1b3   :  { %v850_v57 = vperm.slane %v844_v28, %v4079_v3  ;;  %v867_v48 = vrot.slane %v854_v29, 4  ;;  %v870_v42 = vsel %vm219_vm1, %v854_v29, %v869_v34  ;;  %v778_v23 = vsel %vm219_vm1, %v3737_v37, %v777_v59  ;;  %3805 = vrot.lane.b32.xlu1 %v3804_v18, %s3978_s12 }
 0x1b4   :  { %v878_v12 = vperm.slane %v870_v42, %v4117_v35  ;;  %v900_v47 = vsel %vm219_vm1, %v899_v19, %v3748_v31  ;;  %v786_v37 = vperm.slane %v778_v23, %v4079_v3 }
 0x1b5   :  { %v855_v16 = vrot.slane %v850_v57, 4  ;;  %v858_v4 = vsel %vm219_vm1, %v850_v57, %v857_v24  ;;  %v868_v29 = vsel %vm219_vm1, %v867_v48, %v842_v1  ;;  %v4404_v18 = vperm.slane %v900_v47, %v4079_v3 }
 0x1b6   :  { %v866_v59 = vperm.slane %v858_v4, %v4117_v35  ;;  %v4399_v61 = vperm.slane %v868_v29, %v4117_v35  ;;  %v4401_v53 = vrot.slane %v878_v12, 4  ;;  %v3751_v34 = vpop.permute.xlu1 %3750  ;;  %v910_v1 = vperm.slane %v902_v43, %v4079_v3  ;;  %v4426_v4 = vpop.permute.xlu0 %3760 }
 0x1b7   :  { %v856_v24 = vsel %vm219_vm1, %v855_v16, %v4329_v0  ;;  %v3753_v31 = vunpack.i.h.bf16 %v3751_v34  ;;  %v801_v48 = vrot.slane %v782_v39, 4  ;;  %v813_v42 = vrot.slane %v786_v37, 4 }
 0x1b8   :  { %v4413_v25 = vperm.slane %v856_v24, %v4117_v35  ;;  %v4415_v28 = vrot.slane %v866_v59, 4  ;;  %v4419_v57 = vsel %vm219_vm1, 0.0, %v4401_v53  ;;  %v883_v0 = vrot.slane %v4399_v61, 4 }
 0x1b9   :  { %v788_v23 = vsel %vm219_vm1, %v787_v11, %v3753_v31  ;;  %v789_v12 = vrot.slane %v3753_v31, 4  ;;  %v923_v59 = vrot.slane %v910_v1, 4  ;;  %v3752_v19 = vunpack.i.l.bf16 %v3751_v34 }
 0x1ba   :  { %v794_v16 = vperm.slane %v788_v23, %v4079_v3  ;;  %v879_v29 = vrot.slane %v4413_v25, 4  ;;  %v4435_v11 = vsel %vm219_vm1, 0.0, %v4415_v28 }
 0x1bb   :  { %v790_v24 = vsel %vm219_vm1, %v3733_v41, %v789_v12  ;;  %3830 = vrot.lane.b32.xlu1 %v3829_v15, %s3978_s12  ;;  %v887_v32 = vrot.slane %v3752_v19, 4  ;;  %v890_v63 = vsel %vm219_vm1, %v3752_v19, %v4360_v22  ;;  %v4443_v41 = vunpack.i.h.bf16 %v4426_v4 }
 0x1bc   :  { %v798_v31 = vperm.slane %v790_v24, %v4079_v3  ;;  %v799_v43 = vrot.slane %v794_v16, 4  ;;  %v802_v23 = vsel %vm219_vm1, %v794_v16, %v801_v48  ;;  %v898_v47 = vperm.slane %v890_v63, %v4079_v3 }
 0x1bd   :  { %v810_v26 = vperm.slane %v802_v23, %v4117_v35  ;;  %v888_v23 = vsel %vm219_vm1, %v887_v32, %v3758_v40 }
 0x1be   :  { %v811_v34 = vrot.slane %v798_v31, 4  ;;  %v800_v15 = vsel %vm219_vm1, %v799_v43, %v782_v39  ;;  %v814_v12 = vsel %vm219_vm1, %v798_v31, %v813_v42  ;;  %v894_v19 = vperm.slane %v888_v23, %v4079_v3  ;;  %v3766_v32 = vpop.permute.xlu1 %3765 }
 0x1bf   :  { %v806_v24 = vperm.slane %v800_v15, %v4117_v35  ;;  %v822_v48 = vperm.slane %v814_v12, %v4117_v35  ;;  %v825_v16 = vrot.slane %v810_v26, 4  ;;  %v924_v56 = vsel %vm219_vm1, %v923_v59, %v898_v47 }
 0x1c0   :  { %v812_v22 = vsel %vm219_vm1, %v811_v34, %v786_v37  ;;  %v925_v39 = vrot.slane %v898_v47, 4  ;;  %v4457_v42 = vsel %vm219_vm1, 0.0, %v883_v0  ;;  %v913_v21 = vrot.slane %v894_v19, 4 }
 0x1c1   :  { %v823_v43 = vrot.slane %v806_v24, 4  ;;  %v826_v31 = vsel %vm219_vm1, 0.0, %v825_v16  ;;  %v4460_v63 = vrot.slane %v822_v48, 4  ;;  %v4463_v26 = vperm.slane %v812_v22, %v4117_v35 }
 0x1c2   :  { %v926_v40 = vsel %vm219_vm1, %v910_v1, %v925_v39  ;;  %v930_v37 = vperm.slane %v924_v56, %v4117_v35  ;;  %v4468_v59 = vsel %vm219_vm1, 0.0, %v879_v29  ;;  %v914_v1 = vsel %vm219_vm1, %v4404_v18, %v913_v21 }
 0x1c3   :  { %v4473_v47 = vsel %vm219_vm1, 0.0, %v4460_v63  ;;  %v4476_v34 = vperm.slane %v926_v40, %v4117_v35  ;;  %v824_v15 = vsel %vm219_vm1, 0.0, %v823_v43  ;;  %v1022_v12 = vrot.slane %v826_v31, 4 }
 0x1c4   :  { %v399_v56 = vrot.slane %v4443_v41, 4  ;;  %v922_v29 = vperm.slane %v914_v1, %v4117_v35  ;;  %v939_v48 = vrot.slane %v930_v37, 4  ;;  %v3762_v23 = vunpack.i.l.bf16 %v4426_v4 }
 0x1c5   :  { %5905 = vst [vmem:[#allocation6_spill] sm:$0xff] %v4476_v34  ;;  %v4484_v22 = vunpack.i.h.bf16 %v3766_v32  ;;  %v4488_v40 = vsel %vm219_vm1, %v825_v16, %v806_v24  ;;  %v3767_v0 = vunpack.i.l.bf16 %v3766_v32  ;;  %v941_v31 = vrot.slane %v4476_v34, 4 }
 0x1c6   :  { %v937_v5 = vrot.slane %v922_v29, 4  ;;  %v1149_v21 = vsel %vm219_vm1, %v939_v48, %v922_v29  ;;  %v449_v46 = vrot.slane %v3762_v23, 4  ;;  %v4494_v37 = vsel %vm219_vm1, %v1022_v12, %v824_v15 }
 0x1c7   :  { %5906 = vst [vmem:[#allocation7_spill] sm:$0xff] %v4484_v22  ;;  %v401_v4 = vrot.slane %v4484_v22, 4  ;;  %v400_v1 = vsel %vm219_vm1, %v399_v56, %v4484_v22  ;;  %v3789_v24 = vpack.i.bf16 %v4443_v41, %v4063_v54  ;;  %v3784_v43 = vpack.i.bf16 %v4484_v22, %v4317_v38 }
 0x1c8   :  { %v406_v16 = vperm.slane %v400_v1, %v4079_v3  ;;  %v450_v32 = vsel %vm219_vm1, %v449_v46, %v3767_v0  ;;  %v4505_v29 = vpack.i.bf16 %v3767_v0, %v3762_v23  ;;  %v5907_v39 = vrot.slane %v4404_v18, 4 }
 0x1c9   :  { %v402_v15 = vsel %vm219_vm1, %v4443_v41, %v401_v4  ;;  %v454_v12 = vperm.slane %v450_v32, %v4079_v3  ;;  %v938_v54 = vsel %vm219_vm1, 0.0, %v937_v5  ;;  %v5908_v46 = vrot.slane %v4375_v7, 4  ;;  %3785 = vrot.lane.b32.xlu2 %v3784_v43, %s3976_s11 }
 0x1ca   :  { %v912_v56 = vsel %vm219_vm1, %v5907_v39, %v894_v19  ;;  %v410_v1 = vperm.slane %v402_v15, %v4079_v3  ;;  %v411_v34 = vrot.slane %v406_v16, 4  ;;  %3775 = vrot.lane.b32.xlu0 %v4505_v29, %s3976_s11  ;;  %v4523_v18 = vsel %vm219_vm1, 0.0, %v941_v31 }
 0x1cb   :  { %v414_v38 = vsel %vm219_vm1, %v406_v16, %v5908_v46  ;;  %v918_v0 = vperm.slane %v912_v56, %v4117_v35  ;;  %v455_v5 = vrot.slane %v454_v12, 4  ;;  %v1143_v23 = vrot.slane %v938_v54, 4 }
 0x1cc   :  { %v422_v19 = vperm.slane %v414_v38, %v4117_v35  ;;  %v412_v39 = vsel %vm219_vm1, %v411_v34, %v4375_v7  ;;  %v423_v4 = vrot.slane %v410_v1, 4  ;;  %v5909_v16 = vrot.slane %v4367_v2, 4 }
 0x1cd   :  { %v935_v32 = vrot.slane %v918_v0, 4  ;;  %v418_v15 = vperm.slane %v412_v39, %v4117_v35  ;;  %v5910_v31 = vperm.slane %v4379_v14, %v4079_v3 }
 0x1ce   :  { %v426_v43 = vsel %vm219_vm1, %v410_v1, %v5909_v16  ;;  %v437_v46 = vrot.slane %v422_v19, 4  ;;  %v424_v54 = vsel %vm219_vm1, %v423_v4, %v4367_v2  ;;  %v4542_v1 = vperm.slane %v918_v0, %v4079_v3 }
 0x1cf   :  { %v434_v56 = vperm.slane %v426_v43, %v4117_v35  ;;  %v456_v12 = vsel %vm219_vm1, %v455_v5, %v5910_v31  ;;  %v936_v34 = vsel %vm219_vm1, 0.0, %v935_v32  ;;  %v430_v38 = vperm.slane %v424_v54, %v4117_v35 }
 0x1d0   :  { %v460_v7 = vperm.slane %v456_v12, %v4117_v35  ;;  %v435_v39 = vrot.slane %v418_v15, 4  ;;  %v438_v16 = vsel %vm219_vm1, 0.0, %v437_v46  ;;  %v1134_v5 = vperm.slane %v4542_v1, %v4117_v35 }
 0x1d1   :  { %v441_v43 = vrot.slane %v434_v56, 4  ;;  %v641_v22 = vrot.slane %v438_v16, 4  ;;  %v1144_v2 = vsel %vm219_vm1, %v1143_v23, %v936_v34  ;;  %v439_v32 = vrot.slane %v430_v38, 4  ;;  %3795 = vrot.lane.b32.xlu2 %v4073_v62, %s3978_s12 }
 0x1d2   :  { %v4546_v14 = vrot.slane %v460_v7, 4  ;;  %v436_v4 = vsel %vm219_vm1, 0.0, %v435_v39  ;;  %v604_v15 = vsel %vm219_vm1, %v435_v39, %v4194_v60  ;;  %v4558_v46 = vsel %vm219_vm1, 0.0, %v939_v48  ;;  %3790 = vrot.lane.b32.xlu0 %v3789_v24, %s3976_s11 }
 0x1d3   :  { %v4553_v0 = vsel %vm219_vm1, 0.0, %v441_v43  ;;  %v4561_v31 = vperm.slane %v1149_v21, %v4079_v3  ;;  %v642_v12 = vsel %vm219_vm1, %v641_v22, %v436_v4  ;;  %v1154_v54 = vrot.slane %v4523_v18, 4 }
 0x1d4   :  { %v659_v23 = vsel %vm219_vm1, %v4546_v14, %v434_v56  ;;  %v4571_v60 = vperm.slane %v604_v15, %v4079_v3  ;;  %v647_v48 = vsel %vm219_vm1, %v439_v32, %v422_v19  ;;  %v4575_v21 = vsel %vm219_vm1, 0.0, %v439_v32 }
 0x1d5   :  { %v652_v22 = vrot.slane %v4553_v0, 4  ;;  %v1853_v7 = vpack.c.bf16 %v1134_v5, %v1134_v5  ;;  %v1139_v56 = vrot.slane %v1134_v5, 4  ;;  %v4579_v34 = vperm.slane %v642_v12, %v4079_v3 }
 0x1d6   :  { %v4582_v62 = vperm.slane %v647_v48, %v4079_v3  ;;  %v4585_v24 = vperm.slane %v659_v23, %v4079_v3  ;;  %v5911_v38 = vrot.slane %v4463_v26, 4  ;;  %v4591_v39 = vperm.slane %v1144_v2, %v4079_v3 }
 0x1d7   :  { %v1888_v16 = vunpack.c.l.b16 %v1853_v7  ;;  %v1140_v43 = vsel %vm219_vm1, 0.0, %v1139_v56  ;;  %v1027_v5 = vperm.slane %v4494_v37, %v4079_v3  ;;  %v1028_v32 = vsel %vm219_vm1, %v4460_v63, %v4463_v26 }
 0x1d8   :  { %v828_v19 = vsel %vm219_vm1, 0.0, %v5911_v38  ;;  %v1856_v4 = vpack.c.bf16 %v1140_v43, %v1140_v43  ;;  %v5912_v15 = vrot.slane %v4473_v47, 4  ;;  %v1071_v2 = vsel %vm219_vm1, %v4415_v28, %v4413_v25 }
 0x1d9   :  { %v1890_v23 = vpack.c.b16 %v1888_v16, %v1888_v16  ;;  %v1021_v48 = vperm.slane %v4488_v40, %v4079_v3  ;;  %v1039_v37 = vrot.slane %v1027_v5, 4  ;;  %v1032_v38 = vperm.slane %v1028_v32, %v4079_v3 }
 0x1da   :  { %v1034_v12 = vsel %vm219_vm1, %v5912_v15, %v828_v19  ;;  %v1935_v56 = vunpack.c.l.b16 %v1856_v4  ;;  %v1075_v63 = vperm.slane %v1071_v2, %v4079_v3  ;;  %v5913_v26 = vrot.slane %v4435_v11, 4  ;;  %3800 = vrot.lane.b32.xlu0 %v4051_v49, %s3978_s12 }
 0x1db   :  { %v1038_v7 = vperm.slane %v1034_v12, %v4079_v3  ;;  %v1902_v19 = vsel %vm1891_vm2, %v1890_v23, 0  ;;  %v5914_v25 = vpack.i.bf16 %v4133_v50, %v4139_v55  ;;  %v1040_v28 = vsel %vm219_vm1, %v1039_v37, %v1021_v48 }
 0x1dc   :  { %v1077_v47 = vsel %vm219_vm1, %v5913_v26, %v4468_v59  ;;  %1910 = vmatpush.bf16.xpose.msrb.mxu0 %v1902_v19  ;;  %3701 = vmatpush.bf16.xpose.msra.mxu1 %v1902_v19  ;;  %v1937_v11 = vpack.c.b16 %v1935_v56, %v1935_v56  ;;  %v1046_v59 = vperm.slane %v1040_v28, %v4117_v35  ;;  %v1129_v50 = vrot.slane %v4542_v1, 4 }
 0x1dd   :  { %3810 = vrot.lane.b32.xlu2 %v5914_v25, %s3978_s12  ;;  %v1051_v40 = vrot.slane %v1038_v7, 4  ;;  %v1081_v16 = vperm.slane %v1077_v47, %v4079_v3  ;;  %v1082_v43 = vsel %vm219_vm1, %v4401_v53, %v4399_v61  ;;  %v5915_v49 = vrot.slane %v4419_v57, 4 }
 0x1de   :  { %v1041_v15 = vrot.slane %v1021_v48, 4  ;;  %v1948_v12 = vsel %vm1891_vm2, %v1937_v11, 0  ;;  %v1065_v23 = vrot.slane %v1046_v59, 4  ;;  %v1086_v61 = vperm.slane %v1082_v43, %v4079_v3 }
 0x1df   :  { %v1052_v55 = vsel %vm219_vm1, %v1051_v40, %v1032_v38  ;;  %v1088_v4 = vsel %vm219_vm1, %v5915_v49, %v4457_v42  ;;  %v1093_v32 = vrot.slane %v1081_v16, 4  ;;  %1956 = vmatpush.bf16.xpose.msra.mxu3 %v1948_v12  ;;  %v1130_v1 = vsel %vm219_vm1, 0.0, %v1129_v50 }
 0x1e0   :  { %v1058_v2 = vperm.slane %v1052_v55, %v4117_v35  ;;  %v1092_v37 = vperm.slane %v1088_v4, %v4079_v3  ;;  %v1053_v56 = vrot.slane %v1032_v38, 4  ;;  %v1138_v19 = vperm.slane %v1130_v1, %v4117_v35 }
 0x1e1   :  { %v1094_v53 = vsel %vm219_vm1, %v1093_v32, %v1075_v63  ;;  %v1042_v25 = vsel %vm219_vm1, %v1027_v5, %v1041_v15  ;;  %v664_v50 = vrot.slane %v4582_v62, 4  ;;  %v5916_v32 = vpack.i.bf16 %v4055_v51, %v4069_v58 }
 0x1e2   :  { %v1066_v57 = vsel %vm219_vm1, %v1058_v2, %v1065_v23  ;;  %v1100_v42 = vperm.slane %v1094_v53, %v4117_v35  ;;  %v1105_v48 = vrot.slane %v1092_v37, 4  ;;  %v1063_v26 = vrot.slane %v1058_v2, 4 }
 0x1e3   :  { %v1854_v47 = vpack.c.bf16 %v1066_v57, %v1066_v57  ;;  %v1054_v28 = vsel %vm219_vm1, %v1038_v7, %v1053_v56  ;;  %v1859_v4 = vpack.c.bf16 %v1138_v19, %v1138_v19  ;;  %v5917_v5 = vpack.i.bf16 %v4135_v52, %v4082_v6 }
 0x1e4   :  { %v1106_v40 = vsel %vm219_vm1, %v1105_v48, %v1086_v61  ;;  %v1119_v11 = vrot.slane %v1100_v42, 4  ;;  %v1064_v43 = vsel %vm219_vm1, %v1063_v26, %v1046_v59  ;;  %v1062_v38 = vperm.slane %v1054_v28, %v4117_v35 }
 0x1e5   :  { %v1112_v55 = vperm.slane %v1106_v40, %v4117_v35  ;;  %v1851_v49 = vpack.c.bf16 %v1064_v43, %v1064_v43  ;;  %3820 = vrot.lane.b32.xlu2 %v5916_v32, %s3978_s12  ;;  %3815 = vrot.lane.b32.xlu0 %v5917_v5, %s3978_s12  ;;  %v1141_v7 = vrot.slane %v1138_v19, 4  ;;  %v1095_v15 = vrot.slane %v1075_v63, 4 }
 0x1e6   :  { %v1067_v59 = vrot.slane %v1062_v38, 4  ;;  %v1107_v12 = vrot.slane %v1086_v61, 4  ;;  %v1981_v53 = vunpack.c.l.b16 %v1859_v4  ;;  %v1050_v1 = vperm.slane %v1042_v25, %v4117_v35 }
 0x1e7   :  { %v1120_v2 = vsel %vm219_vm1, %v1112_v55, %v1119_v11  ;;  %v1117_v23 = vrot.slane %v1112_v55, 4  ;;  %v1933_v57 = vunpack.c.l.b16 %v1854_v47  ;;  %v1142_v51 = vsel %vm219_vm1, 0.0, %v1141_v7 }
 0x1e8   :  { %v1855_v56 = vpack.c.bf16 %v1120_v2, %v1120_v2  ;;  %v1096_v58 = vsel %vm219_vm1, %v1081_v16, %v1095_v15  ;;  %v1862_v6 = vpack.c.bf16 %v1142_v51, %v1142_v51  ;;  %v1068_v52 = vsel %vm219_vm1, %v1067_v59, %v1050_v1 }
 0x1e9   :  { %v1118_v48 = vsel %vm219_vm1, %v1117_v23, %v1100_v42  ;;  %v1104_v63 = vperm.slane %v1096_v58, %v4117_v35  ;;  %v1886_v19 = vunpack.c.l.b16 %v1851_v49  ;;  %v1108_v28 = vsel %vm219_vm1, %v1092_v37, %v1107_v12 }
 0x1ea   :  { %v1934_v61 = vunpack.c.l.b16 %v1855_v56  ;;  %v1852_v26 = vpack.c.bf16 %v1118_v48, %v1118_v48  ;;  %v1983_v40 = vpack.c.b16 %v1981_v53, %v1981_v53  ;;  %v2027_v25 = vunpack.c.l.b16 %v1862_v6 }
 0x1eb   :  { %v1116_v47 = vperm.slane %v1108_v28, %v4117_v35  ;;  %v1069_v11 = vrot.slane %v1050_v1, 4  ;;  %v1857_v16 = vpack.c.bf16 %v1068_v52, %v1068_v52  ;;  %v1123_v4 = vrot.slane %v1104_v63, 4 }
 0x1ec   :  { %v1936_v43 = vpack.c.b16 %v1934_v61, %v1933_v57  ;;  %v1887_v55 = vunpack.c.l.b16 %v1852_v26  ;;  %v2029_v42 = vpack.c.b16 %v2027_v25, %v2027_v25  ;;  %v1994_v37 = vsel %vm1891_vm2, %v1983_v40, 0 }
 0x1ed   :  { %v1121_v32 = vrot.slane %v1116_v47, 4  ;;  %v1070_v5 = vsel %vm219_vm1, %v1062_v38, %v1069_v11  ;;  %v1124_v49 = vsel %vm219_vm1, %v1116_v47, %v1123_v4  ;;  %3825 = vrot.lane.b32.xlu0 %v4505_v29, %s3978_s12  ;;  %v4677_v38 = vsel %vm219_vm1, %v1154_v54, %v4558_v46 }
 0x1ee   :  { %v1945_v7 = vsel %vm1891_vm2, %v1936_v43, 0  ;;  %v1889_v59 = vpack.c.b16 %v1887_v55, %v1886_v19  ;;  %v1860_v15 = vpack.c.bf16 %v1070_v5, %v1070_v5  ;;  %v1861_v2 = vpack.c.bf16 %v1124_v49, %v1124_v49 }
 0x1ef   :  { %1957 = vmatpush.bf16.xpose.msra.mxu3 %v1945_v7  ;;  %v1122_v12 = vsel %vm219_vm1, %v1121_v32, %v1104_v63  ;;  %v2040_v53 = vsel %vm1891_vm2, %v2029_v42, 0  ;;  %v1979_v56 = vunpack.c.l.b16 %v1857_v16  ;;  %v1165_v51 = vrot.slane %v4561_v31, 4 }
 0x1f0   :  { %v1899_v23 = vsel %vm1891_vm2, %v1889_v59, 0  ;;  %v1858_v1 = vpack.c.bf16 %v1122_v12, %v1122_v12  ;;  %v2025_v57 = vunpack.c.l.b16 %v1860_v15  ;;  %v1167_v29 = vrot.slane %v4591_v39, 4 }
 0x1f1   :  { %1911 = vmatpush.bf16.xpose.msrb.mxu0 %v1899_v23  ;;  %3702 = vmatpush.bf16.xpose.msra.mxu1 %v1899_v23  ;;  %v621_v58 = vrot.slane %v4571_v60, 4  ;;  %v676_v18 = vrot.slane %v4585_v24, 4  ;;  %v653_v54 = vsel %vm219_vm1, %v652_v22, %v4575_v21  ;;  %v665_v48 = vsel %vm219_vm1, %v664_v50, %v4579_v34 }
 0x1f2   :  { %v1980_v46 = vunpack.c.l.b16 %v1858_v1  ;;  %v2026_v6 = vunpack.c.l.b16 %v1861_v2  ;;  %v4695_v52 = vsel %vm219_vm1, %v1165_v51, %v4591_v39  ;;  %v4699_v63 = vsel %vm219_vm1, %v4561_v31, %v1167_v29 }
 0x1f3   :  { %v622_v61 = vsel %vm219_vm1, %v621_v58, %v4323_v36  ;;  %v666_v0 = vrot.slane %v4579_v34, 4  ;;  %v635_v26 = vrot.slane %v4348_v10, 4  ;;  %v657_v19 = vperm.slane %v653_v54, %v4079_v3 }
 0x1f4   :  { %v1982_v21 = vpack.c.b16 %v1980_v46, %v1979_v56  ;;  %v628_v22 = vperm.slane %v622_v61, %v4117_v35  ;;  %v2028_v50 = vpack.c.b16 %v2026_v6, %v2025_v57  ;;  %v671_v39 = vperm.slane %v665_v48, %v4117_v35 }
 0x1f5   :  { %v5918_v28 = vrot.slane %v4323_v36, 4  ;;  %v5919_v40 = vpack.c.b16 %v4268_v30, %v4266_v27  ;;  %v1882_v34 = vpack.c.b16 %v4342_v8, %v4342_v8  ;;  %v639_v11 = vrot.slane %v4355_v17, 4 }
 0x1f6   :  { %v1991_v25 = vsel %vm1891_vm2, %v1982_v21, 0  ;;  %v636_v47 = vsel %vm219_vm1, %v628_v22, %v635_v26  ;;  %v677_v43 = vsel %vm219_vm1, %v676_v18, %v657_v19  ;;  %v690_v36 = vrot.slane %v671_v39, 4 }
 0x1f7   :  { %2002 = vmatpush.bf16.xpose.msrb.mxu3 %v1994_v37  ;;  %v624_v31 = vsel %vm219_vm1, %v4571_v60, %v5918_v28  ;;  %v1842_v55 = vpack.c.bf16 %v636_v47, %v636_v47  ;;  %v633_v16 = vrot.slane %v628_v22, 4  ;;  %v5920_v60 = vpack.c.b16 %v4275_v45, %v4270_v33 }
 0x1f8   :  { %3656 = vmatmul.msk.bf16.vlgmr.msra.gmra.mxu3 %vm1891_vm2, %v5919_v40  ;;  %3655 = vmatmul.msk.bf16.vlgmr.msra.gmra.mxu1 %vm1891_vm2, %v1882_v34  ;;  %v683_v27 = vperm.slane %v677_v43, %v4117_v35  ;;  %v632_v30 = vperm.slane %v624_v31, %v4117_v35  ;;  %v667_v8 = vsel %vm219_vm1, %v4582_v62, %v666_v0  ;;  %v678_v4 = vrot.slane %v657_v19, 4  ;;  %v5923_v43 = vld [vmem:[#allocation4_spill] sm:$0xff] }
 0x1f9   :  { %2048 = vmatpush.bf16.xpose.msrb.mxu1 %v2040_v53  ;;  %3654 = vmatmul.msk.bf16.vlgmr.msrb.gmra.mxu0 %vm1891_vm2, %v5920_v60  ;;  %v573_v42 = vrot.slane %v4310_v20, 4  ;;  %v2037_v32 = vsel %vm1891_vm2, %v2028_v50, 0  ;;  %v634_v33 = vsel %vm219_vm1, %v633_v16, %v4348_v10  ;;  %v675_v45 = vperm.slane %v667_v8, %v4117_v35 }
 0x1fa   :  { %v691_v5 = vsel %vm219_vm1, %v683_v27, %v690_v36  ;;  %v688_v7 = vrot.slane %v683_v27, 4  ;;  %v1839_v59 = vpack.c.bf16 %v634_v33, %v634_v33  ;;  %v640_v49 = vsel %vm219_vm1, %v632_v30, %v639_v11  ;;  %v5922_v11 = vld [vmem:[#allocation5_spill] sm:$0xff] }
 0x1fb   :  { %v1832_v62 = vpack.c.bf16 %v4345_v9, %v4345_v9  ;;  %v1843_v15 = vpack.c.bf16 %v691_v5, %v691_v5  ;;  %v679_v20 = vsel %vm219_vm1, %v4585_v24, %v678_v4  ;;  %v694_v37 = vrot.slane %v675_v45, 4 }
 0x1fc   :  { %v4742_v12 = vunpack.c.l.b16 %v1842_v55  ;;  %v689_v10 = vsel %vm219_vm1, %v688_v7, %v671_v39  ;;  %v687_v2 = vperm.slane %v679_v20, %v4117_v35  ;;  %v637_v23 = vrot.slane %v632_v30, 4 }
 0x1fd   :  { %v4746_v53 = vunpack.c.l.b16 %v1843_v15  ;;  %v1840_v1 = vpack.c.bf16 %v689_v10, %v689_v10  ;;  %v4748_v56 = vunpack.c.l.b16 %v1839_v59  ;;  %v1848_v57 = vpack.c.bf16 %v640_v49, %v640_v49 }
 0x1fe   :  { %v695_v9 = vsel %vm219_vm1, %v687_v2, %v694_v37  ;;  %v638_v51 = vsel %vm219_vm1, %v637_v23, %v4355_v17  ;;  %v692_v24 = vrot.slane %v687_v2, 4  ;;  %v1927_v54 = vunpack.c.l.b16 %v1832_v62 }
 0x1ff   :  { %2003 = vmatpush.bf16.xpose.msrb.mxu3 %v1991_v25  ;;  %v4755_v58 = vunpack.c.l.b16 %v1840_v1  ;;  %v1849_v18 = vpack.c.bf16 %v695_v9, %v695_v9  ;;  %v1845_v46 = vpack.c.bf16 %v638_v51, %v638_v51  ;;  %v574_v48 = vsel %vm219_vm1, 0.0, %v573_v42 }
 0x200   :  { %v693_v6 = vsel %vm219_vm1, %v692_v24, %v675_v45  ;;  %v4761_v0 = vunpack.c.l.b16 %v1848_v57  ;;  %v582_v22 = vperm.slane %v574_v48, %v4117_v35  ;;  %v1929_v39 = vpack.c.b16 %v1927_v54, %v1927_v54 }
 0x201   :  { %2049 = vmatpush.bf16.xpose.msrb.mxu1 %v2037_v32  ;;  %v4763_v21 = vunpack.c.l.b16 %v1849_v18  ;;  %v1846_v17 = vpack.c.bf16 %v693_v6, %v693_v6  ;;  %v4768_v50 = vunpack.c.l.b16 %v1845_v46  ;;  %v5921_v40 = vpack.c.b16 %v4291_v13, %v4287_v44 }
 0x202   :  { %v585_v31 = vrot.slane %v582_v22, 4  ;;  %v5924_v36 = vpack.c.b16 %v5922_v11, %v5923_v43  ;;  %v1835_v16 = vpack.c.bf16 %v582_v22, %v582_v22  ;;  %v696_v13 = vsel %vm219_vm1, 0.0, %v4546_v14 }
 0x203   :  { %v4770_v19 = vunpack.c.l.b16 %v1846_v17  ;;  %v700_v30 = vperm.slane %v696_v13, %v4079_v3  ;;  %v4805_v23 = vperm.slane %v4677_v38, %v4079_v3  ;;  %v4809_v1 = vperm.slane %v4695_v52, %v4117_v35 }
 0x204   :  { %v586_v34 = vsel %vm219_vm1, 0.0, %v585_v31  ;;  %v1973_v60 = vunpack.c.l.b16 %v1835_v16  ;;  %v4815_v24 = vperm.slane %v4699_v63, %v4117_v35 }
 0x205   :  { %v1838_v25 = vpack.c.bf16 %v586_v34, %v586_v34  ;;  %v701_v4 = vrot.slane %v700_v30, 4  ;;  %v706_v42 = vperm.slane %v700_v30, %v4117_v35  ;;  %v1179_v63 = vrot.slane %v4805_v23, 4 }
 0x206   :  { %v1975_v27 = vpack.c.b16 %v1973_v60, %v1973_v60  ;;  %v1191_v11 = vrot.slane %v4809_v1, 4 }
 0x207   :  { %v2019_v47 = vunpack.c.l.b16 %v1838_v25  ;;  %v702_v32 = vsel %vm219_vm1, 0.0, %v701_v4  ;;  %v711_v45 = vrot.slane %v706_v42, 4  ;;  %v1841_v62 = vpack.c.bf16 %v706_v42, %v706_v42 }
 0x208   :  { %3657 = vmatmul.msk.bf16.gmra.mxu3 %vm1891_vm2, %v1929_v39  ;;  %3660 = vmatmul.msk.bf16.vlgmr.msrb.gmra.mxu1 %vm1891_vm2, %v5921_v40  ;;  %v4796_v5 = vperm.slane %v702_v32, %v4117_v35 }
 0x209   :  { %v2021_v55 = vpack.c.b16 %v2019_v47, %v2019_v47  ;;  %v712_v59 = vsel %vm219_vm1, 0.0, %v711_v45  ;;  %v4817_v18 = vunpack.c.l.b16 %v1841_v62 }
 0x20a   :  { %v713_v14 = vrot.slane %v4796_v5, 4  ;;  %v1844_v15 = vpack.c.bf16 %v712_v59, %v712_v59 }
 0x20c   :  { %v714_v20 = vsel %vm219_vm1, 0.0, %v713_v14  ;;  %v4820_v48 = vunpack.c.l.b16 %v1844_v15 }
 0x20d   :  { %v1850_v38 = vpack.c.bf16 %v714_v20, %v714_v20 }
 0x20f   :  { %v4839_v13 = vunpack.c.l.b16 %v1850_v38 }
 0x218   :  { %3658 = vmatmul.msk.bf16.vlgmr.msrb.gmra.mxu3 %vm1891_vm2, %v5924_v36  ;;  %3661 = vmatmul.msk.bf16.gmra.mxu1 %vm1891_vm2, %v2021_v55 }
 0x21d   :  { %v3781_v33 = vpop.permute.xlu1 %3780 }
 0x21e   :  { %v3782_v49 = vunpack.i.l.bf16 %v3781_v33  ;;  %v3783_v46 = vunpack.i.h.bf16 %v3781_v33 }
 0x220   :  { %v999_v37 = vrot.slane %v3782_v49, 4 }
 0x222   :  { %v1000_v39 = vsel %vm219_vm1, %v999_v37, %v3783_v46 }
 0x223   :  { %v4786_v44 = vpop.permute.xlu2 %3785  ;;  %v1004_v60 = vperm.slane %v1000_v39, %v4079_v3 }
 0x224   :  { %v3788_v31 = vunpack.i.h.bf16 %v4786_v44  ;;  %v3787_v34 = vunpack.i.l.bf16 %v4786_v44 }
 0x225   :  { %v4811_v57 = vpop.permute.xlu1 %3805 }
 0x226   :  { %v3807_v40 = vunpack.i.l.bf16 %v4811_v57  ;;  %v957_v30 = vrot.slane %v3788_v31, 4  ;;  %v943_v45 = vrot.slane %v3787_v34, 4  ;;  %v3808_v62 = vunpack.i.h.bf16 %v4811_v57 }
 0x228   :  { %3659 = vmatmul.msk.bf16.gmra.mxu3 %vm1891_vm2, %v1975_v27  ;;  %v1343_v4 = vrot.slane %v3807_v40, 4 }
 0x22b   :  { %v4791_v8 = vpop.permute.xlu2 %3795 }
 0x22c   :  { %v3798_v59 = vunpack.i.h.bf16 %v4791_v8  ;;  %v3797_v15 = vunpack.i.l.bf16 %v4791_v8 }
 0x237   :  { %v4798_v7 = vpop.permute.xlu2 %3810 }
 0x238   :  { %v3813_v54 = vunpack.i.h.bf16 %v4798_v7 }
 0x23a   :  { %v1345_v43 = vrot.slane %v3813_v54, 4  ;;  %v1344_v20 = vsel %vm219_vm1, %v1343_v4, %v3813_v54 }
 0x23c   :  { %v3776_v2 = vpop.permute.xlu0 %3775  ;;  %v1346_v37 = vsel %vm219_vm1, %v3807_v40, %v1345_v43 }
 0x23d   :  { %v3777_v51 = vunpack.i.l.bf16 %v3776_v2  ;;  %v3778_v52 = vunpack.i.h.bf16 %v3776_v2  ;;  %v4861_v4 = vperm.slane %v1346_v37, %v4079_v3 }
 0x23f   :  { %v3821_v10 = vpop.permute.xlu2 %3820  ;;  %v1005_v22 = vrot.slane %v3777_v51, 4 }
 0x240   :  { %v3823_v9 = vunpack.i.h.bf16 %v3821_v10  ;;  %v3822_v17 = vunpack.i.l.bf16 %v3821_v10 }
 0x241   :  { %v1006_v47 = vsel %vm219_vm1, %v1005_v22, %v3778_v52  ;;  %v1387_v22 = vrot.slane %v3798_v59, 4 }
 0x242   :  { %v1445_v6 = vrot.slane %v3823_v9, 4  ;;  %v1010_v36 = vperm.slane %v1006_v47, %v4079_v3  ;;  %v1443_v42 = vrot.slane %v3822_v17, 4 }
 0x244   :  { %v1446_v25 = vsel %vm219_vm1, %v3822_v17, %v1445_v6  ;;  %v1011_v32 = vrot.slane %v1010_v36, 4  ;;  %v3791_v33 = vpop.permute.xlu0 %3790  ;;  %v1444_v38 = vsel %vm219_vm1, %v1443_v42, %v3823_v9 }
 0x245   :  { %v3793_v14 = vunpack.i.h.bf16 %v3791_v33  ;;  %v3792_v49 = vunpack.i.l.bf16 %v3791_v33  ;;  %v4865_v42 = vperm.slane %v1444_v38, %v4079_v3  ;;  %v4872_v37 = vperm.slane %v1446_v25, %v4079_v3 }
 0x246   :  { %v1012_v52 = vsel %vm219_vm1, %v1011_v32, %v1004_v60  ;;  %v3812_v60 = vunpack.i.l.bf16 %v4798_v7  ;;  %v1331_v25 = vrot.slane %v3797_v15, 4 }
 0x247   :  { %v955_v10 = vrot.slane %v3793_v14, 4  ;;  %v958_v2 = vsel %vm219_vm1, %v3793_v14, %v957_v30  ;;  %v944_v51 = vsel %vm219_vm1, %v943_v45, %v3792_v49  ;;  %v945_v46 = vrot.slane %v3792_v49, 4 }
 0x248   :  { %v966_v6 = vperm.slane %v958_v2, %v4079_v3  ;;  %v950_v17 = vperm.slane %v944_v51, %v4079_v3  ;;  %v1016_v40 = vperm.slane %v1012_v52, %v4117_v35  ;;  %v1350_v30 = vperm.slane %v1344_v20, %v4079_v3 }
 0x249   :  { %v956_v54 = vsel %vm219_vm1, %v955_v10, %v3788_v31  ;;  %v946_v39 = vsel %vm219_vm1, %v3787_v34, %v945_v46 }
 0x24a   :  { %v962_v47 = vperm.slane %v956_v54, %v4079_v3  ;;  %v979_v43 = vrot.slane %v966_v6, 4  ;;  %v954_v9 = vperm.slane %v946_v39, %v4079_v3  ;;  %v969_v36 = vrot.slane %v950_v17, 4 }
 0x24b   :  { %v4876_v51 = vrot.slane %v1016_v40, 4  ;;  %v1399_v39 = vrot.slane %v3808_v62, 4 }
 0x24c   :  { %v967_v31 = vrot.slane %v962_v47, 4  ;;  %v970_v34 = vsel %vm219_vm1, %v962_v47, %v969_v36  ;;  %v980_v32 = vsel %vm219_vm1, %v979_v43, %v954_v9  ;;  %v981_v33 = vrot.slane %v954_v9, 4  ;;  %v3801_v45 = vpop.permute.xlu0 %3800 }
 0x24d   :  { %v978_v14 = vperm.slane %v970_v34, %v4117_v35  ;;  %v986_v49 = vperm.slane %v980_v32, %v4117_v35  ;;  %v3803_v20 = vunpack.i.h.bf16 %v3801_v45  ;;  %v3802_v10 = vunpack.i.l.bf16 %v3801_v45 }
 0x24e   :  { %v968_v7 = vsel %vm219_vm1, %v967_v31, %v950_v17  ;;  %v982_v2 = vsel %vm219_vm1, %v966_v6, %v981_v33  ;;  %v1455_v47 = vrot.slane %v3812_v60, 4  ;;  %v1355_v36 = vrot.slane %v1350_v30, 4 }
 0x24f   :  { %v974_v46 = vperm.slane %v968_v7, %v4117_v35  ;;  %v4880_v38 = vperm.slane %v982_v2, %v4117_v35  ;;  %v993_v52 = vrot.slane %v978_v14, 4  ;;  %v995_v54 = vrot.slane %v986_v49, 4 }
 0x250   :  { %v1389_v43 = vrot.slane %v3803_v20, 4  ;;  %v1388_v40 = vsel %vm219_vm1, %v1387_v22, %v3803_v20  ;;  %v1333_v9 = vrot.slane %v3802_v10, 4  ;;  %v1367_v31 = vrot.slane %v4861_v4, 4 }
 0x251   :  { %v991_v17 = vrot.slane %v974_v46, 4  ;;  %v994_v6 = vsel %vm219_vm1, 0.0, %v993_v52  ;;  %v997_v34 = vrot.slane %v4880_v38, 4  ;;  %v1332_v32 = vsel %vm219_vm1, %v1331_v25, %v3802_v10 }
 0x252   :  { %v1469_v33 = vrot.slane %v4865_v42, 4  ;;  %v1481_v45 = vrot.slane %v4872_v37, 4  ;;  %v1203_v49 = vsel %vm219_vm1, %v995_v54, %v978_v14  ;;  %v1252_v7 = vsel %vm219_vm1, 0.0, %v4876_v51 }
 0x253   :  { %v4897_v2 = vsel %vm219_vm1, 0.0, %v995_v54  ;;  %v1197_v22 = vrot.slane %v994_v6, 4  ;;  %v1390_v20 = vsel %vm219_vm1, %v3798_v59, %v1389_v43  ;;  %v4903_v46 = vperm.slane %v1388_v40, %v4079_v3  ;;  %v5925_v6 = vld [vmem:[#allocation6_spill] sm:$0xff] }
 0x254   :  { %v992_v52 = vsel %vm219_vm1, 0.0, %v991_v17  ;;  %v1334_v14 = vsel %vm219_vm1, %v3797_v15, %v1333_v9  ;;  %v1338_v25 = vperm.slane %v1332_v32, %v4079_v3  ;;  %v4911_v54 = vsel %vm219_vm1, 0.0, %v997_v34 }
 0x255   :  { %v4915_v44 = vsel %vm219_vm1, %v991_v17, %v5925_v6  ;;  %v4918_v59 = vperm.slane %v1203_v49, %v4079_v3  ;;  %v1342_v43 = vperm.slane %v1334_v14, %v4079_v3  ;;  %v4928_v17 = vsel %vm219_vm1, %v1197_v22, %v992_v52 }
 0x256   :  { %v1356_v40 = vsel %vm219_vm1, %v1355_v36, %v1338_v25  ;;  %v1357_v8 = vrot.slane %v1338_v25, 4  ;;  %v1398_v22 = vperm.slane %v1390_v20, %v4079_v3 }
 0x257   :  { %v3816_v10 = vpop.permute.xlu0 %3815  ;;  %v1368_v32 = vsel %vm219_vm1, %v1367_v31, %v1342_v43  ;;  %v1369_v27 = vrot.slane %v1342_v43, 4  ;;  %v1362_v14 = vperm.slane %v1356_v40, %v4117_v35 }
 0x258   :  { %v3818_v16 = vunpack.i.h.bf16 %v3816_v10  ;;  %v3817_v28 = vunpack.i.l.bf16 %v3816_v10  ;;  %v1358_v49 = vsel %vm219_vm1, %v1350_v30, %v1357_v8  ;;  %v1208_v10 = vrot.slane %v4911_v54, 4 }
 0x259   :  { %v1366_v25 = vperm.slane %v1358_v49, %v4117_v35  ;;  %v1425_v49 = vrot.slane %v1398_v22, 4 }
 0x25a   :  { %v1456_v15 = vsel %vm219_vm1, %v1455_v47, %v3818_v16  ;;  %v1457_v9 = vrot.slane %v3818_v16, 4  ;;  %v1370_v16 = vsel %vm219_vm1, %v4861_v4, %v1369_v27  ;;  %v4937_v47 = vperm.slane %v1368_v32, %v4117_v35 }
 0x25b   :  { %v4925_v34 = vperm.slane %v1456_v15, %v4079_v3  ;;  %v1378_v30 = vperm.slane %v1370_v16, %v4117_v35  ;;  %v1381_v6 = vrot.slane %v1366_v25, 4  ;;  %v1400_v27 = vsel %vm219_vm1, %v1399_v39, %v3817_v28 }
 0x25c   :  { %v1458_v36 = vsel %vm219_vm1, %v3812_v60, %v1457_v9  ;;  %v1413_v60 = vrot.slane %v4903_v46, 4  ;;  %v1379_v4 = vrot.slane %v1362_v14, 4  ;;  %v1401_v15 = vrot.slane %v3817_v28, 4 }
 0x25d   :  { %v1466_v31 = vperm.slane %v1458_v36, %v4079_v3  ;;  %v1470_v52 = vsel %vm219_vm1, %v4925_v34, %v1469_v33  ;;  %v4947_v40 = vrot.slane %v1378_v30, 4  ;;  %v1382_v9 = vsel %vm219_vm1, 0.0, %v1381_v6 }
 0x25e   :  { %v1383_v20 = vrot.slane %v4937_v47, 4  ;;  %v1478_v32 = vperm.slane %v1470_v52, %v4117_v35  ;;  %v1573_v25 = vsel %vm219_vm1, %v1381_v6, %v1362_v14  ;;  %v1578_v16 = vrot.slane %v1382_v9, 4 }
 0x25f   :  { %v1479_v43 = vrot.slane %v1466_v31, 4  ;;  %v1482_v8 = vsel %vm219_vm1, %v1466_v31, %v1481_v45  ;;  %v1215_v45 = vsel %vm219_vm1, %v4876_v51, %v4880_v38  ;;  %v4964_v28 = vsel %vm219_vm1, 0.0, %v4947_v40 }
 0x260   :  { %v4957_v39 = vperm.slane %v1482_v8, %v4117_v35  ;;  %v1406_v30 = vperm.slane %v1400_v27, %v4079_v3  ;;  %v1380_v51 = vsel %vm219_vm1, 0.0, %v1379_v4  ;;  %v4975_v38 = vsel %vm219_vm1, 0.0, %v1383_v20 }
 0x261   :  { %v1480_v33 = vsel %vm219_vm1, %v1479_v43, %v4872_v37  ;;  %v1402_v37 = vsel %vm219_vm1, %v3808_v62, %v1401_v15  ;;  %v1256_v43 = vperm.slane %v1252_v7, %v4079_v3  ;;  %v1493_v14 = vrot.slane %v1478_v32, 4 }
 0x262   :  { %v1486_v36 = vperm.slane %v1480_v33, %v4117_v35  ;;  %5926 = vst [vmem:[#allocation5_spill] sm:$0xff] %v4957_v39  ;;  %v1410_v52 = vperm.slane %v1402_v37, %v4079_v3  ;;  %v4979_v6 = vperm.slane %v1573_v25, %v4079_v3  ;;  %v1497_v62 = vrot.slane %v4957_v39, 4 }
 0x263   :  { %v1579_v7 = vsel %vm219_vm1, %v1578_v16, %v1380_v51  ;;  %v1411_v15 = vrot.slane %v1406_v30, 4  ;;  %v1414_v4 = vsel %vm219_vm1, %v1406_v30, %v1413_v60  ;;  %v1262_v25 = vperm.slane %v1256_v43, %v4117_v35 }
 0x264   :  { %v1495_v31 = vrot.slane %v1486_v36, 4  ;;  %v1423_v9 = vrot.slane %v1410_v52, 4  ;;  %v1422_v20 = vperm.slane %v1414_v4, %v4117_v35  ;;  %v1426_v33 = vsel %vm219_vm1, %v1410_v52, %v1425_v49 }
 0x265   :  { %v1257_v36 = vrot.slane %v1256_v43, 4  ;;  %v4992_v37 = vsel %vm219_vm1, 0.0, %v1493_v14  ;;  %v1434_v16 = vperm.slane %v1426_v33, %v4117_v35  ;;  %v1267_v49 = vrot.slane %v1262_v25, 4 }
 0x266   :  { %v4984_v27 = vsel %vm219_vm1, %v1495_v31, %v1478_v32  ;;  %v1412_v32 = vsel %vm219_vm1, %v1411_v15, %v4903_v46  ;;  %v1424_v26 = vsel %vm219_vm1, %v1423_v9, %v1398_v22  ;;  %v1437_v51 = vrot.slane %v1422_v20, 4 }
 0x267   :  { %v1418_v60 = vperm.slane %v1412_v32, %v4117_v35  ;;  %v5000_v30 = vperm.slane %v1424_v26, %v4117_v35  ;;  %v5003_v52 = vperm.slane %v1579_v7, %v4079_v3  ;;  %v5006_v43 = vsel %vm219_vm1, 0.0, %v1497_v62 }
 0x268   :  { %v5008_v14 = vrot.slane %v1434_v16, 4  ;;  %v1865_v46 = vpack.c.bf16 %v1262_v25, %v1262_v25  ;;  %v5011_v22 = vsel %vm219_vm1, 0.0, %v1437_v51  ;;  %v5014_v4 = vperm.slane %v1215_v45, %v4079_v3 }
 0x269   :  { %v1435_v15 = vrot.slane %v1418_v60, 4  ;;  %v1258_v26 = vsel %vm219_vm1, 0.0, %v1257_v36  ;;  %v5018_v9 = vsel %vm219_vm1, 0.0, %v1495_v31  ;;  %v1268_v62 = vsel %vm219_vm1, 0.0, %v1267_v49 }
 0x26a   :  { %v2073_v20 = vunpack.c.l.b16 %v1865_v46  ;;  %v1439_v25 = vrot.slane %v5000_v30, 4  ;;  %v5025_v32 = vsel %vm219_vm1, %v1437_v51, %v1418_v60  ;;  %v1868_v16 = vpack.c.bf16 %v1268_v62, %v1268_v62 }
 0x26b   :  { %v5029_v45 = vsel %vm219_vm1, 0.0, %v5008_v14  ;;  %v1266_v61 = vperm.slane %v1258_v26, %v4117_v35  ;;  %v5034_v46 = vsel %vm219_vm1, 0.0, %v1435_v15  ;;  %v1164_v33 = vperm.slane %v4915_v44, %v4079_v3 }
 0x26c   :  { %v2075_v36 = vpack.c.b16 %v2073_v20, %v2073_v20  ;;  %v2119_v49 = vunpack.c.l.b16 %v1868_v16  ;;  %v1209_v60 = vsel %vm219_vm1, %v1208_v10, %v4897_v2  ;;  %v1202_v20 = vperm.slane %v4928_v17, %v4079_v3 }
 0x26d   :  { %v1871_v62 = vpack.c.bf16 %v1266_v61, %v1266_v61  ;;  %v1269_v29 = vrot.slane %v1266_v61, 4  ;;  %v5046_v26 = vsel %vm219_vm1, 0.0, %v1439_v25  ;;  %v1177_v16 = vrot.slane %v1164_v33, 4 }
 0x26e   :  { %v2086_v51 = vsel %vm1891_vm2, %v2075_v36, 0  ;;  %v2121_v15 = vpack.c.b16 %v2119_v49, %v2119_v49  ;;  %v1213_v44 = vperm.slane %v1209_v60, %v4079_v3  ;;  %v1220_v2 = vrot.slane %v4918_v59, 4 }
 0x26f   :  { %2094 = vmatpush.bf16.xpose.msra.mxu2 %v2086_v51  ;;  %v2165_v57 = vunpack.c.l.b16 %v1871_v62  ;;  %v1270_v54 = vsel %vm219_vm1, 0.0, %v1269_v29  ;;  %v1232_v10 = vrot.slane %v5014_v4, 4  ;;  %v1178_v25 = vsel %vm219_vm1, %v1177_v16, %v4805_v23 }
 0x270   :  { %v2132_v36 = vsel %vm1891_vm2, %v2121_v15, 0  ;;  %v1874_v17 = vpack.c.bf16 %v1270_v54, %v1270_v54  ;;  %v1184_v29 = vperm.slane %v1178_v25, %v4117_v35  ;;  %v1221_v62 = vsel %vm219_vm1, %v1220_v2, %v1202_v20 }
 0x271   :  { %2140 = vmatpush.bf16.xpose.msra.mxu3 %v2132_v36  ;;  %v2167_v49 = vpack.c.b16 %v2165_v57, %v2165_v57  ;;  %v1233_v7 = vsel %vm219_vm1, %v1232_v10, %v1213_v44  ;;  %v1227_v61 = vperm.slane %v1221_v62, %v4117_v35  ;;  %v1222_v62 = vrot.slane %v1202_v20, 4 }
 0x272   :  { %v2211_v31 = vunpack.c.l.b16 %v1874_v17  ;;  %v1239_v15 = vperm.slane %v1233_v7, %v4117_v35  ;;  %v1192_v57 = vsel %vm219_vm1, %v1184_v29, %v1191_v11  ;;  %v1189_v36 = vrot.slane %v1184_v29, 4 }
 0x273   :  { %v2178_v16 = vsel %vm1891_vm2, %v2167_v49, 0  ;;  %v1246_v25 = vrot.slane %v1227_v61, 4  ;;  %v1866_v10 = vpack.c.bf16 %v1192_v57, %v1192_v57  ;;  %v1180_v49 = vsel %vm219_vm1, %v1164_v33, %v1179_v63 }
 0x274   :  { %2186 = vmatpush.bf16.xpose.msra.mxu0 %v2178_v16  ;;  %v2213_v2 = vpack.c.b16 %v2211_v31, %v2211_v31  ;;  %v1244_v17 = vrot.slane %v1239_v15, 4  ;;  %v1190_v7 = vsel %vm219_vm1, %v1189_v36, %v4809_v1  ;;  %v1234_v55 = vrot.slane %v1213_v44, 4 }
 0x275   :  { %v5058_v60 = vpop.f32.mrf.mxu1  ;;  %v1247_v29 = vsel %vm219_vm1, %v1239_v15, %v1246_v25  ;;  %v2117_v31 = vunpack.c.l.b16 %v1866_v10  ;;  %v1188_v1 = vperm.slane %v1180_v49, %v4117_v35  ;;  %v1223_v23 = vsel %vm219_vm1, %v4918_v59, %v1222_v62 }
 0x276   :  { %v5056_v51 = vpop.f32.mrf.mxu0  ;;  %v2224_v8 = vsel %vm1891_vm2, %v2213_v2, 0  ;;  %v1245_v16 = vsel %vm219_vm1, %v1244_v17, %v1227_v61  ;;  %v1867_v57 = vpack.c.bf16 %v1247_v29, %v1247_v29  ;;  %v1235_v63 = vsel %vm219_vm1, %v5014_v4, %v1234_v55 }
 0x277   :  { %v2245_v54 = vsel %vm2244_vm3, %v5056_v51, -inf  ;;  %2232 = vmatpush.bf16.xpose.msra.mxu1 %v2224_v8  ;;  %v1864_v39 = vpack.c.bf16 %v1245_v16, %v1245_v16  ;;  %v5927_v20 = vrot.slane %v4925_v34, 4  ;;  %v5928_v36 = vrot.slane %v4815_v24, 4 }
 0x278   :  { %2246 = vmax.xlane.f32.xlu0 %v2245_v54  ;;  %v1863_v54 = vpack.c.bf16 %v1190_v7, %v1190_v7  ;;  %v2118_v8 = vunpack.c.l.b16 %v1867_v57  ;;  %v5929_v55 = vrot.slane %v5011_v22, 4  ;;  %v1231_v25 = vperm.slane %v1223_v23, %v4117_v35 }
 0x279   :  { %v1468_v44 = vsel %vm219_vm1, %v5927_v20, %v4865_v42  ;;  %v2072_v15 = vunpack.c.l.b16 %v1864_v39  ;;  %v1196_v2 = vsel %vm219_vm1, %v1188_v1, %v5928_v36  ;;  %v1243_v34 = vperm.slane %v1235_v63, %v4117_v35 }
 0x27a   :  { %v2071_v61 = vunpack.c.l.b16 %v1863_v54  ;;  %v5099_v4 = vsel %vm219_vm1, %v5929_v55, %v5034_v46  ;;  %v1193_v42 = vrot.slane %v1188_v1, 4  ;;  %v2120_v10 = vpack.c.b16 %v2118_v8, %v2117_v31 }
 0x27b   :  { %v5076_v11 = vpop.f32.mrf.mxu3  ;;  %v1872_v39 = vpack.c.bf16 %v1196_v2, %v1196_v2  ;;  %v1474_v7 = vperm.slane %v1468_v44, %v4117_v35  ;;  %v1250_v49 = vrot.slane %v1231_v25, 4  ;;  %v1248_v29 = vrot.slane %v1243_v34, 4 }
 0x27c   :  { %v2255_v33 = vsel %vm2244_vm3, %v5076_v11, -inf  ;;  %v2074_v17 = vpack.c.b16 %v2072_v15, %v2071_v61  ;;  %v1194_v62 = vsel %vm219_vm1, %v1193_v42, %v4815_v24  ;;  %v2129_v22 = vsel %vm1891_vm2, %v2120_v10, 0 }
 0x27d   :  { %2256 = vmax.xlane.f32.xlu1 %v2255_v33  ;;  %v1920_v59 = vpop.f32.mrf.mxu1  ;;  %v1869_v16 = vpack.c.bf16 %v1194_v62, %v1194_v62  ;;  %v1491_v57 = vrot.slane %v1474_v7, 4  ;;  %2141 = vmatpush.bf16.xpose.msra.mxu3 %v2129_v22  ;;  %v1251_v31 = vsel %vm219_vm1, %v1243_v34, %v1250_v49  ;;  %v1249_v1 = vsel %vm219_vm1, %v1248_v29, %v1231_v25 }
 0x27e   :  { %v2083_v46 = vsel %vm1891_vm2, %v2074_v17, 0  ;;  %v5112_v23 = vpop.f32.mrf.mxu0  ;;  %v1684_v24 = vperm.slane %v1474_v7, %v4079_v3  ;;  %v1873_v63 = vpack.c.bf16 %v1251_v31, %v1251_v31  ;;  %v2209_v33 = vunpack.c.l.b16 %v1872_v39 }
 0x27f   :  { %2095 = vmatpush.bf16.xpose.msra.mxu2 %v2083_v46  ;;  %v1870_v20 = vpack.c.bf16 %v1249_v1, %v1249_v1  ;;  %v1492_v44 = vsel %vm219_vm1, 0.0, %v1491_v57  ;;  %v2163_v8 = vunpack.c.l.b16 %v1869_v16  ;;  %v5930_v36 = vrot.slane %v4992_v37, 4 }
 0x280   :  { %v1685_v61 = vrot.slane %v1684_v24, 4  ;;  %v1690_v15 = vperm.slane %v1684_v24, %v4117_v35  ;;  %v2210_v59 = vunpack.c.l.b16 %v1873_v63  ;;  %v3979_v25 = vmov 0  }
 0x281   :  { %v5120_v2 = vsel %vm219_vm1, %v5930_v36, %v1492_v44  ;;  %v2164_v55 = vunpack.c.l.b16 %v1870_v20  ;;  %v5123_v34 = vsel %vm2581_vm4, 65535, %v3979_v25  ;;  %v2248_v42 = vsel %vm2244_vm3, %v5112_v23, -inf }
 0x282   :  { %v1686_v17 = vsel %vm219_vm1, 0.0, %v1685_v61  ;;  %v1695_v39 = vrot.slane %v1690_v15, 4  ;;  %v2536_v7 = vpack.c.bf16 %v1690_v15, %v1690_v15  ;;  %2249 = vmax.xlane.f32.xlu2 %v2248_v42  ;;  %v2212_v37 = vpack.c.b16 %v2210_v59, %v2209_v33 }
 0x283   :  { %v5108_v54 = vpop.f32.mrf.mxu3  ;;  %v2166_v49 = vpack.c.b16 %v2164_v55, %v2163_v8  ;;  %v2252_v62 = vsel %vm2251_vm5, %v5058_v60, -inf  ;;  %v1694_v29 = vperm.slane %v1686_v17, %v4117_v35  ;;  %v1584_v16 = vsel %vm219_vm1, %v4947_v40, %v4937_v47 }
 0x284   :  { %v1696_v22 = vsel %vm219_vm1, 0.0, %v1695_v39  ;;  %v2571_v46 = vunpack.c.l.b16 %v2536_v7  ;;  %2253 = vmax.xlane.f32.xlu0 %v2252_v62  ;;  %v5931_v57 = vrot.slane %v4964_v28, 4  ;;  %v2221_v1 = vsel %vm1891_vm2, %v2212_v37, 0 }
 0x285   :  { %v5127_v10 = vpop.f32.mrf.mxu1  ;;  %v2175_v24 = vsel %vm1891_vm2, %v2166_v49, 0  ;;  %v5932_v63 = vpack.c.b16 %v4746_v53, %v4742_v12  ;;  %v5933_v33 = vpack.c.b16 %v4755_v58, %v4748_v56  ;;  %v2539_v47 = vpack.c.bf16 %v1696_v22, %v1696_v22  ;;  %2233 = vmatpush.bf16.xpose.msra.mxu1 %v2221_v1 }
 0x286   :  { %v1590_v31 = vsel %vm219_vm1, %v5931_v57, %v4975_v38  ;;  %v2542_v40 = vpack.c.bf16 %v1694_v29, %v1694_v29  ;;  %2187 = vmatpush.bf16.xpose.msra.mxu0 %v2175_v24  ;;  %v2573_v28 = vpack.c.b16 %v2571_v46, %v2571_v46  ;;  %v1697_v38 = vrot.slane %v1694_v29, 4 }
 0x287   :  { %3664 = vmatmul.msk.bf16.vlgmr.msra.gmra.mxu3 %vm1891_vm2, %v5932_v63  ;;  %3662 = vmatmul.msk.bf16.vlgmr.msra.gmra.mxu2 %vm1891_vm2, %v5933_v33  ;;  %v1588_v44 = vperm.slane %v1584_v16, %v4079_v3  ;;  %v1594_v8 = vperm.slane %v1590_v31, %v4079_v3  ;;  %v2618_v12 = vunpack.c.l.b16 %v2539_v47  ;;  %v1595_v61 = vrot.slane %v5003_v52, 4 }
 0x288   :  { %v2662_v53 = vunpack.c.l.b16 %v2542_v40  ;;  %v1631_v56 = vperm.slane %v5025_v32, %v4079_v3  ;;  %v2585_v58 = vand.u32 %v5123_v34, %v2573_v28  ;;  %v1698_v15 = vsel %vm219_vm1, 0.0, %v1697_v38 }
 0x289   :  { %v1607_v36 = vrot.slane %v1594_v8, 4  ;;  %v1637_v59 = vperm.slane %v5099_v4, %v4079_v3  ;;  %v2620_v55 = vpack.c.b16 %v2618_v12, %v2618_v12  ;;  %v2545_v42 = vpack.c.bf16 %v1698_v15, %v1698_v15 }
 0x28a   :  { %v2664_v25 = vpack.c.b16 %v2662_v53, %v2662_v53  ;;  %v1596_v17 = vsel %vm219_vm1, %v1595_v61, %v4979_v6  ;;  %2593 = vmatpush.bf16.msrb.mxu2 %v2585_v58  ;;  %v1638_v37 = vsel %vm219_vm1, %v5008_v14, %v5000_v30  ;;  %v5934_v4 = vrot.slane %v5029_v45, 4 }
 0x28b   :  { %v5151_v20 = vpop.f32.mrf.mxu3  ;;  %v1602_v7 = vperm.slane %v1596_v17, %v4117_v35  ;;  %v1608_v32 = vsel %vm219_vm1, %v1607_v36, %v1588_v44  ;;  %v2629_v62 = vand.u32 %v2620_v55, %v5123_v34  ;;  %v2706_v22 = vunpack.c.l.b16 %v2545_v42 }
 0x28c   :  { %v1644_v49 = vsel %vm219_vm1, %v5934_v4, %v5046_v26  ;;  %v2673_v29 = vand.u32 %v2664_v25, %v5123_v34  ;;  %v1614_v46 = vperm.slane %v1608_v32, %v4117_v35  ;;  %v1642_v57 = vperm.slane %v1638_v37, %v4079_v3 }
 0x28d   :  { %v5164_v39 = vpop.f32.mrf.mxu1  ;;  %v1621_v16 = vrot.slane %v1602_v7, 4  ;;  %v1648_v31 = vperm.slane %v1644_v49, %v4079_v3  ;;  %v1649_v1 = vrot.slane %v1637_v59, 4  ;;  %v5935_v30 = vpack.c.b16 %v4763_v21, %v4761_v0  ;;  %2637 = vmatpush.bf16.msrb.mxu3 %v2629_v62 }
 0x28e   :  { %v2708_v14 = vpack.c.b16 %v2706_v22, %v2706_v22  ;;  %v1597_v45 = vrot.slane %v4979_v6, 4  ;;  %v1609_v26 = vrot.slane %v1588_v44, 4  ;;  %v1651_v24 = vrot.slane %v1631_v56, 4  ;;  %2681 = vmatpush.bf16.msrb.mxu0 %v2673_v29 }
 0x28f   :  { %3668 = vmatmul.msk.bf16.vlgmr.msra.gmra.mxu1 %vm1891_vm2, %v5935_v30  ;;  %v1622_v33 = vsel %vm219_vm1, %v1614_v46, %v1621_v16  ;;  %v1650_v47 = vsel %vm219_vm1, %v1649_v1, %v1631_v56  ;;  %v1661_v40 = vrot.slane %v1648_v31, 4  ;;  %v1663_v28 = vrot.slane %v1642_v57, 4 }
 0x290   :  { %v5189_v38 = vperm.slane %v4984_v27, %v4079_v3  ;;  %v5936_v0 = vpack.c.b16 %v4770_v19, %v4768_v50  ;;  %v2717_v21 = vand.u32 %v2708_v14, %v5123_v34  ;;  %v1656_v6 = vperm.slane %v1650_v47, %v4117_v35 }
 0x291   :  { %v1598_v44 = vsel %vm219_vm1, %v5003_v52, %v1597_v45  ;;  %v1662_v12 = vsel %vm219_vm1, %v1661_v40, %v1642_v57  ;;  %v1610_v61 = vsel %vm219_vm1, %v1594_v8, %v1609_v26  ;;  %v1652_v27 = vsel %vm219_vm1, %v1637_v59, %v1651_v24 }
 0x292   :  { %3666 = vmatmul.msk.bf16.vlgmr.msra.gmra.mxu0 %vm1891_vm2, %v5936_v0  ;;  %v1606_v53 = vperm.slane %v1598_v44, %v4117_v35  ;;  %2725 = vmatpush.bf16.msrb.mxu1 %v2717_v21  ;;  %v1668_v50 = vperm.slane %v1662_v12, %v4117_v35  ;;  %v1675_v19 = vrot.slane %v1656_v6, 4  ;;  %v2537_v56 = vpack.c.bf16 %v1622_v33, %v1622_v33 }
 0x293   :  { %v1966_v63 = vpop.f32.mrf.mxu3  ;;  %v1618_v58 = vperm.slane %v1610_v61, %v4117_v35  ;;  %v1660_v36 = vperm.slane %v1652_v27, %v4117_v35  ;;  %v1664_v52 = vsel %vm219_vm1, %v1648_v31, %v1663_v28  ;;  %v2273_v55 = vsel %vm2244_vm3, %v5127_v10, -inf }
 0x294   :  { %v2258_v8 = vsel %vm2244_vm3, %v5108_v54, -inf  ;;  %v1676_v59 = vsel %vm219_vm1, %v1668_v50, %v1675_v19  ;;  %v1672_v42 = vperm.slane %v1664_v52, %v4117_v35  ;;  %2274 = vmax.xlane.f32.xlu1 %v2273_v55  ;;  %v1619_v17 = vrot.slane %v1614_v46, 4 }
 0x295   :  { %v5205_v15 = vpop.f32.mrf.mxu1  ;;  %v1623_v25 = vrot.slane %v1618_v58, 4  ;;  %2259 = vmax.xlane.f32.xlu2 %v2258_v8  ;;  %v2538_v32 = vpack.c.bf16 %v1676_v59, %v1676_v59  ;;  %v1673_v37 = vrot.slane %v1668_v50, 4  ;;  %v1625_v4 = vrot.slane %v1606_v53, 4 }
 0x296   :  { %v1679_v49 = vrot.slane %v1660_v36, 4  ;;  %v2616_v62 = vunpack.c.l.b16 %v2537_v56  ;;  %v1677_v22 = vrot.slane %v1672_v42, 4  ;;  %v1620_v16 = vsel %vm219_vm1, %v1619_v17, %v1602_v7 }
 0x297   :  { %v1624_v29 = vsel %vm219_vm1, %v1623_v25, %v1606_v53  ;;  %v5937_v57 = vpack.c.b16 %v4820_v48, %v4820_v48  ;;  %v5938_v31 = vpack.c.b16 %v4817_v18, %v4817_v18  ;;  %v2617_v1 = vunpack.c.l.b16 %v2538_v32 }
 0x298   :  { %v2540_v30 = vpack.c.bf16 %v1624_v29, %v1624_v29  ;;  %v1674_v14 = vsel %vm219_vm1, %v1673_v37, %v1656_v6  ;;  %v2534_v45 = vpack.c.bf16 %v1620_v16, %v1620_v16  ;;  %v1678_v26 = vsel %vm219_vm1, %v1677_v22, %v1660_v36  ;;  %v5280_v16 = vpop.permute.xlu1 %3830 }
 0x299   :  { %3665 = vmatmul.msk.bf16.gmra.mxu3 %vm1891_vm2, %v5937_v57  ;;  %3663 = vmatmul.msk.bf16.gmra.mxu2 %vm1891_vm2, %v5938_v31  ;;  %v2535_v7 = vpack.c.bf16 %v1674_v14, %v1674_v14  ;;  %v1626_v24 = vsel %vm219_vm1, %v1618_v58, %v1625_v4  ;;  %v1680_v48 = vsel %vm219_vm1, %v1672_v42, %v1679_v49  ;;  %v5940_v61 = vrot.slane %v5006_v43, 4 }
 0x29a   :  { %v1704_v63 = vperm.slane %v5120_v2, %v4079_v3  ;;  %v2619_v18 = vpack.c.b16 %v2617_v1, %v2616_v62  ;;  %v2541_v33 = vpack.c.bf16 %v1678_v26, %v1678_v26  ;;  %v5939_v47 = vpack.c.bf16 %v4796_v5, %v4796_v5 }
 0x29b   :  { %v5225_v46 = vpop.f32.mrf.mxu3  ;;  %v2569_v28 = vunpack.c.l.b16 %v2534_v45  ;;  %v2570_v0 = vunpack.c.l.b16 %v2535_v7  ;;  %v2543_v21 = vpack.c.bf16 %v1626_v24, %v1626_v24  ;;  %v2544_v6 = vpack.c.bf16 %v1680_v48, %v1680_v48 }
 0x29c   :  { %v2157_v40 = vunpack.c.l.b16 %v5939_v47  ;;  %2638 = vmatpush.bf16.msrb.mxu3 %v2619_v18  ;;  %v2660_v12 = vunpack.c.l.b16 %v2540_v30  ;;  %v2661_v53 = vunpack.c.l.b16 %v2541_v33  ;;  %v5240_v27 = vsel %vm219_vm1, %v5940_v61, %v5018_v9 }
 0x29d   :  { %v2058_v44 = vpop.f32.mrf.mxu1  ;;  %v1721_v2 = vrot.slane %v5189_v38, 4  ;;  %v2572_v50 = vpack.c.b16 %v2570_v0, %v2569_v28  ;;  %v2704_v19 = vunpack.c.l.b16 %v2543_v21  ;;  %v2705_v5 = vunpack.c.l.b16 %v2544_v6 }
 0x29e   :  { %v2205_v56 = vpack.c.b16 %v4839_v13, %v4839_v13  ;;  %v2663_v58 = vpack.c.b16 %v2661_v53, %v2660_v12  ;;  %v1723_v52 = vrot.slane %v1704_v63, 4  ;;  %v2159_v43 = vpack.c.b16 %v2157_v40, %v2157_v40 }
 0x29f   :  { %v5246_v36 = vsel %vm219_vm1, %v1721_v2, %v1704_v63  ;;  %2594 = vmatpush.bf16.msrb.mxu2 %v2572_v50  ;;  %v2707_v55 = vpack.c.b16 %v2705_v5, %v2704_v19  ;;  %v2264_v62 = vsel %vm2244_vm3, %v5225_v46, -inf  ;;  %v2276_v31 = vsel %vm2244_vm3, %v5164_v39, -inf }
 0x2a0   :  { %3669 = vmatmul.msk.bf16.gmra.mxu1 %vm1891_vm2, %v2205_v56  ;;  %2682 = vmatpush.bf16.msrb.mxu0 %v2663_v58  ;;  %v5253_v8 = vsel %vm219_vm1, %v5189_v38, %v1723_v52  ;;  %v2261_v18 = vsel %vm2251_vm5, %v5151_v20, -inf  ;;  %v5319_v58 = vpop.permute.xlu0 %3825 }
 0x2a1   :  { %2726 = vmatpush.bf16.msrb.mxu1 %v2707_v55 }
 0x2a2   :  { %3667 = vmatmul.msk.bf16.gmra.mxu0 %vm1891_vm2, %v2159_v43 }
 0x2a3   :  { %v5249_v9 = vpop.f32.mrf.mxu3 }
 0x2a4   :  { %v2267_v43 = vsel %vm2244_vm3, %v5249_v9, -inf }
 0x2ab   :  { %v5256_v13 = vpop.f32.mrf.mxu3 }
 0x2ac   :  { %v2270_v19 = vsel %vm2251_vm5, %v5256_v13, -inf }
 0x2b3   :  { %v2012_v59 = vpop.f32.mrf.mxu3 }
 0x2f0   :  { %v2257_v63 = vpop.xlane.xlu1 %2256 }
 0x2f1   :  { %v2321_v33 = vsub.f32 %v5076_v11, %v2257_v63 }
 0x2f3   :  { %v2348_v21 = vmul.f32 1.442695, %v2321_v33 }
 0x2f5   :  { %v2250_v57 = vpop.xlane.xlu2 %2249 }
 0x2f6   :  { %v2319_v30 = vsub.f32 %v5112_v23, %v2250_v57  ;;  %v2279_v23 = vsel %vm2251_vm5, %v5205_v15, -inf }
 0x2f8   :  { %v2344_v24 = vmul.f32 1.442695, %v2319_v30 }
 0x2fa   :  { %3876 = vpow2.f32 %v2344_v24 }
 0x2fb   :  { %3878 = vpow2.f32 %v2348_v21 }
 0x300   :  { %v5308_v53 = vpop.eup %3876 }
 0x301   :  { %v2393_v61 = vsel %vm2244_vm3, %v5308_v53, 0.0  ;;  %v5317_v5 = vpop.eup %3878 }
 0x302   :  { %v2399_v55 = vsel %vm2244_vm3, %v5317_v5, 0.0 }
 0x307   :  { %v2275_v11 = vpop.xlane.xlu1 %2274 }
 0x308   :  { %v2327_v2 = vsub.f32 %v5127_v10, %v2275_v11  ;;  %v2260_v52 = vpop.xlane.xlu2 %2259 }
 0x309   :  { %v2322_v10 = vsub.f32 %v5108_v54, %v2260_v52 }
 0x30a   :  { %v5258_v25 = vpop.f32.mrf.mxu3  ;;  %v5260_v42 = vpop.f32.mrf.mxu2  ;;  %v2360_v56 = vmul.f32 1.442695, %v2327_v2 }
 0x30b   :  { %v2282_v17 = vsel %vm2244_vm3, %v5260_v42, -inf  ;;  %v2291_v28 = vsel %vm2244_vm3, %v5258_v25, -inf }
 0x30c   :  { %v5264_v32 = vpop.f32.mrf.mxu1  ;;  %2283 = vmax.xlane.f32.xlu0 %v2282_v17  ;;  %3880 = vpow2.f32 %v2360_v56  ;;  %v2350_v17 = vmul.f32 1.442695, %v2322_v10 }
 0x30d   :  { %v2309_v50 = vsel %vm2244_vm3, %v5264_v32, -inf }
 0x30e   :  { %3882 = vpow2.f32 %v2350_v17 }
 0x30f   :  { %v5266_v37 = vpop.f32.mrf.mxu0 }
 0x310   :  { %v2300_v38 = vsel %vm2244_vm3, %v5266_v37, -inf }
 0x311   :  { %2301 = vmax.xlane.f32.xlu2 %v2300_v38  ;;  %v2247_v38 = vpop.xlane.xlu0 %2246 }
 0x312   :  { %v5270_v4 = vpop.f32.mrf.mxu3  ;;  %v5272_v49 = vpop.f32.mrf.mxu2  ;;  %v2318_v57 = vsub.f32 %v5056_v51, %v2247_v38 }
 0x313   :  { %v2285_v44 = vsel %vm2244_vm3, %v5272_v49, -inf }
 0x314   :  { %v5276_v29 = vpop.f32.mrf.mxu1  ;;  %2265 = vmax.xlane.f32.xlu0 %v2264_v62  ;;  %v5328_v62 = vpop.eup %3880 }
 0x315   :  { %v2312_v26 = vsel %vm2244_vm3, %v5276_v29, -inf  ;;  %v2417_v54 = vsel %vm2244_vm3, %v5328_v62, 0.0  ;;  %v5335_v30 = vpop.eup %3882 }
 0x316   :  { %v2402_v24 = vsel %vm2244_vm3, %v5335_v30, 0.0 }
 0x317   :  { %v5278_v22 = vpop.f32.mrf.mxu0 }
 0x318   :  { %v2303_v1 = vsel %vm2244_vm3, %v5278_v22, -inf }
 0x319   :  { %2277 = vmax.xlane.f32.xlu2 %v2276_v31  ;;  %2304 = vmax.xlane.f32.xlu1 %v2303_v1  ;;  %v2294_v31 = vsel %vm2244_vm3, %v5270_v4, -inf  ;;  %v2342_v1 = vmul.f32 1.442695, %v2318_v57 }
 0x31b   :  { %3884 = vpow2.f32 %v2342_v1 }
 0x31c   :  { %v5287_v14 = vpop.f32.mrf.mxu3  ;;  %v5289_v45 = vpop.f32.mrf.mxu2  ;;  %2313 = vmax.xlane.f32.xlu0 %v2312_v26 }
 0x31d   :  { %v5293_v7 = vpop.f32.mrf.mxu1  ;;  %v2288_v12 = vsel %vm2251_vm5, %v5289_v45, -inf  ;;  %v2297_v26 = vsel %vm2251_vm5, %v5287_v14, -inf }
 0x31e   :  { %v2315_v59 = vsel %vm2251_vm5, %v5293_v7, -inf }
 0x31f   :  { %v5295_v48 = vpop.f32.mrf.mxu0 }
 0x321   :  { %2262 = vmax.xlane.f32.xlu2 %v2261_v18  ;;  %2280 = vmax.xlane.f32.xlu1 %v2279_v23  ;;  %v5341_v51 = vpop.eup %3884  ;;  %v5345_v18 = vpop.xlane.xlu0 %2253 }
 0x322   :  { %v2390_v63 = vsel %vm2244_vm3, %v5341_v51, 0.0 }
 0x324   :  { %v2150_v47 = vpop.f32.mrf.mxu3  ;;  %v2104_v40 = vpop.f32.mrf.mxu2  ;;  %2292 = vmax.xlane.f32.xlu0 %v2291_v28 }
 0x325   :  { %v2242_v0 = vpop.f32.mrf.mxu1 }
 0x327   :  { %v2196_v6 = vpop.f32.mrf.mxu0 }
 0x329   :  { %2286 = vmax.xlane.f32.xlu1 %v2285_v44  ;;  %2289 = vmax.xlane.f32.xlu2 %v2288_v12 }
 0x32c   :  { %2394 = vadd.xlane.f32.xlu0 %v2393_v61 }
 0x331   :  { %2310 = vmax.xlane.f32.xlu1 %v2309_v50  ;;  %2271 = vmax.xlane.f32.xlu2 %v2270_v19 }
 0x334   :  { %2400 = vadd.xlane.f32.xlu0 %v2399_v55 }
 0x339   :  { %2268 = vmax.xlane.f32.xlu1 %v2267_v43  ;;  %2316 = vmax.xlane.f32.xlu2 %v2315_v59 }
 0x341   :  { %2295 = vmax.xlane.f32.xlu1 %v2294_v31  ;;  %2418 = vadd.xlane.f32.xlu2 %v2417_v54 }
 0x349   :  { %2298 = vmax.xlane.f32.xlu1 %v2297_v26  ;;  %2403 = vadd.xlane.f32.xlu2 %v2402_v24 }
 0x351   :  { %2391 = vadd.xlane.f32.xlu1 %v2390_v63 }
 0x37f   :  { %v5347_v23 = vpop.xlane.xlu0 %2283 }
 0x384   :  { %v5349_v33 = vpop.xlane.xlu2 %2301 }
 0x387   :  { %v2266_v47 = vpop.xlane.xlu0 %2265 }
 0x388   :  { %v2324_v40 = vsub.f32 %v5225_v46, %v2266_v47 }
 0x38a   :  { %v2354_v28 = vmul.f32 1.442695, %v2324_v40 }
 0x38c   :  { %v2278_v0 = vpop.xlane.xlu2 %2277  ;;  %v5352_v21 = vpop.xlane.xlu1 %2304  ;;  %3886 = vpow2.f32 %v2354_v28 }
 0x38d   :  { %v2328_v6 = vsub.f32 %v5164_v39, %v2278_v0 }
 0x38f   :  { %v2362_v44 = vmul.f32 1.442695, %v2328_v6  ;;  %v5360_v19 = vpop.xlane.xlu0 %2313 }
 0x391   :  { %3888 = vpow2.f32 %v2362_v44  ;;  %v5941_v44 = vld [vmem:[#allocation3_spill] sm:$0xff] }
 0x392   :  { %v5355_v12 = vpop.eup %3886 }
 0x393   :  { %v2408_v2 = vsel %vm2244_vm3, %v5355_v12, 0.0 }
 0x394   :  { %v2263_v11 = vpop.xlane.xlu2 %2262  ;;  %v2281_v61 = vpop.xlane.xlu1 %2280  ;;  %2409 = vadd.xlane.f32.xlu0 %v2408_v2 }
 0x395   :  { %v2323_v50 = vsub.f32 %v5151_v20, %v2263_v11  ;;  %v2329_v39 = vsub.f32 %v5205_v15, %v2281_v61 }
 0x397   :  { %v5362_v46 = vpop.eup %3888  ;;  %v2352_v56 = vmul.f32 1.442695, %v2323_v50  ;;  %v2364_v55 = vmul.f32 1.442695, %v2329_v39  ;;  %v2293_v17 = vpop.xlane.xlu0 %2292 }
 0x398   :  { %v2420_v52 = vsel %vm2244_vm3, %v5362_v46, 0.0  ;;  %v2333_v0 = vsub.f32 %v5258_v25, %v2293_v17  ;;  %v2336_v25 = vsub.f32 %v5266_v37, %v5349_v33 }
 0x399   :  { %3890 = vpow2.f32 %v2352_v56  ;;  %2421 = vadd.xlane.f32.xlu1 %v2420_v52 }
 0x39a   :  { %3892 = vpow2.f32 %v2364_v55  ;;  %v2372_v61 = vmul.f32 1.442695, %v2333_v0  ;;  %v2378_v55 = vmul.f32 1.442695, %v2336_v25  ;;  %v5942_v25 = vld [vmem:[#allocation7_spill] sm:$0xff] }
 0x39c   :  { %v2287_v10 = vpop.xlane.xlu1 %2286  ;;  %v2290_v43 = vpop.xlane.xlu2 %2289 }
 0x39d   :  { %v2331_v20 = vsub.f32 %v5272_v49, %v2287_v10  ;;  %v2332_v37 = vsub.f32 %v5289_v45, %v2290_v43 }
 0x39f   :  { %v5367_v59 = vpop.eup %3890  ;;  %v2368_v57 = vmul.f32 1.442695, %v2331_v20  ;;  %v2395_v24 = vpop.xlane.xlu0 %2394 }
 0x3a0   :  { %v2405_v38 = vsel %vm2251_vm5, %v5367_v59, 0.0  ;;  %v5374_v54 = vpop.eup %3892 }
 0x3a1   :  { %2406 = vadd.xlane.f32.xlu0 %v2405_v38  ;;  %3894 = vpow2.f32 %v2368_v57  ;;  %v2423_v26 = vsel %vm2251_vm5, %v5374_v54, 0.0 }
 0x3a4   :  { %v5372_v15 = vpop.xlane.xlu1 %2310  ;;  %v2272_v31 = vpop.xlane.xlu2 %2271 }
 0x3a5   :  { %v2326_v1 = vsub.f32 %v5256_v13, %v2272_v31  ;;  %v3839_v13 = vpack.i.bf16 %v4443_v41, %v5941_v44 }
 0x3a7   :  { %v2358_v49 = vmul.f32 1.442695, %v2326_v1  ;;  %v5381_v40 = vpop.eup %3894  ;;  %v2401_v2 = vpop.xlane.xlu0 %2400  ;;  %v2370_v1 = vmul.f32 1.442695, %v2332_v37 }
 0x3a8   :  { %v2429_v11 = vsel %vm2244_vm3, %v5381_v40, 0.0 }
 0x3a9   :  { %2424 = vadd.xlane.f32.xlu0 %v2423_v26  ;;  %3896 = vpow2.f32 %v2358_v49 }
 0x3ac   :  { %v2269_v63 = vpop.xlane.xlu1 %2268  ;;  %v5379_v47 = vpop.xlane.xlu2 %2316 }
 0x3ad   :  { %v2325_v28 = vsub.f32 %v5249_v9, %v2269_v63 }
 0x3af   :  { %v2356_v6 = vmul.f32 1.442695, %v2325_v28  ;;  %v5392_v9 = vpop.eup %3896 }
 0x3b0   :  { %v2414_v52 = vsel %vm2251_vm5, %v5392_v9, 0.0 }
 0x3b1   :  { %3898 = vpow2.f32 %v2356_v6  ;;  %2430 = vadd.xlane.f32.xlu0 %v2429_v11 }
 0x3b2   :  { %3840 = vrot.lane.b32.xlu1 %v3839_v13, %s3978_s12  ;;  %3900 = vpow2.f32 %v2372_v61 }
 0x3b3   :  { %3902 = vrcp.f32 %v2401_v2 }
 0x3b4   :  { %v2296_v50 = vpop.xlane.xlu1 %2295  ;;  %v5390_v56 = vpop.xlane.xlu2 %2418 }
 0x3b7   :  { %v5396_v39 = vpop.eup %3898 }
 0x3b8   :  { %v2411_v41 = vsel %vm2244_vm3, %v5396_v39, 0.0  ;;  %v5402_v10 = vpop.eup %3900 }
 0x3b9   :  { %2412 = vadd.xlane.f32.xlu2 %v2411_v41  ;;  %2415 = vadd.xlane.f32.xlu0 %v2414_v52  ;;  %v3903_v38 = vpop.eup %3902  ;;  %v2435_v57 = vsel %vm2244_vm3, %v5402_v10, 0.0  ;;  %v5943_v41 = vld [vmem:[#allocation2_spill] sm:$0xff] }
 0x3ba   :  { %v2489_v33 = vmul.f32 %v3903_v38, %v5317_v5  ;;  %v3834_v52 = vpack.i.bf16 %v5943_v41, %v5942_v25  ;;  %v2339_v38 = vsub.f32 %v5264_v32, %v5372_v15 }
 0x3bc   :  { %v5404_v20 = vpop.xlane.xlu1 %2298  ;;  %v2404_v17 = vpop.xlane.xlu2 %2403  ;;  %v2513_v49 = vpack.c.bf16 %v2489_v33, %v2489_v33  ;;  %v2384_v37 = vmul.f32 1.442695, %v2339_v38  ;;  %v2334_v33 = vsub.f32 %v5270_v4, %v2296_v50  ;;  %v2320_v4 = vsub.f32 %v5058_v60, %v5345_v18 }
 0x3bd   :  { %3904 = vrcp.f32 %v2404_v17  ;;  %v2341_v50 = vsub.f32 %v5293_v7, %v5379_v47  ;;  %v2340_v47 = vsub.f32 %v5276_v29, %v5360_v19 }
 0x3be   :  { %3906 = vpow2.f32 %v2378_v55  ;;  %v2608_v43 = vunpack.c.l.b16 %v2513_v49  ;;  %v2337_v49 = vsub.f32 %v5278_v22, %v5352_v21 }
 0x3bf   :  { %3908 = vrcp.f32 %v2395_v24  ;;  %v2388_v22 = vmul.f32 1.442695, %v2341_v50 }
 0x3c0   :  { %v2380_v15 = vmul.f32 1.442695, %v2337_v49 }
 0x3c1   :  { %2436 = vadd.xlane.f32.xlu0 %v2435_v57  ;;  %v2306_v57 = vsel %vm2251_vm5, %v5295_v48, -inf }
 0x3c3   :  { %v3905_v31 = vpop.eup %3904 }
 0x3c4   :  { %v5410_v26 = vpop.eup %3906  ;;  %v2490_v63 = vmul.f32 %v3905_v31, %v5335_v30  ;;  %v2392_v28 = vpop.xlane.xlu1 %2391  ;;  %v2374_v31 = vmul.f32 1.442695, %v2334_v33 }
 0x3c5   :  { %v3909_v0 = vpop.eup %3908  ;;  %3910 = vrcp.f32 %v2392_v28  ;;  %v2444_v24 = vsel %vm2244_vm3, %v5410_v26, 0.0 }
 0x3c6   :  { %v2514_v6 = vpack.c.bf16 %v2490_v63, %v2490_v63  ;;  %3912 = vpow2.f32 %v2370_v1  ;;  %v2487_v45 = vmul.f32 %v3909_v0, %v5308_v53  ;;  %v2346_v0 = vmul.f32 1.442695, %v2320_v4 }
 0x3c7   :  { %3914 = vpow2.f32 %v2384_v37 }
 0x3c8   :  { %v2609_v5 = vunpack.c.l.b16 %v2514_v6  ;;  %v2511_v11 = vpack.c.bf16 %v2487_v45, %v2487_v45  ;;  %3916 = vpow2.f32 %v2374_v31  ;;  %v2330_v6 = vsub.f32 %v5260_v42, %v5347_v23 }
 0x3c9   :  { %2445 = vadd.xlane.f32.xlu0 %v2444_v24  ;;  %3918 = vpow2.f32 %v2380_v15  ;;  %v2386_v23 = vmul.f32 1.442695, %v2340_v47  ;;  %v2335_v24 = vsub.f32 %v5287_v14, %v5404_v20  ;;  %v3833_v15 = vunpack.i.h.bf16 %v5280_v16 }
 0x3ca   :  { %v2611_v44 = vpack.c.b16 %v2609_v5, %v2608_v43  ;;  %v2562_v53 = vunpack.c.l.b16 %v2511_v11  ;;  %3920 = vpow2.f32 %v2346_v0  ;;  %v2366_v18 = vmul.f32 1.442695, %v2330_v6 }
 0x3cb   :  { %v3911_v13 = vpop.eup %3910  ;;  %3922 = vpow2.f32 %v2388_v22  ;;  %v2376_v29 = vmul.f32 1.442695, %v2335_v24 }
 0x3cc   :  { %v2486_v61 = vmul.f32 %v3911_v13, %v5341_v51  ;;  %3672 = vmatmul.msk.bf16.vlgmr.msrb.gmra.mxu3 %vm2244_vm3, %v2611_v44  ;;  %v5418_v30 = vpop.eup %3912  ;;  %3924 = vpow2.f32 %v2366_v18 }
 0x3cd   :  { %v2432_v17 = vsel %vm2251_vm5, %v5418_v30, 0.0  ;;  %v5431_v1 = vpop.eup %3914  ;;  %3926 = vpow2.f32 %v2386_v23 }
 0x3ce   :  { %v2510_v2 = vpack.c.bf16 %v2486_v61, %v2486_v61  ;;  %v2453_v32 = vsel %vm2244_vm3, %v5431_v1, 0.0  ;;  %v5437_v63 = vpop.eup %3916  ;;  %3928 = vrcp.f32 %v5390_v56 }
 0x3cf   :  { %v2438_v28 = vsel %vm2244_vm3, %v5437_v63, 0.0  ;;  %v5445_v21 = vpop.eup %3918  ;;  %3930 = vpow2.f32 %v2376_v29 }
 0x3d0   :  { %v2561_v55 = vunpack.c.l.b16 %v2510_v2  ;;  %v2447_v60 = vsel %vm2244_vm3, %v5445_v21, 0.0  ;;  %v5451_v45 = vpop.eup %3920 }
 0x3d1   :  { %3835 = vrot.lane.b32.xlu2 %v3834_v52, %s3978_s12  ;;  %2433 = vadd.xlane.f32.xlu0 %v2432_v17  ;;  %v5453_v7 = vpop.eup %3922  ;;  %v2396_v43 = vsel %vm2251_vm5, %v5451_v45, 0.0 }
 0x3d2   :  { %v2564_v51 = vpack.c.b16 %v2562_v53, %v2561_v55  ;;  %v2459_v42 = vsel %vm2251_vm5, %v5453_v7, 0.0  ;;  %v5461_v5 = vpop.eup %3924 }
 0x3d3   :  { %v2426_v44 = vsel %vm2244_vm3, %v5461_v5, 0.0  ;;  %v5467_v19 = vpop.eup %3926 }
 0x3d4   :  { %3670 = vmatmul.msk.bf16.vlgmr.msrb.gmra.mxu2 %vm2244_vm3, %v2564_v51  ;;  %v2456_v13 = vsel %vm2244_vm3, %v5467_v19, 0.0  ;;  %v3929_v2 = vpop.eup %3928  ;;  %v3827_v51 = vunpack.i.l.bf16 %v5319_v58 }
 0x3d5   :  { %v5472_v25 = vpop.eup %3930  ;;  %v2495_v14 = vmul.f32 %v3929_v2, %v5328_v62  ;;  %v3832_v2 = vunpack.i.l.bf16 %v5280_v16 }
 0x3d6   :  { %v2441_v20 = vsel %vm2251_vm5, %v5472_v25, 0.0  ;;  %v1561_v31 = vrot.slane %v3827_v51, 4 }
 0x3d7   :  { %v2519_v52 = vpack.c.bf16 %v2495_v14, %v2495_v14 }
 0x3d9   :  { %v2696_v17 = vunpack.c.l.b16 %v2519_v52 }
 0x3dc   :  { %2307 = vmax.xlane.f32.xlu1 %v2306_v57 }
 0x3e4   :  { %2454 = vadd.xlane.f32.xlu1 %v2453_v32  ;;  %v3828_v32 = vunpack.i.h.bf16 %v5319_v58 }
 0x3e6   :  { %v1562_v4 = vsel %vm219_vm1, %v1561_v31, %v3828_v32 }
 0x3e7   :  { %v1566_v0 = vperm.slane %v1562_v4, %v4079_v3 }
 0x3e9   :  { %v1567_v47 = vrot.slane %v1566_v0, 4 }
 0x3ec   :  { %2439 = vadd.xlane.f32.xlu1 %v2438_v28 }
 0x3f4   :  { %2448 = vadd.xlane.f32.xlu1 %v2447_v60 }
 0x3fa   :  { %2397 = vadd.xlane.f32.xlu2 %v2396_v43 }
 0x3fc   :  { %2460 = vadd.xlane.f32.xlu1 %v2459_v42 }
 0x402   :  { %2427 = vadd.xlane.f32.xlu2 %v2426_v44 }
 0x407   :  { %v2410_v11 = vpop.xlane.xlu0 %2409 }
 0x40a   :  { %2457 = vadd.xlane.f32.xlu2 %v2456_v13 }
 0x40c   :  { %v2422_v61 = vpop.xlane.xlu1 %2421 }
 0x40d   :  { %3932 = vrcp.f32 %v2422_v61 }
 0x412   :  { %2442 = vadd.xlane.f32.xlu2 %v2441_v20 }
 0x413   :  { %v3933_v41 = vpop.eup %3932 }
 0x414   :  { %v2496_v56 = vmul.f32 %v3933_v41, %v5362_v46  ;;  %v2407_v53 = vpop.xlane.xlu0 %2406 }
 0x415   :  { %3934 = vrcp.f32 %v2407_v53 }
 0x416   :  { %v2520_v55 = vpack.c.bf16 %v2496_v56, %v2496_v56 }
 0x418   :  { %v2697_v38 = vunpack.c.l.b16 %v2520_v55 }
 0x41a   :  { %v2699_v37 = vpack.c.b16 %v2697_v38, %v2696_v17  ;;  %v1499_v38 = vrot.slane %v3832_v2, 4 }
 0x41b   :  { %v3935_v33 = vpop.eup %3934 }
 0x41c   :  { %3676 = vmatmul.msk.bf16.vlgmr.msrb.gmra.mxu1 %vm2244_vm3, %v2699_v37  ;;  %v2425_v62 = vpop.xlane.xlu0 %2424  ;;  %v2491_v57 = vmul.f32 %v3935_v33, %v5367_v59  ;;  %v1555_v59 = vrot.slane %v3833_v15, 4 }
 0x41d   :  { %3936 = vrcp.f32 %v2425_v62 }
 0x41e   :  { %v2515_v49 = vpack.c.bf16 %v2491_v57, %v2491_v57  ;;  %3938 = vrcp.f32 %v2410_v11 }
 0x420   :  { %v2610_v46 = vunpack.c.l.b16 %v2515_v49 }
 0x422   :  { %v2612_v50 = vpack.c.b16 %v2610_v46, %v2610_v46 }
 0x423   :  { %v3937_v28 = vpop.eup %3936 }
 0x424   :  { %v3841_v22 = vpop.permute.xlu1 %3840  ;;  %3673 = vmatmul.msk.bf16.gmra.mxu3 %vm2244_vm3, %v2612_v50  ;;  %v2497_v6 = vmul.f32 %v3937_v28, %v5374_v54  ;;  %v5489_v42 = vpop.xlane.xlu0 %2430 }
 0x425   :  { %v3842_v60 = vunpack.i.l.bf16 %v3841_v22  ;;  %v3939_v29 = vpop.eup %3938  ;;  %v3843_v14 = vunpack.i.h.bf16 %v3841_v22 }
 0x426   :  { %v2521_v18 = vpack.c.bf16 %v2497_v6, %v2497_v6  ;;  %v2492_v11 = vmul.f32 %v3939_v29, %v5355_v12 }
 0x427   :  { %v1556_v58 = vsel %vm219_vm1, %v1555_v59, %v3842_v60  ;;  %v1511_v51 = vrot.slane %v3843_v14, 4 }
 0x428   :  { %v1560_v43 = vperm.slane %v1556_v58, %v4079_v3  ;;  %v2698_v23 = vunpack.c.l.b16 %v2521_v18  ;;  %v2516_v52 = vpack.c.bf16 %v2492_v11, %v2492_v11 }
 0x42a   :  { %v1568_v24 = vsel %vm219_vm1, %v1567_v47, %v1560_v43  ;;  %v2700_v44 = vpack.c.b16 %v2698_v23, %v2698_v23  ;;  %v2652_v32 = vunpack.c.l.b16 %v2516_v52 }
 0x42b   :  { %v1572_v13 = vperm.slane %v1568_v24, %v4117_v35 }
 0x42c   :  { %v2413_v61 = vpop.xlane.xlu2 %2412  ;;  %3677 = vmatmul.msk.bf16.gmra.mxu1 %vm2244_vm3, %v2700_v44  ;;  %v2416_v56 = vpop.xlane.xlu0 %2415 }
 0x42d   :  { %v5494_v54 = vrot.slane %v1572_v13, 4  ;;  %3940 = vrcp.f32 %v2413_v61 }
 0x42e   :  { %3942 = vrcp.f32 %v2416_v56  ;;  %v1715_v56 = vperm.slane %v5240_v27, %v4079_v3 }
 0x42f   :  { %v1808_v20 = vsel %vm219_vm1, 0.0, %v5494_v54 }
 0x430   :  { %v1812_v41 = vperm.slane %v1808_v20, %v4079_v3 }
 0x432   :  { %v1818_v53 = vperm.slane %v1812_v41, %v4117_v35  ;;  %v1813_v55 = vrot.slane %v1812_v41, 4 }
 0x433   :  { %v3941_v17 = vpop.eup %3940 }
 0x434   :  { %v2493_v37 = vmul.f32 %v3941_v17, %v5396_v39  ;;  %v3836_v33 = vpop.permute.xlu2 %3835  ;;  %v2548_v12 = vpack.c.bf16 %v1818_v53, %v1818_v53  ;;  %v1823_v62 = vrot.slane %v1818_v53, 4  ;;  %v1814_v16 = vsel %vm219_vm1, 0.0, %v1813_v55  ;;  %v3943_v13 = vpop.eup %3942 }
 0x435   :  { %v3838_v57 = vunpack.i.h.bf16 %v3836_v33  ;;  %v3837_v31 = vunpack.i.l.bf16 %v3836_v33  ;;  %v5505_v49 = vperm.slane %v1814_v16, %v4117_v35 }
 0x436   :  { %v2517_v46 = vpack.c.bf16 %v2493_v37, %v2493_v37  ;;  %v2750_v15 = vunpack.c.l.b16 %v2548_v12  ;;  %v1824_v4 = vsel %vm219_vm1, 0.0, %v1823_v62  ;;  %v2494_v12 = vmul.f32 %v3943_v13, %v5392_v9 }
 0x437   :  { %v1500_v50 = vsel %vm219_vm1, %v1499_v38, %v3838_v57  ;;  %v1501_v28 = vrot.slane %v3838_v57, 4  ;;  %v1512_v39 = vsel %vm219_vm1, %v1511_v51, %v3837_v31  ;;  %v1513_v0 = vrot.slane %v3837_v31, 4 }
 0x438   :  { %v2653_v22 = vunpack.c.l.b16 %v2517_v46  ;;  %v1506_v6 = vperm.slane %v1500_v50, %v4079_v3  ;;  %v1518_v59 = vperm.slane %v1512_v39, %v4079_v3  ;;  %v2752_v60 = vpack.c.b16 %v2750_v15, %v2750_v15 }
 0x439   :  { %v1502_v18 = vsel %vm219_vm1, %v3832_v2, %v1501_v28  ;;  %v1514_v58 = vsel %vm219_vm1, %v3843_v14, %v1513_v0  ;;  %v2551_v47 = vpack.c.bf16 %v1824_v4, %v1824_v4  ;;  %v2554_v43 = vpack.c.bf16 %v5505_v49, %v5505_v49 }
 0x43a   :  { %v2655_v23 = vpack.c.b16 %v2653_v22, %v2652_v32  ;;  %v1510_v24 = vperm.slane %v1502_v18, %v4079_v3  ;;  %v1525_v44 = vrot.slane %v1506_v6, 4  ;;  %v1522_v29 = vperm.slane %v1514_v58, %v4079_v3 }
 0x43b   :  { %v1523_v61 = vrot.slane %v1518_v59, 4  ;;  %v2761_v11 = vand.u32 %v2752_v60, %v5123_v34  ;;  %v2794_v20 = vunpack.c.l.b16 %v2551_v47  ;;  %v2838_v41 = vunpack.c.l.b16 %v2554_v43 }
 0x43c   :  { %v1537_v52 = vrot.slane %v1510_v24, 4  ;;  %v1526_v2 = vsel %vm219_vm1, %v1518_v59, %v1525_v44  ;;  %v1535_v14 = vrot.slane %v1522_v29, 4  ;;  %3674 = vmatmul.msk.bf16.vlgmr.msrb.gmra.mxu0 %vm2244_vm3, %v2655_v23  ;;  %v1735_v46 = vrot.slane %v1715_v56, 4  ;;  %v5944_v59 = vld [vmem:[#allocation5_spill] sm:$0xff] }
 0x43d   :  { %v1524_v53 = vsel %vm219_vm1, %v1523_v61, %v1506_v6  ;;  %v1534_v55 = vperm.slane %v1526_v2, %v4117_v35  ;;  %2769 = vmatpush.bf16.msra.mxu2 %v2761_v11  ;;  %v2796_v17 = vpack.c.b16 %v2794_v20, %v2794_v20  ;;  %v2840_v38 = vpack.c.b16 %v2838_v41, %v2838_v41 }
 0x43e   :  { %v1530_v51 = vperm.slane %v1524_v53, %v4117_v35  ;;  %v1536_v37 = vsel %vm219_vm1, %v1535_v14, %v1510_v24  ;;  %v1538_v33 = vsel %vm219_vm1, %v1522_v29, %v1537_v52  ;;  %v5536_v28 = vperm.slane %v5253_v8, %v4117_v35 }
 0x43f   :  { %v1542_v62 = vperm.slane %v1536_v37, %v4117_v35  ;;  %v1546_v16 = vperm.slane %v1538_v33, %v4117_v35  ;;  %v1549_v27 = vrot.slane %v1534_v55, 4  ;;  %v2805_v57 = vand.u32 %v2796_v17, %v5123_v34 }
 0x440   :  { %v1547_v31 = vrot.slane %v1530_v51, 4  ;;  %v2849_v32 = vand.u32 %v2840_v38, %v5123_v34  ;;  %v1825_v22 = vrot.slane %v5505_v49, 4  ;;  %v2518_v58 = vpack.c.bf16 %v2494_v12, %v2494_v12 }
 0x441   :  { %v1550_v15 = vsel %vm219_vm1, 0.0, %v1549_v27  ;;  %v1551_v4 = vrot.slane %v1542_v62, 4  ;;  %v1553_v50 = vrot.slane %v1546_v16, 4  ;;  %2813 = vmatpush.bf16.msra.mxu3 %v2805_v57  ;;  %v1771_v0 = vsel %vm219_vm1, %v5494_v54, %v1546_v16 }
 0x442   :  { %v1548_v9 = vsel %vm219_vm1, 0.0, %v1547_v31  ;;  %v1753_v39 = vrot.slane %v1550_v15, 4  ;;  %2857 = vmatpush.bf16.msra.mxu0 %v2849_v32  ;;  %v1716_v60 = vsel %vm219_vm1, %v1547_v31, %v5944_v59  ;;  %v1826_v23 = vsel %vm219_vm1, 0.0, %v1825_v22 }
 0x443   :  { %v1554_v6 = vsel %vm219_vm1, 0.0, %v1553_v50  ;;  %v1759_v18 = vsel %vm219_vm1, %v1551_v4, %v1534_v55  ;;  %v1552_v54 = vsel %vm219_vm1, 0.0, %v1551_v4  ;;  %v2557_v49 = vpack.c.bf16 %v1826_v23, %v1826_v23 }
 0x444   :  { %v1754_v8 = vsel %vm219_vm1, %v1753_v39, %v1548_v9  ;;  %v1763_v47 = vperm.slane %v1759_v18, %v4079_v3  ;;  %v1764_v43 = vrot.slane %v1554_v6, 4  ;;  %v2654_v44 = vunpack.c.l.b16 %v2518_v58 }
 0x445   :  { %v1758_v24 = vperm.slane %v1754_v8, %v4079_v3  ;;  %v1720_v29 = vperm.slane %v1716_v60, %v4079_v3  ;;  %v1775_v61 = vperm.slane %v1771_v0, %v4079_v3  ;;  %v2882_v20 = vunpack.c.l.b16 %v2557_v49 }
 0x446   :  { %v1765_v13 = vsel %vm219_vm1, %v1764_v43, %v1552_v54  ;;  %v1776_v11 = vrot.slane %v1763_v47, 4  ;;  %v1728_v41 = vperm.slane %v5246_v36, %v4117_v35  ;;  %v1751_v2 = vrot.slane %v5536_v28, 4 }
 0x447   :  { %v1769_v52 = vperm.slane %v1765_v13, %v4079_v3  ;;  %v1733_v14 = vrot.slane %v1720_v29, 4  ;;  %v1788_v55 = vrot.slane %v1775_v61, 4  ;;  %v1736_v17 = vsel %vm219_vm1, %v1720_v29, %v1735_v46 }
 0x448   :  { %v1777_v53 = vsel %vm219_vm1, %v1776_v11, %v1758_v24  ;;  %v2884_v38 = vpack.c.b16 %v2882_v20, %v2882_v20  ;;  %v2656_v51 = vpack.c.b16 %v2654_v44, %v2654_v44  ;;  %v1744_v33 = vperm.slane %v1736_v17, %v4117_v35 }
 0x449   :  { %v1783_v37 = vperm.slane %v1777_v53, %v4117_v35  ;;  %v1734_v12 = vsel %vm219_vm1, %v1733_v14, %v1715_v56  ;;  %v1789_v36 = vsel %vm219_vm1, %v1788_v55, %v1769_v52  ;;  %v1778_v62 = vrot.slane %v1758_v24, 4  ;;  %v2437_v53 = vpop.xlane.xlu0 %2436 }
 0x44a   :  { %v1790_v16 = vrot.slane %v1769_v52, 4  ;;  %v2893_v27 = vand.u32 %v2884_v38, %v5123_v34  ;;  %v1740_v57 = vperm.slane %v1734_v12, %v4117_v35  ;;  %v1747_v31 = vrot.slane %v1728_v41, 4 }
 0x44b   :  { %v1795_v32 = vperm.slane %v1789_v36, %v4117_v35  ;;  %v1802_v46 = vrot.slane %v1783_v37, 4  ;;  %v1752_v15 = vsel %vm219_vm1, %v1744_v33, %v1751_v2  ;;  %v1779_v4 = vsel %vm219_vm1, %v1763_v47, %v1778_v62 }
 0x44c   :  { %3675 = vmatmul.msk.bf16.gmra.mxu0 %vm2244_vm3, %v2656_v51  ;;  %v1791_v56 = vsel %vm219_vm1, %v1775_v61, %v1790_v16  ;;  %2901 = vmatpush.bf16.msra.mxu1 %v2893_v27  ;;  %v1748_v50 = vsel %vm219_vm1, %v1740_v57, %v1747_v31  ;;  %v1745_v9 = vrot.slane %v1740_v57, 4  ;;  %v1787_v34 = vperm.slane %v1779_v4, %v4117_v35 }
 0x44d   :  { %v1800_v39 = vrot.slane %v1795_v32, 4  ;;  %v1803_v0 = vsel %vm219_vm1, %v1795_v32, %v1802_v46  ;;  %v2549_v22 = vpack.c.bf16 %v1748_v50, %v1748_v50  ;;  %v1799_v6 = vperm.slane %v1791_v56, %v4117_v35 }
 0x44e   :  { %v2550_v60 = vpack.c.bf16 %v1803_v0, %v1803_v0  ;;  %v1746_v18 = vsel %vm219_vm1, %v1745_v9, %v1728_v41  ;;  %v1806_v8 = vrot.slane %v1787_v34, 4  ;;  %v2555_v23 = vpack.c.bf16 %v1752_v15, %v1752_v15 }
 0x44f   :  { %v2308_v59 = vpop.xlane.xlu1 %2307  ;;  %v1801_v58 = vsel %vm219_vm1, %v1800_v39, %v1783_v37  ;;  %v2546_v43 = vpack.c.bf16 %v1746_v18, %v1746_v18  ;;  %v2792_v54 = vunpack.c.l.b16 %v2549_v22  ;;  %v1749_v61 = vrot.slane %v1744_v33, 4 }
 0x450   :  { %v2338_v47 = vsub.f32 %v5295_v48, %v2308_v59  ;;  %v2793_v24 = vunpack.c.l.b16 %v2550_v60  ;;  %v2547_v49 = vpack.c.bf16 %v1801_v58, %v1801_v58  ;;  %v1807_v44 = vsel %vm219_vm1, %v1799_v6, %v1806_v8 }
 0x451   :  { %v2556_v13 = vpack.c.bf16 %v1807_v44, %v1807_v44  ;;  %v2748_v20 = vunpack.c.l.b16 %v2546_v43  ;;  %v1804_v2 = vrot.slane %v1799_v6, 4  ;;  %v2880_v41 = vunpack.c.l.b16 %v2555_v23  ;;  %v2446_v27 = vpop.xlane.xlu0 %2445 }
 0x452   :  { %v2382_v29 = vmul.f32 1.442695, %v2338_v47  ;;  %v2795_v11 = vpack.c.b16 %v2793_v24, %v2792_v54  ;;  %v2749_v52 = vunpack.c.l.b16 %v2547_v49  ;;  %v1750_v48 = vsel %vm219_vm1, %v1749_v61, %v5536_v28 }
 0x453   :  { %v2881_v14 = vunpack.c.l.b16 %v2556_v13  ;;  %v1805_v17 = vsel %vm219_vm1, %v1804_v2, %v1787_v34  ;;  %v2552_v38 = vpack.c.bf16 %v1750_v48, %v1750_v48 }
 0x454   :  { %3944 = vpow2.f32 %v2382_v29  ;;  %2814 = vmatpush.bf16.msra.mxu3 %v2795_v11  ;;  %v2751_v55 = vpack.c.b16 %v2749_v52, %v2748_v20  ;;  %v2553_v37 = vpack.c.bf16 %v1805_v17, %v1805_v17 }
 0x455   :  { %v2883_v51 = vpack.c.b16 %v2881_v14, %v2880_v41  ;;  %v2836_v12 = vunpack.c.l.b16 %v2552_v38  ;;  %3946 = vrcp.f32 %v2437_v53 }
 0x456   :  { %2770 = vmatpush.bf16.msra.mxu2 %v2751_v55  ;;  %v2837_v36 = vunpack.c.l.b16 %v2553_v37 }
 0x457   :  { %v2455_v33 = vpop.xlane.xlu1 %2454  ;;  %2902 = vmatpush.bf16.msra.mxu1 %v2883_v51 }
 0x458   :  { %v2839_v16 = vpack.c.b16 %v2837_v36, %v2836_v12 }
 0x459   :  { %v2434_v61 = vpop.xlane.xlu0 %2433 }
 0x45a   :  { %v5582_v62 = vpop.eup %3944  ;;  %2858 = vmatpush.bf16.msra.mxu0 %v2839_v16 }
 0x45b   :  { %v2450_v28 = vsel %vm2251_vm5, %v5582_v62, 0.0  ;;  %v3947_v31 = vpop.eup %3946 }
 0x45c   :  { %2451 = vadd.xlane.f32.xlu2 %v2450_v28  ;;  %v2501_v32 = vmul.f32 %v3947_v31, %v5402_v10 }
 0x45e   :  { %v2525_v15 = vpack.c.bf16 %v2501_v32, %v2501_v32  ;;  %v2640_v32 = vpop.f32.mrf.mxu3 }
 0x45f   :  { %v2440_v57 = vpop.xlane.xlu1 %2439 }
 0x460   :  { %3948 = vrcp.f32 %v2440_v57  ;;  %v2784_v39 = vunpack.c.l.b16 %v2525_v15 }
 0x461   :  { %3950 = vrcp.f32 %v2446_v27 }
 0x466   :  { %v3949_v46 = vpop.eup %3948 }
 0x467   :  { %v2502_v4 = vmul.f32 %v3949_v46, %v5437_v63  ;;  %v2449_v56 = vpop.xlane.xlu1 %2448  ;;  %v3951_v50 = vpop.eup %3950 }
 0x468   :  { %3952 = vrcp.f32 %v2449_v56  ;;  %v2504_v34 = vmul.f32 %v3951_v50, %v5410_v26 }
 0x469   :  { %v2526_v9 = vpack.c.bf16 %v2502_v4, %v2502_v4 }
 0x46a   :  { %v2528_v60 = vpack.c.bf16 %v2504_v34, %v2504_v34 }
 0x46b   :  { %v2785_v0 = vunpack.c.l.b16 %v2526_v9 }
 0x46c   :  { %v2828_v58 = vunpack.c.l.b16 %v2528_v60  ;;  %v2596_v60 = vpop.f32.mrf.mxu2 }
 0x46d   :  { %v2787_v22 = vpack.c.b16 %v2785_v0, %v2784_v39  ;;  %v2398_v6 = vpop.xlane.xlu2 %2397 }
 0x46e   :  { %v3953_v59 = vpop.eup %3952  ;;  %3954 = vrcp.f32 %v2398_v6  ;;  %v2927_v6 = vrot.slane %v2640_v32, 4 }
 0x46f   :  { %v2505_v18 = vmul.f32 %v3953_v59, %v5445_v21  ;;  %3680 = vmatmul.msk.bf16.vlgmr.msra.gmra.mxu3 %vm2244_vm3, %v2787_v22  ;;  %v2461_v11 = vpop.xlane.xlu1 %2460 }
 0x471   :  { %v2529_v10 = vpack.c.bf16 %v2505_v18, %v2505_v18 }
 0x473   :  { %v2829_v63 = vunpack.c.l.b16 %v2529_v10 }
 0x474   :  { %v3955_v8 = vpop.eup %3954 }
 0x475   :  { %v2831_v47 = vpack.c.b16 %v2829_v63, %v2828_v58  ;;  %v2428_v43 = vpop.xlane.xlu2 %2427  ;;  %v2488_v23 = vmul.f32 %v3955_v8, %v5451_v45  ;;  %v2915_v63 = vrot.slane %v2596_v60, 4 }
 0x476   :  { %3956 = vrcp.f32 %v2428_v43 }
 0x477   :  { %3958 = vrcp.f32 %v5489_v42  ;;  %3682 = vmatmul.msk.bf16.vlgmr.msra.gmra.mxu0 %vm2244_vm3, %v2831_v47  ;;  %v2512_v26 = vpack.c.bf16 %v2488_v23, %v2488_v23 }
 0x478   :  { %3960 = vrcp.f32 %v2455_v33 }
 0x479   :  { %v2563_v54 = vunpack.c.l.b16 %v2512_v26 }
 0x47b   :  { %v2565_v24 = vpack.c.b16 %v2563_v54, %v2563_v54 }
 0x47c   :  { %v3957_v21 = vpop.eup %3956 }
 0x47d   :  { %v3959_v49 = vpop.eup %3958  ;;  %3671 = vmatmul.msk.bf16.gmra.mxu2 %vm2244_vm3, %v2565_v24  ;;  %v2458_v44 = vpop.xlane.xlu2 %2457  ;;  %v2498_v13 = vmul.f32 %v3957_v21, %v5461_v5 }
 0x47e   :  { %v3961_v29 = vpop.eup %3960  ;;  %3962 = vrcp.f32 %v2458_v44  ;;  %v2499_v45 = vmul.f32 %v3959_v49, %v5381_v40 }
 0x47f   :  { %v2507_v42 = vmul.f32 %v3961_v29, %v5431_v1  ;;  %v2522_v20 = vpack.c.bf16 %v2498_v13, %v2498_v13  ;;  %3964 = vrcp.f32 %v2434_v61 }
 0x480   :  { %v2523_v2 = vpack.c.bf16 %v2499_v45, %v2499_v45  ;;  %3966 = vrcp.f32 %v2461_v11  ;;  %v2598_v11 = vpop.f32.mrf.mxu2 }
 0x481   :  { %v2531_v41 = vpack.c.bf16 %v2507_v42, %v2507_v42  ;;  %v2740_v53 = vunpack.c.l.b16 %v2522_v20 }
 0x482   :  { %v2741_v17 = vunpack.c.l.b16 %v2523_v2 }
 0x483   :  { %v2872_v5 = vunpack.c.l.b16 %v2531_v41 }
 0x484   :  { %v3963_v52 = vpop.eup %3962  ;;  %v2743_v37 = vpack.c.b16 %v2741_v17, %v2740_v53 }
 0x485   :  { %v2508_v14 = vmul.f32 %v3963_v52, %v5467_v19  ;;  %v2443_v48 = vpop.xlane.xlu2 %2442  ;;  %v3965_v40 = vpop.eup %3964 }
 0x486   :  { %3968 = vrcp.f32 %v2443_v48  ;;  %v3967_v51 = vpop.eup %3966  ;;  %v2500_v19 = vmul.f32 %v3965_v40, %v5418_v30 }
 0x487   :  { %v2532_v55 = vpack.c.bf16 %v2508_v14, %v2508_v14  ;;  %v2509_v16 = vmul.f32 %v3967_v51, %v5453_v7 }
 0x488   :  { %v2524_v57 = vpack.c.bf16 %v2500_v19, %v2500_v19 }
 0x489   :  { %v2873_v38 = vunpack.c.l.b16 %v2532_v55  ;;  %v2533_v31 = vpack.c.bf16 %v2509_v16, %v2509_v16 }
 0x48a   :  { %v2742_v46 = vunpack.c.l.b16 %v2524_v57 }
 0x48b   :  { %v2875_v1 = vpack.c.b16 %v2873_v38, %v2872_v5  ;;  %v2874_v15 = vunpack.c.l.b16 %v2533_v31  ;;  %v2971_v5 = vrot.slane %v2598_v11, 4 }
 0x48c   :  { %v3969_v33 = vpop.eup %3968  ;;  %v2744_v56 = vpack.c.b16 %v2742_v46, %v2742_v46 }
 0x48d   :  { %3678 = vmatmul.msk.bf16.vlgmr.msra.gmra.mxu2 %vm2244_vm3, %v2743_v37  ;;  %3684 = vmatmul.msk.bf16.vlgmr.msra.gmra.mxu1 %vm2244_vm3, %v2875_v1  ;;  %v2503_v12 = vmul.f32 %v3969_v33, %v5472_v25  ;;  %v2876_v50 = vpack.c.b16 %v2874_v15, %v2874_v15  ;;  %v2642_v25 = vpop.f32.mrf.mxu3 }
 0x48e   :  { %v2983_v47 = vrot.slane %v2642_v25, 4 }
 0x48f   :  { %v2527_v36 = vpack.c.bf16 %v2503_v12, %v2503_v12 }
 0x491   :  { %v2786_v28 = vunpack.c.l.b16 %v2527_v36 }
 0x493   :  { %v2788_v27 = vpack.c.b16 %v2786_v28, %v2786_v28 }
 0x495   :  { %3681 = vmatmul.msk.bf16.gmra.mxu3 %vm2244_vm3, %v2788_v27 }
 0x499   :  { %v2728_v4 = vpop.f32.mrf.mxu1 }
 0x49a   :  { %v2925_v59 = vrot.slane %v2728_v4, 4  ;;  %v2928_v18 = vsel %vm219_vm1, %v2728_v4, %v2927_v6 }
 0x49b   :  { %v2936_v58 = vperm.slane %v2928_v18, %v4079_v3 }
 0x49c   :  { %v2926_v10 = vsel %vm219_vm1, %v2925_v59, %v2640_v32 }
 0x49d   :  { %3679 = vmatmul.msk.bf16.gmra.mxu2 %vm2244_vm3, %v2744_v56  ;;  %3685 = vmatmul.msk.bf16.gmra.mxu1 %vm2244_vm3, %v2876_v50  ;;  %v2932_v43 = vperm.slane %v2926_v10, %v4079_v3  ;;  %v2949_v24 = vrot.slane %v2936_v58, 4 }
 0x49f   :  { %v2937_v13 = vrot.slane %v2932_v43, 4 }
 0x4a1   :  { %v2730_v30 = vpop.f32.mrf.mxu1 }
 0x4a2   :  { %v2981_v8 = vrot.slane %v2730_v30, 4  ;;  %v2984_v21 = vsel %vm219_vm1, %v2730_v30, %v2983_v47 }
 0x4a3   :  { %v2992_v20 = vperm.slane %v2984_v21, %v4079_v3 }
 0x4a4   :  { %v2982_v44 = vsel %vm219_vm1, %v2981_v8, %v2642_v25 }
 0x4a5   :  { %v2988_v2 = vperm.slane %v2982_v44, %v4079_v3  ;;  %v3005_v12 = vrot.slane %v2992_v20, 4 }
 0x4a7   :  { %v2645_v9 = vpop.f32.mrf.mxu3  ;;  %v2993_v33 = vrot.slane %v2988_v2, 4 }
 0x4a9   :  { %v2733_v7 = vpop.f32.mrf.mxu1 }
 0x4aa   :  { %v3031_v39 = vrot.slane %v2733_v7, 4 }
 0x4ac   :  { %v5608_v34 = vsel %vm219_vm1, %v3031_v39, %v2645_v9 }
 0x4af   :  { %v2647_v0 = vpop.f32.mrf.mxu3 }
 0x4b1   :  { %v2735_v22 = vpop.f32.mrf.mxu1 }
 0x4b9   :  { %v2684_v23 = vpop.f32.mrf.mxu0 }
 0x4ba   :  { %v2913_v26 = vrot.slane %v2684_v23, 4  ;;  %v2916_v54 = vsel %vm219_vm1, %v2684_v23, %v2915_v63 }
 0x4bb   :  { %v2924_v49 = vperm.slane %v2916_v54, %v4079_v3 }
 0x4bc   :  { %v2914_v29 = vsel %vm219_vm1, %v2913_v26, %v2596_v60 }
 0x4bd   :  { %v2920_v45 = vperm.slane %v2914_v29, %v4079_v3  ;;  %v2950_v61 = vsel %vm219_vm1, %v2949_v24, %v2924_v49  ;;  %v2951_v42 = vrot.slane %v2924_v49, 4 }
 0x4be   :  { %v2956_v52 = vperm.slane %v2950_v61, %v4117_v35 }
 0x4bf   :  { %v2938_v41 = vsel %vm219_vm1, %v2937_v13, %v2920_v45  ;;  %v2939_v14 = vrot.slane %v2920_v45, 4  ;;  %v2952_v48 = vsel %vm219_vm1, %v2936_v58, %v2951_v42 }
 0x4c0   :  { %v2944_v53 = vperm.slane %v2938_v41, %v4117_v35  ;;  %v2960_v55 = vperm.slane %v2952_v48, %v4117_v35  ;;  %v2965_v17 = vrot.slane %v2956_v52, 4 }
 0x4c1   :  { %v2940_v38 = vsel %vm219_vm1, %v2932_v43, %v2939_v14  ;;  %v2686_v40 = vpop.f32.mrf.mxu0 }
 0x4c2   :  { %v2948_v51 = vperm.slane %v2940_v38, %v4117_v35  ;;  %v2961_v37 = vrot.slane %v2944_v53, 4  ;;  %v2967_v1 = vrot.slane %v2960_v55, 4  ;;  %v2969_v36 = vrot.slane %v2686_v40, 4 }
 0x4c3   :  { %v2972_v19 = vsel %vm219_vm1, %v2686_v40, %v2971_v5  ;;  %v2966_v28 = vsel %vm219_vm1, 0.0, %v2965_v17 }
 0x4c4   :  { %v2963_v16 = vrot.slane %v2948_v51, 4  ;;  %v2968_v27 = vsel %vm219_vm1, 0.0, %v2967_v1  ;;  %v3178_v57 = vsel %vm219_vm1, %v2967_v1, %v2956_v52  ;;  %v2970_v46 = vsel %vm219_vm1, %v2969_v36, %v2598_v11 }
 0x4c5   :  { %v3182_v31 = vperm.slane %v3178_v57, %v4079_v3  ;;  %v3183_v32 = vrot.slane %v2968_v27, 4  ;;  %v2980_v15 = vperm.slane %v2972_v19, %v4079_v3  ;;  %v2962_v4 = vsel %vm219_vm1, 0.0, %v2961_v37 }
 0x4c6   :  { %v2964_v56 = vsel %vm219_vm1, 0.0, %v2963_v16  ;;  %v3167_v50 = vsel %vm219_vm1, %v2963_v16, %v2944_v53  ;;  %v2976_v25 = vperm.slane %v2970_v46, %v4079_v3 }
 0x4c7   :  { %v3172_v30 = vrot.slane %v2964_v56, 4  ;;  %v3184_v9 = vsel %vm219_vm1, %v3183_v32, %v2966_v28  ;;  %v3203_v7 = vrot.slane %v3182_v31, 4  ;;  %v3006_v39 = vsel %vm219_vm1, %v3005_v12, %v2980_v15 }
 0x4c8   :  { %v3188_v0 = vperm.slane %v3184_v9, %v4079_v3  ;;  %v2994_v22 = vsel %vm219_vm1, %v2993_v33, %v2976_v25  ;;  %v2995_v6 = vrot.slane %v2976_v25, 4  ;;  %v3007_v59 = vrot.slane %v2980_v15, 4 }
 0x4c9   :  { %v3000_v60 = vperm.slane %v2994_v22, %v4117_v35  ;;  %v3012_v18 = vperm.slane %v3006_v39, %v4117_v35  ;;  %v5647_v10 = vpop.f32.mrf.mxu0  ;;  %v3171_v58 = vperm.slane %v3167_v50, %v4079_v3  ;;  %v3173_v63 = vsel %vm219_vm1, %v3172_v30, %v2962_v4 }
 0x4ca   :  { %v2996_v8 = vsel %vm219_vm1, %v2988_v2, %v2995_v6  ;;  %v3008_v47 = vsel %vm219_vm1, %v2992_v20, %v3007_v59  ;;  %v3177_v43 = vperm.slane %v3173_v63, %v4079_v3  ;;  %v3204_v21 = vsel %vm219_vm1, %v3188_v0, %v3203_v7 }
 0x4cb   :  { %v3004_v23 = vperm.slane %v2996_v8, %v4117_v35  ;;  %v3016_v26 = vperm.slane %v3008_v47, %v4117_v35  ;;  %v3017_v54 = vrot.slane %v3000_v60, 4  ;;  %v3191_v24 = vrot.slane %v3171_v58, 4 }
 0x4cc   :  { %v3189_v49 = vrot.slane %v3177_v43, 4  ;;  %v3201_v44 = vrot.slane %v3188_v0, 4  ;;  %v3021_v45 = vrot.slane %v3012_v18, 4  ;;  %v3212_v11 = vperm.slane %v3204_v21, %v4117_v35 }
 0x4cd   :  { %v3018_v29 = vsel %vm219_vm1, 0.0, %v3017_v54  ;;  %v3019_v13 = vrot.slane %v3004_v23, 4  ;;  %v3023_v61 = vrot.slane %v3016_v26, 4  ;;  %v3192_v42 = vsel %vm219_vm1, %v3177_v43, %v3191_v24 }
 0x4ce   :  { %v3190_v20 = vsel %vm219_vm1, %v3189_v49, %v3171_v58  ;;  %v3202_v52 = vsel %vm219_vm1, %v3201_v44, %v3182_v31  ;;  %v3022_v38 = vsel %vm219_vm1, 0.0, %v3021_v45  ;;  %v3200_v51 = vperm.slane %v3192_v42, %v4117_v35 }
 0x4cf   :  { %v3020_v2 = vsel %vm219_vm1, 0.0, %v3019_v13  ;;  %v3024_v41 = vsel %vm219_vm1, 0.0, %v3023_v61  ;;  %v3221_v14 = vsel %vm219_vm1, %v3019_v13, %v3000_v60  ;;  %v3232_v48 = vsel %vm219_vm1, %v3023_v61, %v3012_v18  ;;  %v2452_v53 = vpop.xlane.xlu2 %2451 }
 0x4d0   :  { %v3226_v55 = vrot.slane %v3020_v2, 4  ;;  %v3236_v17 = vperm.slane %v3232_v48, %v4079_v3  ;;  %v3237_v5 = vrot.slane %v3024_v41, 4  ;;  %3970 = vrcp.f32 %v2452_v53 }
 0x4d1   :  { %v2691_v40 = vpop.f32.mrf.mxu0  ;;  %v3225_v37 = vperm.slane %v3221_v14, %v4079_v3  ;;  %v3196_v1 = vperm.slane %v3190_v20, %v4117_v35  ;;  %v3208_v19 = vperm.slane %v3202_v52, %v4117_v35  ;;  %v3217_v57 = vrot.slane %v3212_v11, 4 }
 0x4d2   :  { %v3238_v33 = vsel %vm219_vm1, %v3237_v5, %v3022_v38  ;;  %v3257_v12 = vrot.slane %v3236_v17, 4  ;;  %v3227_v36 = vsel %vm219_vm1, %v3226_v55, %v3018_v29  ;;  %v3219_v31 = vrot.slane %v3200_v51, 4 }
 0x4d3   :  { %v3242_v16 = vperm.slane %v3238_v33, %v4079_v3  ;;  %v3231_v28 = vperm.slane %v3227_v36, %v4079_v3  ;;  %v3245_v27 = vrot.slane %v3225_v37, 4  ;;  %v3213_v32 = vrot.slane %v3208_v19, 4 }
 0x4d4   :  { %v3215_v9 = vrot.slane %v3196_v1, 4  ;;  %v3218_v58 = vsel %vm219_vm1, %v3217_v57, %v3200_v51  ;;  %v3220_v63 = vsel %vm219_vm1, %v3212_v11, %v3219_v31  ;;  %v3036_v45 = vperm.slane %v5608_v34, %v4079_v3 }
 0x4d5   :  { %v3246_v46 = vsel %vm219_vm1, %v3231_v28, %v3245_v27  ;;  %v3258_v15 = vsel %vm219_vm1, %v3242_v16, %v3257_v12  ;;  %v3243_v4 = vrot.slane %v3231_v28, 4  ;;  %v3255_v56 = vrot.slane %v3242_v16, 4 }
 0x4d6   :  { %v3971_v50 = vpop.eup %3970  ;;  %v3254_v25 = vperm.slane %v3246_v46, %v4117_v35  ;;  %v3266_v30 = vperm.slane %v3258_v15, %v4117_v35  ;;  %v5684_v22 = vsel %vm219_vm1, %v3213_v32, %v3196_v1  ;;  %v3216_v21 = vsel %vm219_vm1, %v3208_v19, %v3215_v9 }
 0x4d7   :  { %v3244_v7 = vsel %vm219_vm1, %v3243_v4, %v3225_v37  ;;  %v3256_v39 = vsel %vm219_vm1, %v3255_v56, %v3236_v17  ;;  %v2506_v0 = vmul.f32 %v3971_v50, %v5582_v62  ;;  %v3025_v61 = vrot.slane %v5647_v10, 4 }
 0x4d8   :  { %v3271_v6 = vrot.slane %v3266_v30, 4  ;;  %v3273_v59 = vrot.slane %v3254_v25, 4  ;;  %v3250_v60 = vperm.slane %v3244_v7, %v4117_v35  ;;  %v3262_v18 = vperm.slane %v3256_v39, %v4117_v35 }
 0x4d9   :  { %v2530_v8 = vpack.c.bf16 %v2506_v0, %v2506_v0  ;;  %v3037_v20 = vrot.slane %v3036_v45, 4 }
 0x4da   :  { %v3272_v47 = vsel %vm219_vm1, %v3271_v6, %v3254_v25  ;;  %v3274_v43 = vsel %vm219_vm1, %v3266_v30, %v3273_v59  ;;  %v3267_v23 = vrot.slane %v3262_v18, 4  ;;  %v3269_v62 = vrot.slane %v3250_v60, 4 }
 0x4db   :  { %v3849_v26 = vpack.i.bf16 %v3272_v47, %v3218_v58  ;;  %v3854_v54 = vpack.i.bf16 %v3274_v43, %v3220_v63  ;;  %v2830_v24 = vunpack.c.l.b16 %v2530_v8 }
 0x4dc   :  { %v3270_v49 = vsel %vm219_vm1, %v3262_v18, %v3269_v62  ;;  %v5695_v44 = vsel %vm219_vm1, %v3267_v23, %v3250_v60 }
 0x4dd   :  { %3850 = vrot.lane.b32.xlu1 %v3849_v26, %s3980_s13  ;;  %3855 = vrot.lane.b32.xlu2 %v3854_v54, %s3981_s14  ;;  %v3844_v29 = vpack.i.bf16 %v3270_v49, %v3216_v21  ;;  %v2832_v13 = vpack.c.b16 %v2830_v24, %v2830_v24 }
 0x4df   :  { %3845 = vrot.lane.b32.xlu0 %v3844_v29, %s3982_s15  ;;  %3683 = vmatmul.msk.bf16.gmra.mxu0 %vm2244_vm3, %v2832_v13 }
 0x4f2   :  { %v2816_v2 = vpop.f32.mrf.mxu3 }
 0x4f3   :  { %v3057_v53 = vrot.slane %v2816_v2, 4 }
 0x4f4   :  { %v2860_v55 = vpop.f32.mrf.mxu0 }
 0x4f5   :  { %v3043_v40 = vrot.slane %v2860_v55, 4 }
 0x4fa   :  { %v2818_v38 = vpop.f32.mrf.mxu3 }
 0x4fb   :  { %v3113_v1 = vrot.slane %v2818_v38, 4 }
 0x4fc   :  { %v2862_v4 = vpop.f32.mrf.mxu0 }
 0x4fd   :  { %v3099_v60 = vrot.slane %v2862_v4, 4 }
 0x500   :  { %v2601_v42 = vpop.f32.mrf.mxu2 }
 0x501   :  { %v3026_v11 = vsel %vm219_vm1, %v3025_v61, %v2601_v42 }
 0x502   :  { %v3030_v52 = vperm.slane %v3026_v11, %v4079_v3 }
 0x504   :  { %v3038_v41 = vsel %vm219_vm1, %v3037_v20, %v3030_v52 }
 0x505   :  { %v3042_v18 = vperm.slane %v3038_v41, %v4117_v35 }
 0x508   :  { %v2603_v14 = vpop.f32.mrf.mxu2 }
 0x50a   :  { %v2904_v48 = vpop.f32.mrf.mxu1 }
 0x50b   :  { %v3055_v17 = vrot.slane %v2904_v48, 4  ;;  %v3058_v34 = vsel %vm219_vm1, %v2904_v48, %v3057_v53 }
 0x50c   :  { %v3066_v51 = vperm.slane %v3058_v34, %v4079_v3 }
 0x50d   :  { %v3056_v5 = vsel %vm219_vm1, %v3055_v17, %v2816_v2 }
 0x50e   :  { %v3062_v10 = vperm.slane %v3056_v5, %v4079_v3  ;;  %v3079_v31 = vrot.slane %v3066_v51, 4 }
 0x510   :  { %v2772_v37 = vpop.f32.mrf.mxu2  ;;  %v3067_v36 = vrot.slane %v3062_v10, 4 }
 0x511   :  { %v3044_v33 = vsel %vm219_vm1, %v3043_v40, %v2772_v37  ;;  %v3045_v12 = vrot.slane %v2772_v37, 4 }
 0x512   :  { %v3050_v19 = vperm.slane %v3044_v33, %v4079_v3  ;;  %v2906_v16 = vpop.f32.mrf.mxu1 }
 0x513   :  { %v3046_v28 = vsel %vm219_vm1, %v2860_v55, %v3045_v12  ;;  %v3111_v27 = vrot.slane %v2906_v16, 4  ;;  %v3114_v57 = vsel %vm219_vm1, %v2906_v16, %v3113_v1 }
 0x514   :  { %v3054_v32 = vperm.slane %v3046_v28, %v4079_v3  ;;  %v3068_v46 = vsel %vm219_vm1, %v3067_v36, %v3050_v19  ;;  %v3069_v15 = vrot.slane %v3050_v19, 4  ;;  %v3122_v7 = vperm.slane %v3114_v57, %v4079_v3 }
 0x515   :  { %v3074_v56 = vperm.slane %v3068_v46, %v4117_v35  ;;  %v3112_v50 = vsel %vm219_vm1, %v3111_v27, %v2818_v38 }
 0x516   :  { %v3070_v25 = vsel %vm219_vm1, %v3062_v10, %v3069_v15  ;;  %v3080_v30 = vsel %vm219_vm1, %v3079_v31, %v3054_v32  ;;  %v3081_v9 = vrot.slane %v3054_v32, 4  ;;  %v3118_v59 = vperm.slane %v3112_v50, %v4079_v3 }
 0x517   :  { %v3078_v39 = vperm.slane %v3070_v25, %v4117_v35  ;;  %v3086_v0 = vperm.slane %v3080_v30, %v4117_v35  ;;  %v3091_v6 = vrot.slane %v3074_v56, 4  ;;  %v3135_v54 = vrot.slane %v3122_v7, 4 }
 0x518   :  { %v3082_v58 = vsel %vm219_vm1, %v3066_v51, %v3081_v9  ;;  %v2774_v63 = vpop.f32.mrf.mxu2  ;;  %v2821_v8 = vpop.f32.mrf.mxu3  ;;  %v3123_v61 = vrot.slane %v3118_v59, 4 }
 0x519   :  { %v3090_v47 = vperm.slane %v3082_v58, %v4117_v35  ;;  %v3092_v43 = vsel %vm219_vm1, 0.0, %v3091_v6  ;;  %v3093_v23 = vrot.slane %v3078_v39, 4  ;;  %v3095_v62 = vrot.slane %v3086_v0, 4 }
 0x51a   :  { %v3275_v26 = vrot.slane %v3092_v43, 4  ;;  %v3100_v24 = vsel %vm219_vm1, %v3099_v60, %v2774_v63  ;;  %v3101_v21 = vrot.slane %v2774_v63, 4  ;;  %v2909_v49 = vpop.f32.mrf.mxu1 }
 0x51b   :  { %v3096_v29 = vsel %vm219_vm1, 0.0, %v3095_v62  ;;  %v3097_v13 = vrot.slane %v3090_v47, 4  ;;  %v3281_v45 = vsel %vm219_vm1, %v3093_v23, %v3074_v56  ;;  %v3094_v2 = vsel %vm219_vm1, 0.0, %v3093_v23 }
 0x51c   :  { %v3276_v42 = vsel %vm219_vm1, %v3275_v26, %v3042_v18  ;;  %v5734_v11 = vperm.slane %v3281_v45, %v4079_v3  ;;  %v3286_v20 = vrot.slane %v3096_v29, 4  ;;  %v3102_v52 = vsel %vm219_vm1, %v2862_v4, %v3101_v21 }
 0x51d   :  { %v3292_v41 = vsel %vm219_vm1, %v3097_v13, %v3086_v0  ;;  %v3106_v14 = vperm.slane %v3100_v24, %v4079_v3  ;;  %v3110_v48 = vperm.slane %v3102_v52, %v4079_v3  ;;  %v3159_v17 = vrot.slane %v2909_v49, 4 }
 0x51e   :  { %v3287_v53 = vsel %vm219_vm1, %v3286_v20, %v3094_v2  ;;  %v3297_v55 = vrot.slane %v5734_v11, 4  ;;  %v3280_v5 = vperm.slane %v3276_v42, %v4079_v3  ;;  %v3296_v28 = vperm.slane %v3292_v41, %v4079_v3 }
 0x51f   :  { %v3124_v34 = vsel %vm219_vm1, %v3123_v61, %v3106_v14  ;;  %v3125_v38 = vrot.slane %v3106_v14, 4  ;;  %v3136_v10 = vsel %vm219_vm1, %v3135_v54, %v3110_v48  ;;  %v3137_v40 = vrot.slane %v3110_v48, 4 }
 0x520   :  { %v3130_v51 = vperm.slane %v3124_v34, %v4117_v35  ;;  %v3142_v37 = vperm.slane %v3136_v10, %v4117_v35  ;;  %v5749_v1 = vsel %vm219_vm1, %v3159_v17, %v2821_v8  ;;  %v5751_v33 = vpop.f32.mrf.mxu2  ;;  %v2823_v12 = vpop.f32.mrf.mxu3  ;;  %v3291_v16 = vperm.slane %v3287_v53, %v4079_v3 }
 0x521   :  { %v3126_v36 = vsel %vm219_vm1, %v3118_v59, %v3125_v38  ;;  %v3138_v19 = vsel %vm219_vm1, %v3122_v7, %v3137_v40  ;;  %v3298_v15 = vsel %vm219_vm1, %v3297_v55, %v3280_v5  ;;  %v3309_v4 = vrot.slane %v3296_v28, 4 }
 0x522   :  { %v3134_v27 = vperm.slane %v3126_v36, %v4117_v35  ;;  %v3146_v57 = vperm.slane %v3138_v19, %v4117_v35  ;;  %v3147_v31 = vrot.slane %v3130_v51, 4  ;;  %v3151_v32 = vrot.slane %v3142_v37, 4  ;;  %v2911_v46 = vpop.f32.mrf.mxu1 }
 0x523   :  { %v3098_v9 = vsel %vm219_vm1, 0.0, %v3097_v13  ;;  %v3310_v0 = vsel %vm219_vm1, %v3309_v4, %v3291_v16  ;;  %v3304_v47 = vperm.slane %v3298_v15, %v4117_v35  ;;  %v3299_v21 = vrot.slane %v3280_v5, 4  ;;  %v3700_v46 = vld [vmem:[%s5891_s3 + $0x8] sm:$0xff] }
 0x524   :  { %v3148_v56 = vsel %vm219_vm1, 0.0, %v3147_v31  ;;  %v3149_v50 = vrot.slane %v3134_v27, 4  ;;  %v3152_v25 = vsel %vm219_vm1, 0.0, %v3151_v32  ;;  %v5762_v30 = vrot.slane %v3146_v57, 4  ;;  %3528 = vmatpush.bf16.msrb.mxu2 %v3700_v46 }
 0x525   :  { %v3329_v7 = vrot.slane %v3148_v56, 4  ;;  %v3340_v39 = vrot.slane %v3152_v25, 4  ;;  %v3316_v18 = vperm.slane %v3310_v0, %v4117_v35  ;;  %v3311_v49 = vrot.slane %v3291_v16, 4  ;;  %v3699_v56 = vld [vmem:[%s5891_s3] sm:$0xff] }
 0x526   :  { %v3150_v6 = vsel %vm219_vm1, 0.0, %v3149_v50  ;;  %v3335_v59 = vsel %vm219_vm1, %v3149_v50, %v3130_v51  ;;  %v3347_v60 = vsel %vm219_vm1, %v5762_v30, %v3142_v37  ;;  %v3323_v61 = vrot.slane %v3304_v47, 4 }
 0x527   :  { %v3330_v58 = vsel %vm219_vm1, %v3329_v7, %v3098_v9  ;;  %v3339_v63 = vperm.slane %v3335_v59, %v4079_v3  ;;  %v3341_v8 = vsel %vm219_vm1, %v3340_v39, %v3150_v6  ;;  %v3321_v23 = vrot.slane %v3316_v18, 4 }
 0x528   :  { %v2779_v43 = vpop.f32.mrf.mxu2  ;;  %v3334_v62 = vperm.slane %v3330_v58, %v4079_v3  ;;  %v3345_v26 = vperm.slane %v3341_v8, %v4079_v3  ;;  %v3351_v54 = vperm.slane %v3347_v60, %v4079_v3  ;;  %v3312_v20 = vsel %vm219_vm1, %v3296_v28, %v3311_v49  ;;  %3529 = vmatpush.bf16.msrb.mxu2 %v3699_v56 }
 0x529   :  { %v3352_v24 = vrot.slane %v3339_v63, 4  ;;  %v5781_v52 = vsel %vm219_vm1, %v3321_v23, %v3304_v47  ;;  %v3320_v14 = vperm.slane %v3312_v20, %v4117_v35  ;;  %v3300_v55 = vsel %vm219_vm1, %v5734_v11, %v3299_v21 }
 0x52a   :  { %v3364_v29 = vrot.slane %v3351_v54, 4  ;;  %v3354_v13 = vrot.slane %v3334_v62, 4  ;;  %v3366_v45 = vrot.slane %v3345_v26, 4  ;;  %v3324_v51 = vsel %vm219_vm1, %v3316_v18, %v3323_v61 }
 0x52b   :  { %v3353_v42 = vsel %vm219_vm1, %v3352_v24, %v3334_v62  ;;  %v3325_v34 = vrot.slane %v3320_v14, 4  ;;  %v3308_v12 = vperm.slane %v3300_v55, %v4117_v35  ;;  %v3164_v62 = vperm.slane %v5749_v1, %v4079_v3 }
 0x52c   :  { %v3359_v2 = vperm.slane %v3353_v42, %v4117_v35  ;;  %v3365_v41 = vsel %vm219_vm1, %v3364_v29, %v3345_v26  ;;  %v3355_v48 = vsel %vm219_vm1, %v3339_v63, %v3354_v13  ;;  %v3367_v17 = vsel %vm219_vm1, %v3351_v54, %v3366_v45 }
 0x52d   :  { %v3371_v53 = vperm.slane %v3365_v41, %v4117_v35  ;;  %v3363_v38 = vperm.slane %v3355_v48, %v4117_v35  ;;  %v3375_v10 = vperm.slane %v3367_v17, %v4117_v35  ;;  %v3326_v16 = vsel %vm219_vm1, %v3325_v34, %v3308_v12 }
 0x52e   :  { %v3378_v5 = vrot.slane %v3359_v2, 4  ;;  %v3327_v31 = vrot.slane %v3308_v12, 4  ;;  %v3165_v24 = vrot.slane %v3164_v62, 4 }
 0x52f   :  { %v3376_v40 = vrot.slane %v3371_v53, 4  ;;  %v3380_v36 = vrot.slane %v3375_v10, 4  ;;  %v3382_v28 = vrot.slane %v3363_v38, 4 }
 0x530   :  { %v3379_v37 = vsel %vm219_vm1, %v3371_v53, %v3378_v5  ;;  %v3328_v15 = vsel %vm219_vm1, %v3320_v14, %v3327_v31 }
 0x531   :  { %v3859_v19 = vpack.i.bf16 %v3379_v37, %v3324_v51  ;;  %v3381_v11 = vsel %vm219_vm1, %v3380_v36, %v3363_v38  ;;  %v5799_v27 = vsel %vm219_vm1, %v3376_v40, %v3359_v2  ;;  %v3383_v32 = vsel %vm219_vm1, %v3375_v10, %v3382_v28 }
 0x532   :  { %v3864_v57 = vpack.i.bf16 %v3381_v11, %v3326_v16  ;;  %v3869_v4 = vpack.i.bf16 %v3383_v32, %v3328_v15 }
 0x533   :  { %3860 = vrot.lane.b32.xlu0 %v3859_v19, %s3982_s15 }
 0x534   :  { %3865 = vrot.lane.b32.xlu1 %v3864_v57, %s3980_s13 }
 0x537   :  { %v3856_v25 = vpop.permute.xlu2 %3855 }
 0x538   :  { %v3858_v59 = vunpack.i.h.bf16 %v3856_v25  ;;  %v3857_v60 = vunpack.i.l.bf16 %v3856_v25 }
 0x53b   :  { %3870 = vrot.lane.b32.xlu0 %v3869_v4, %s3981_s14 }
 0x54f   :  { %v3851_v50 = vpop.permute.xlu1 %3850 }
 0x550   :  { %v3853_v0 = vunpack.i.h.bf16 %v3851_v50  ;;  %v3852_v6 = vunpack.i.l.bf16 %v3851_v50 }
 0x551   :  { %v3846_v9 = vpop.permute.xlu0 %3845 }
 0x552   :  { %v3848_v7 = vunpack.i.h.bf16 %v3846_v9  ;;  %v3847_v39 = vunpack.i.l.bf16 %v3846_v9 }
 0x554   :  { %v3473_v18 = vsel %vm1891_vm2, %v5684_v22, %v3847_v39  ;;  %v3474_v58 = vsel %vm1891_vm2, %v5695_v44, %v3848_v7  ;;  %v3384_v22 = vsel %vm219_vm1, 0.0, %v5762_v30 }
 0x555   :  { %v3479_v63 = vsel %vm3478_vm6, %v3473_v18, %v3852_v6  ;;  %v3480_v8 = vsel %vm3478_vm6, %v3474_v58, %v3853_v0  ;;  %v3388_v49 = vperm.slane %v3384_v22, %v4079_v3 }
 0x556   :  { %v3485_v47 = vsel %vm3484_vm7, %v3479_v63, %v3857_v60  ;;  %v3486_v43 = vsel %vm3484_vm7, %v3480_v8, %v3858_v59 }
 0x557   :  { %v3490_v23 = vpack.c.bf16 %v3486_v43, %v3485_v47  ;;  %v3399_v61 = vrot.slane %v3388_v49, 4 }
 0x559   :  { %3694 = vmatmul.msk.bf16.vlgmr.msrb.gmra.mxu2 %vm135_vm0, %v3490_v23 }
 0x55c   :  { %v2865_v26 = vpop.f32.mrf.mxu0 }
 0x55d   :  { %v3153_v54 = vrot.slane %v2865_v26, 4 }
 0x55f   :  { %v3154_v44 = vsel %vm219_vm1, %v3153_v54, %v5751_v33 }
 0x560   :  { %v3158_v21 = vperm.slane %v3154_v44, %v4079_v3 }
 0x562   :  { %v3166_v29 = vsel %vm219_vm1, %v3165_v24, %v3158_v21 }
 0x563   :  { %v3392_v13 = vperm.slane %v3166_v29, %v4117_v35 }
 0x564   :  { %v2867_v45 = vpop.f32.mrf.mxu0 }
 0x565   :  { %v3396_v1 = vperm.slane %v3392_v13, %v4079_v3 }
 0x567   :  { %v3400_v42 = vsel %vm219_vm1, %v3396_v1, %v3399_v61  ;;  %v3397_v20 = vrot.slane %v3396_v1, 4 }
 0x568   :  { %v3408_v30 = vperm.slane %v3400_v42, %v4117_v35 }
 0x569   :  { %v3398_v33 = vsel %vm219_vm1, %v3397_v20, %v3388_v49 }
 0x56a   :  { %3446 = vrot.lane.b32.xlu1 %v3408_v30, %s3980_s13  ;;  %v3411_v2 = vrot.slane %v3408_v30, 4  ;;  %v3404_v41 = vperm.slane %v3398_v33, %v4117_v35 }
 0x56c   :  { %v3412_v14 = vsel %vm219_vm1, 0.0, %v3411_v2  ;;  %v3409_v48 = vrot.slane %v3404_v41, 4 }
 0x56d   :  { %3466 = vrot.lane.b32.xlu0 %v3412_v14, %s3981_s14 }
 0x56e   :  { %v3410_v3 = vsel %vm219_vm1, 0.0, %v3409_v48 }
 0x56f   :  { %3426 = vrot.lane.b32.xlu2 %v3410_v3, %s3982_s15 }
 0x5a5   :  { %v3861_v53 = vpop.permute.xlu0 %3860 }
 0x5a6   :  { %v3866_v55 = vpop.permute.xlu1 %3865  ;;  %v3863_v17 = vunpack.i.h.bf16 %v3861_v53  ;;  %v3862_v5 = vunpack.i.l.bf16 %v3861_v53 }
 0x5a7   :  { %v3868_v34 = vunpack.i.h.bf16 %v3866_v55  ;;  %v3867_v38 = vunpack.i.l.bf16 %v3866_v55 }
 0x5a8   :  { %v3475_v40 = vsel %vm1891_vm2, %v5781_v52, %v3862_v5  ;;  %v3476_v35 = vsel %vm1891_vm2, %v5799_v27, %v3863_v17  ;;  %v5853_v52 = vld [vmem:[%s5892_s4] ss:$0 sm:$0xff] }
 0x5a9   :  { %v3481_v12 = vsel %vm3478_vm6, %v3475_v40, %v3867_v38  ;;  %v3482_v36 = vsel %vm3478_vm6, %v3476_v35, %v3868_v34 }
 0x5ad   :  { %v3871_v10 = vpop.permute.xlu0 %3870 }
 0x5ae   :  { %v3873_v51 = vunpack.i.h.bf16 %v3871_v10  ;;  %v3872_v37 = vunpack.i.l.bf16 %v3871_v10 }
 0x5b0   :  { %v3487_v19 = vsel %vm3484_vm7, %v3481_v12, %v3872_v37  ;;  %v3488_v16 = vsel %vm3484_vm7, %v3482_v36, %v3873_v51 }
 0x5b1   :  { %v3491_v11 = vpack.c.bf16 %v3488_v16, %v3487_v19 }
 0x5b3   :  { %3695 = vmatmul.msk.bf16.gmra.mxu2 %vm135_vm0, %v3491_v11 }
 0x5c9   :  { %v3427_v28 = vpop.permute.xlu2 %3426 }
 0x5ca   :  { %v3477_v32 = vsel %vm1891_vm2, %v3404_v41, %v3427_v28 }
 0x5dc   :  { %v3531_v27 = vpop.f32.mrf.mxu2  ;;  %v3447_v57 = vpop.permute.xlu1 %3446 }
 0x5dd   :  { %v3532_v31 = vadd.f32 %v5853_v52, %v3531_v27  ;;  %v3483_v56 = vsel %vm3478_vm6, %v3477_v32, %v3447_v57 }
 0x5df   :  { %v3550_v46 = vrot.slane %v3532_v31, 1  ;;  %v3551_v15 = vrot.slane %v3532_v31, 2  ;;  %v3552_v4 = vrot.slane %v3532_v31, 3  ;;  %3579 = vst [vmem:[#allocation1] ss:$9 sm:$0xff] %v3532_v31  ;;  %v3467_v50 = vpop.permute.xlu0 %3466  ;;  %v3553_v25 = vrot.slane %v3532_v31, 4 }
 0x5e0   :  { %v3489_v9 = vsel %vm3484_vm7, %v3483_v56, %v3467_v50  ;;  %v3554_v7 = vrot.slane %v3532_v31, 5  ;;  %v3555_v0 = vrot.slane %v3532_v31, 6  ;;  %v3556_v6 = vrot.slane %v3532_v31, 7 }
 0x5e1   :  { %3581 = vst [vmem:[#allocation1 + $0x1] ss:$9 sm:$0xff] %v3550_v46  ;;  %v3492_v39 = vpack.c.bf16 %v3489_v9, %v3489_v9 }
 0x5e2   :  { %3583 = vst [vmem:[#allocation1 + $0x2] ss:$9 sm:$0xff] %v3551_v15 }
 0x5e3   :  { %3585 = vst [vmem:[#allocation1 + $0x3] ss:$9 sm:$0xff] %v3552_v4  ;;  %3696 = vmatmul.msk.bf16.gmra.mxu2 %vm135_vm0, %v3492_v39 }
 0x5e4   :  { %3587 = vst [vmem:[#allocation1 + $0x4] ss:$9 sm:$0xff] %v3553_v25  ;;  %v3533_v59 = vpop.f32.mrf.mxu2 }
 0x5e5   :  { %3589 = vst [vmem:[#allocation1 + $0x5] ss:$9 sm:$0xff] %v3554_v7  ;;  %v3534_v60 = vadd.f32 %v5853_v52, %v3533_v59 }
 0x5e6   :  { %3591 = vst [vmem:[#allocation1 + $0x6] ss:$9 sm:$0xff] %v3555_v0 }
 0x5e7   :  { %3593 = vst [vmem:[#allocation1 + $0x7] ss:$9 sm:$0xff] %v3556_v6  ;;  %v3557_v18 = vrot.slane %v3534_v60, 1  ;;  %v3558_v58 = vrot.slane %v3534_v60, 2  ;;  %v3559_v8 = vrot.slane %v3534_v60, 3  ;;  %v3560_v47 = vrot.slane %v3534_v60, 4 }
 0x5e8   :  { %v3561_v43 = vrot.slane %v3534_v60, 5  ;;  %v3562_v23 = vrot.slane %v3534_v60, 6  ;;  %v3563_v62 = vrot.slane %v3534_v60, 7 }
 0x5ee   :  { %v3594_v63 = vld [vmem:[#allocation1] sm:$0xff] }
 0x5ef   :  { %3595 = vst [vmem:[#allocation1] ss:$9 sm:$0xff] %v3534_v60 }
 0x5f0   :  { %3596 = vst [vmem:[#allocation1 + $0x1] ss:$9 sm:$0xff] %v3557_v18 }
 0x5f1   :  { %3597 = vst [vmem:[#allocation1 + $0x2] ss:$9 sm:$0xff] %v3558_v58 }
 0x5f2   :  { %3598 = vst [vmem:[#allocation1 + $0x3] ss:$9 sm:$0xff] %v3559_v8 }
 0x5f3   :  { %3599 = vst [vmem:[#allocation1 + $0x4] ss:$9 sm:$0xff] %v3560_v47 }
 0x5f4   :  { %3600 = vst [vmem:[#allocation1 + $0x5] ss:$9 sm:$0xff] %v3561_v43 }
 0x5f5   :  { %3601 = vst [vmem:[#allocation1 + $0x6] ss:$9 sm:$0xff] %v3562_v23 }
 0x5f6   :  { %3602 = vst [vmem:[#allocation1 + $0x7] ss:$9 sm:$0xff] %v3563_v62 }
 0x5f7   :  { %3632 = vst.msk [vmem:[%s5893_s5] sm:$0xff] %vm135_vm0, %v3594_v63 }
 0x5fd   :  { %v3603_v26 = vld [vmem:[#allocation1] sm:$0xff] }
 0x5fe   :  { %3633 = vst.msk [vmem:[%s5893_s5 + $0x8] sm:$0xff] %vm135_vm0, %v3603_v26 }
 0x636   :  { %v3536_v54 = vpop.f32.mrf.mxu2 }
 0x637   :  { %v3537_v22 = vadd.f32 %v5853_v52, %v3536_v54 }
 0x639   :  { %3604 = vst [vmem:[#allocation1] ss:$9 sm:$0xff] %v3537_v22  ;;  %v3564_v44 = vrot.slane %v3537_v22, 1  ;;  %v3565_v24 = vrot.slane %v3537_v22, 2  ;;  %v3566_v49 = vrot.slane %v3537_v22, 3  ;;  %v3567_v13 = vrot.slane %v3537_v22, 4 }
 0x63a   :  { %v3568_v45 = vrot.slane %v3537_v22, 5  ;;  %v3569_v1 = vrot.slane %v3537_v22, 6  ;;  %v3570_v42 = vrot.slane %v3537_v22, 7 }
 0x63e   :  { %v3538_v29 = vpop.f32.mrf.mxu2 }
 0x63f   :  { %v3539_v61 = vadd.f32 %v5853_v52, %v3538_v29 }
 0x640   :  { %v3605_v21 = vld [vmem:[#allocation1] sm:$0xff] }
 0x641   :  { %3606 = vst [vmem:[#allocation1] ss:$9 sm:$0xff] %v3564_v44  ;;  %v3571_v20 = vrot.slane %v3539_v61, 1  ;;  %v3572_v30 = vrot.slane %v3539_v61, 2  ;;  %v3573_v2 = vrot.slane %v3539_v61, 3  ;;  %v3574_v41 = vrot.slane %v3539_v61, 4 }
 0x642   :  { %3607 = vst [vmem:[#allocation1 + $0x1] ss:$9 sm:$0xff] %v3565_v24  ;;  %v3575_v14 = vrot.slane %v3539_v61, 5  ;;  %v3576_v48 = vrot.slane %v3539_v61, 6  ;;  %v3577_v3 = vrot.slane %v3539_v61, 7 }
 0x643   :  { %3608 = vst [vmem:[#allocation1 + $0x2] ss:$9 sm:$0xff] %v3566_v49 }
 0x644   :  { %3609 = vst [vmem:[#allocation1 + $0x3] ss:$9 sm:$0xff] %v3567_v13 }
 0x645   :  { %3610 = vst [vmem:[#allocation1 + $0x4] ss:$9 sm:$0xff] %v3568_v45 }
 0x646   :  { %3611 = vst [vmem:[#allocation1 + $0x5] ss:$9 sm:$0xff] %v3569_v1 }
 0x647   :  { %3612 = vst [vmem:[#allocation1 + $0x6] ss:$9 sm:$0xff] %v3570_v42 }
 0x648   :  { %3613 = vst [vmem:[#allocation1 + $0x7] ss:$9 sm:$0xff] %v3539_v61 }
 0x649   :  { %3635 = vst.msk [vmem:[%s5893_s5 + $0x10] sm:$0x1] %vm3634_vm8, %v3605_v21 }
 0x64f   :  { %v3614_v33 = vld [vmem:[#allocation1] sm:$0xff] }
 0x650   :  { %3615 = vst [vmem:[#allocation1] ss:$9 sm:$0xff] %v3571_v20 }
 0x651   :  { %3616 = vst [vmem:[#allocation1 + $0x1] ss:$9 sm:$0xff] %v3572_v30 }
 0x652   :  { %3617 = vst [vmem:[#allocation1 + $0x2] ss:$9 sm:$0xff] %v3573_v2 }
 0x653   :  { %3618 = vst [vmem:[#allocation1 + $0x3] ss:$9 sm:$0xff] %v3574_v41 }
 0x654   :  { %3619 = vst [vmem:[#allocation1 + $0x4] ss:$9 sm:$0xff] %v3575_v14 }
 0x655   :  { %3620 = vst [vmem:[#allocation1 + $0x5] ss:$9 sm:$0xff] %v3576_v48 }
 0x656   :  { %3621 = vst [vmem:[#allocation1 + $0x6] ss:$9 sm:$0xff] %v3577_v3 }
 0x657   :  { %3636 = vst.msk [vmem:[%s5893_s5 + $0x18] sm:$0xff] %vm135_vm0, %v3614_v33 }
 0x666   :  { %v3541_v53 = vpop.f32.mrf.mxu2 }
 0x667   :  { %v3542_v55 = vadd.f32 %v5853_v52, %v3541_v53 }
 0x669   :  { %3622 = vst [vmem:[#allocation1 + $0x7] ss:$9 sm:$0xff] %v3542_v55  ;;  %v3578_v5 = vrot.slane %v3542_v55, 1 }
 0x66e   :  { %v3543_v17 = vpop.f32.mrf.mxu2 }
 0x670   :  { %v3623_v34 = vld [vmem:[#allocation1] sm:$0xff] }
 0x671   :  { %3624 = vst [vmem:[#allocation1] ss:$9 sm:$0xff] %v3578_v5 }
 0x672   :  { %3637 = vst.msk [vmem:[%s5893_s5 + $0x20] sm:$0xff] %vm135_vm0, %v3623_v34 }
 0x678   :  { %v3625_v38 = vld [vmem:[#allocation1] sm:$0xff] }
 0x679   :  { %3638 = vst.msk [vmem:[%s5893_s5 + $0x28] sm:$0x1] %vm3634_vm8, %v3625_v38 }

</bundles_post_ra>
